<compile_context>
chip_gen: v7x
topology: tpu7x:2x2x1
jax: 0.10.0
libtpu: 0.0.40
codegen_flags: <defaults>
</compile_context>

<pallas_src>
import functools

import jax
import jax.numpy as jnp
import numpy as np
from jax.experimental import pallas as pl
from jax.experimental.pallas import tpu as pltpu


def _res3d_kernel(w1_ref, b1_ref, w2_ref, b2_ref,
                  xprev_ref, xmid_ref, xnext_ref,
                  out_ref, canvas_ref, *, nf, td):
    # Shapes seen by the kernel (d0 = program_id(1) * td):
    #   xprev_ref : (H, W)        x[n, max(d0-1, 0)]
    #   xmid_ref  : (td, H, W)    x[n, d0 : d0+td]   (plane dd is also the residual)
    #   xnext_ref : (H, W)        x[n, min(d0+td, D-1)]
    #   out_ref   : (td, H, W)
    #   canvas_ref: (H+16, W+136) VMEM scratch; data parked at [8:8+H, 128:128+W]
    #   w1_ref (nf, 3), b1_ref (nf,), w2_ref (nf, 9), b2_ref (1,)      -- SMEM
    t = pl.program_id(1)
    n_t = pl.num_programs(1)
    _, H, W = out_ref.shape
    R0, C0 = 8, 128      # tile-aligned top-left corner of the parked data

    # Zero the canvas once per grid step.  Only [R0:R0+H, C0:C0+W] is ever
    # written below, so the 1-element ring around it stays zero and implements
    # the (0,1,1) zero padding of the post-ReLU tensor exactly.
    canvas_ref[...] = jnp.zeros(canvas_ref.shape, jnp.float32)

    b2 = b2_ref[0]

    for dd in range(td):          # td is small and static -> unrolled
        # Depth taps d-1, d, d+1 for output depth d = t*td + dd.  At the volume
        # boundary PyTorch's (1,0,0) padding supplies a zero plane, so the
        # clamped neighbour plane is multiplied by a {0,1} scalar.
        if dd == 0:
            xa = xprev_ref[...] * (t > 0).astype(jnp.float32)
        else:
            xa = xmid_ref[dd - 1]
        xb = xmid_ref[dd]
        if dd == td - 1:
            xc = xnext_ref[...] * (t < n_t - 1).astype(jnp.float32)
        else:
            xc = xmid_ref[dd + 1]

        # Feature loop: Conv3d(1->F,(3,1,1)) + bias + ReLU, immediately reduced
        # over features into nine (H, W) tap accumulators (pure VPU work, no
        # shifted slices inside this loop).
        # TODO(synk): for large n_feats switch to lax.fori_loop(unroll=k) over a
        # stacked (9, H, W) carry to bound vreg live ranges; on v6e a bf16
        # compute path / MXU im2col for the F-reduction is a further option.
        z = [jnp.zeros((H, W), jnp.float32) for _ in range(9)]
        for f in range(nf):
            y = jnp.maximum(
                w1_ref[f, 0] * xa + w1_ref[f, 1] * xb + w1_ref[f, 2] * xc
                + b1_ref[f], 0.0)
            for k in range(9):
                z[k] = z[k] + w2_ref[f, k] * y

        # Conv3d(F->1,(1,3,3)) + bias + residual: nine shifted slices in total.
        # Each z_k is parked at the tile-aligned corner of the zero canvas and
        # read back with a (i-1, j-1) offset; the zero ring gives the exact
        # zero-padding of the second conv.
        acc = xb + b2 + z[4]                      # centre tap needs no shift
        for i in range(3):
            for j in range(3):
                if i == 1 and j == 1:
                    continue
                canvas_ref[R0:R0 + H, C0:C0 + W] = z[3 * i + j]
                acc = acc + canvas_ref[R0 + i - 1:R0 + i - 1 + H,
                                       C0 + j - 1:C0 + j - 1 + W]

        out_ref[dd] = acc.astype(out_ref.dtype)


def res3d_block(x, w1, b1, w2, b2, *, depth_tile=None):
    """Pallas implementation of Res3DBlock.forward.

    x : (N, D, H, W)  -- D is the spectral/band (Conv3d depth) axis
    w1: (F, 1, 3, 1, 1), b1: (F,)   -- Conv3d(1, F, (3,1,1), pad (1,0,0))
    w2: (1, F, 1, 3, 3), b2: (1,)   -- Conv3d(F, 1, (1,3,3), pad (0,1,1))
    """
    N, D, H, W = x.shape
    nf = w1.shape[0]

    # Depth tile: bigger tiles amortize per-grid-step overhead and make each
    # output block (td, H, W) large, while VMEM stays O(td + 2) planes,
    # independent of D.  td must divide D (falls back to 1 for e.g. prime D).
    if depth_tile is None:
        depth_tile = max(t for t in range(1, min(D, 8) + 1) if D % t == 0)
    td = int(depth_tile)
    if D % td != 0:
        raise ValueError(f"depth_tile={td} must divide D={D}")
    n_tiles = D // td

    w1f = w1.reshape(nf, 3).astype(jnp.float32)
    w2f = w2.reshape(nf, 9).astype(jnp.float32)
    b1f = b1.astype(jnp.float32)
    b2f = b2.astype(jnp.float32)

    smem = pl.BlockSpec(memory_space=pltpu.MemorySpace.SMEM)
    kernel = functools.partial(_res3d_kernel, nf=nf, td=td)

    # Explicit VMEM budget: double-buffered input/output blocks + canvas +
    # headroom for in-flight accumulators, clamped to limits safe on all gens.
    est = 4 * ((2 * td + 4) * H * W + 2 * td * H * W
               + (H + 16) * (W + 136) + 12 * H * W)
    vmem_limit = int(min(max(2 * est, 32 * 1024 * 1024), 64 * 1024 * 1024))

    return pl.pallas_call(
        kernel,
        out_shape=jax.ShapeDtypeStruct((N, D, H, W), x.dtype),
        grid_spec=pltpu.PrefetchScalarGridSpec(
            num_scalar_prefetch=0,
            grid=(N, n_tiles),
            in_specs=[
                smem, smem, smem, smem,
                # plane x[n, d0-1] (clamped at the front edge; the kernel zeroes
                # its contribution when d0 == 0)
                pl.BlockSpec((None, None, H, W),
                             lambda n, t: (n, jnp.maximum(t * td - 1, 0), 0, 0)),
                # planes x[n, d0 : d0+td]; plane dd doubles as the residual
                pl.BlockSpec((None, td, H, W), lambda n, t: (n, t, 0, 0)),
                # plane x[n, d0+td] (clamped at the back edge; zeroed in-kernel)
                pl.BlockSpec((None, None, H, W),
                             lambda n, t: (n, jnp.minimum(t * td + td, D - 1),
                                           0, 0)),
            ],
            out_specs=pl.BlockSpec((None, td, H, W), lambda n, t: (n, t, 0, 0)),
            scratch_shapes=[pltpu.VMEM((H + 16, W + 136), jnp.float32)],
        ),
        compiler_params=pltpu.CompilerParams(
            dimension_semantics=("parallel", "parallel"),
            vmem_limit_bytes=vmem_limit),
    )(w1f, b1f, w2f, b2f, x, x, x)


def res3d_ref(x, w1, b1, w2, b2):
    """Pure-JAX reference matching PyTorch Conv3d semantics (cross-correlation)."""
    N, D, H, W = x.shape
    nf = w1.shape[0]
    w1f = w1.reshape(nf, 3)
    w2f = w2.reshape(nf, 3, 3)
    # Conv3d(1->F, (3,1,1), pad (1,0,0))
    xpd = jnp.pad(x, ((0, 0), (1, 1), (0, 0), (0, 0)))
    y1 = sum(w1f[:, k][None, :, None, None, None] * xpd[:, None, k:k + D]
             for k in range(3))
    y1 = y1 + b1[None, :, None, None, None]
    y2 = jnp.maximum(y1, 0.0)
    # Conv3d(F->1, (1,3,3), pad (0,1,1))
    y2p = jnp.pad(y2, ((0, 0), (0, 0), (0, 0), (1, 1), (1, 1)))
    out = jnp.zeros_like(x)
    for i in range(3):
        for j in range(3):
            out = out + jnp.einsum('f,nfdhw->ndhw', w2f[:, i, j],
                                   y2p[:, :, :, i:i + H, j:j + W])
    return out + b2[0] + x


if __name__ == "__main__":
    N, D, H, W = 2, 8, 16, 16   # (batch, spectral bands, height, width)
    NF = 4                      # n_feats

    key = jax.random.PRNGKey(0)
    k1, k2, k3, k4, k5 = jax.random.split(key, 5)
    w1 = jax.random.normal(k1, (NF, 1, 3, 1, 1), jnp.float32) * 0.5
    b1 = jax.random.normal(k2, (NF,), jnp.float32) * 0.1
    w2 = jax.random.normal(k3, (1, NF, 1, 3, 3), jnp.float32) * 0.2
    b2 = jax.random.normal(k4, (1,), jnp.float32) * 0.1
    x = jax.random.normal(k5, (N, D, H, W), jnp.float32)

    # depth_tile=4 -> grid (2, 2): exercises both the interior depth-tap path
    # and the zeroed volume-boundary path.
    out = jax.block_until_ready(res3d_block(x, w1, b1, w2, b2, depth_tile=4))
    ref = jax.block_until_ready(res3d_ref(x, w1, b1, w2, b2))

    np.testing.assert_allclose(np.asarray(out), np.asarray(ref),
                               rtol=1e-5, atol=1e-5)
    print("KERNEL_OK")
</pallas_src>

<mosaic_0001>
module attributes {stable_mosaic.version = 11 : i64} {
  func.func @_res3d_kernel(%arg0: i32, %arg1: i32, %arg2: memref<4x3xf32, #tpu.memory_space<smem>>, %arg3: memref<4xf32, #tpu.memory_space<smem>>, %arg4: memref<4x9xf32, #tpu.memory_space<smem>>, %arg5: memref<1xf32, #tpu.memory_space<smem>>, %arg6: memref<1x1x16x16xf32, #tpu.memory_space<vmem>>, %arg7: memref<1x4x16x16xf32, #tpu.memory_space<vmem>>, %arg8: memref<1x1x16x16xf32, #tpu.memory_space<vmem>>, %arg9: memref<1x4x16x16xf32, #tpu.memory_space<vmem>>, %arg10: memref<32x152xf32, #tpu.memory_space<vmem>>) attributes {dimension_semantics = [#tpu.dimension_semantics<parallel>, #tpu.dimension_semantics<parallel>], iteration_bounds = array<i64: 2, 2>, scalar_prefetch = 0 : i64, scratch_operands = 1 : i64, tpu.core_type = #tpu.core_type<tc>, window_params = [{transform_indices = @transform_0, window_bounds = array<i64: 4, 3>}, {transform_indices = @transform_1, window_bounds = array<i64: 4>}, {transform_indices = @transform_2, window_bounds = array<i64: 4, 9>}, {transform_indices = @transform_3, window_bounds = array<i64: 1>}, {transform_indices = @transform_4, window_bounds = array<i64: 1, 1, 16, 16>}, {transform_indices = @transform_5, window_bounds = array<i64: 1, 4, 16, 16>}, {transform_indices = @transform_6, window_bounds = array<i64: 1, 1, 16, 16>}, {transform_indices = @transform_7, window_bounds = array<i64: 1, 4, 16, 16>}]} {
    %cst = arith.constant 0.000000e+00 : f32
    %0 = vector.broadcast %cst : f32 to vector<32x152xf32>
    %c0 = arith.constant 0 : index
    %c0_0 = arith.constant 0 : index
    %1 = vector.load %arg10[%c0, %c0_0] : memref<32x152xf32, #tpu.memory_space<vmem>>, vector<32x152xf32>
    tpu.vector_store %arg10[%c0, %c0_0], %0 {strides = array<i32>} : memref<32x152xf32, #tpu.memory_space<vmem>>, vector<32x152xf32>,
    %c0_1 = arith.constant 0 : index
    %2 = memref.load %arg5[%c0_1] : memref<1xf32, #tpu.memory_space<smem>>
    %c0_2 = arith.constant 0 : index
    %c0_3 = arith.constant 0 : index
    %c0_4 = arith.constant 0 : index
    %c0_5 = arith.constant 0 : index
    %3 = vector.load %arg6[%c0_2, %c0_3, %c0_4, %c0_5] : memref<1x1x16x16xf32, #tpu.memory_space<vmem>>, vector<1x1x16x16xf32>
    %4 = vector.shape_cast %3 : vector<1x1x16x16xf32> to vector<16x16xf32>
    %c0_i32 = arith.constant 0 : i32
    %5 = arith.cmpi sgt, %arg1, %c0_i32 : i32
    %6 = arith.extui %5 : i1 to i32
    %7 = arith.sitofp %6 : i32 to f32
    %8 = vector.broadcast %7 : f32 to vector<16x16xf32>
    %9 = arith.mulf %4, %8 : vector<16x16xf32>
    %c0_6 = arith.constant 0 : index
    %c0_7 = arith.constant 0 : index
    %c0_8 = arith.constant 0 : index
    %c0_9 = arith.constant 0 : index
    %10 = vector.load %arg7[%c0_6, %c0_7, %c0_8, %c0_9] : memref<1x4x16x16xf32, #tpu.memory_space<vmem>>, vector<1x1x16x16xf32>
    %11 = vector.shape_cast %10 : vector<1x1x16x16xf32> to vector<16x16xf32>
    %c0_10 = arith.constant 0 : index
    %c1 = arith.constant 1 : index
    %c0_11 = arith.constant 0 : index
    %c0_12 = arith.constant 0 : index
    %12 = vector.load %arg7[%c0_10, %c1, %c0_11, %c0_12] : memref<1x4x16x16xf32, #tpu.memory_space<vmem>>, vector<1x1x16x16xf32>
    %13 = vector.shape_cast %12 : vector<1x1x16x16xf32> to vector<16x16xf32>
    %cst_13 = arith.constant 0.000000e+00 : f32
    %14 = vector.broadcast %cst_13 : f32 to vector<16x16xf32>
    %cst_14 = arith.constant 0.000000e+00 : f32
    %15 = vector.broadcast %cst_14 : f32 to vector<16x16xf32>
    %cst_15 = arith.constant 0.000000e+00 : f32
    %16 = vector.broadcast %cst_15 : f32 to vector<16x16xf32>
    %cst_16 = arith.constant 0.000000e+00 : f32
    %17 = vector.broadcast %cst_16 : f32 to vector<16x16xf32>
    %cst_17 = arith.constant 0.000000e+00 : f32
    %18 = vector.broadcast %cst_17 : f32 to vector<16x16xf32>
    %cst_18 = arith.constant 0.000000e+00 : f32
    %19 = vector.broadcast %cst_18 : f32 to vector<16x16xf32>
    %cst_19 = arith.constant 0.000000e+00 : f32
    %20 = vector.broadcast %cst_19 : f32 to vector<16x16xf32>
    %cst_20 = arith.constant 0.000000e+00 : f32
    %21 = vector.broadcast %cst_20 : f32 to vector<16x16xf32>
    %cst_21 = arith.constant 0.000000e+00 : f32
    %22 = vector.broadcast %cst_21 : f32 to vector<16x16xf32>
    %c0_22 = arith.constant 0 : index
    %c0_23 = arith.constant 0 : index
    %23 = memref.load %arg2[%c0_22, %c0_23] : memref<4x3xf32, #tpu.memory_space<smem>>
    %24 = vector.broadcast %23 : f32 to vector<16x16xf32>
    %25 = arith.mulf %24, %9 : vector<16x16xf32>
    %c0_24 = arith.constant 0 : index
    %c1_25 = arith.constant 1 : index
    %26 = memref.load %arg2[%c0_24, %c1_25] : memref<4x3xf32, #tpu.memory_space<smem>>
    %27 = vector.broadcast %26 : f32 to vector<16x16xf32>
    %28 = arith.mulf %27, %11 : vector<16x16xf32>
    %29 = arith.addf %25, %28 : vector<16x16xf32>
    %c0_26 = arith.constant 0 : index
    %c2 = arith.constant 2 : index
    %30 = memref.load %arg2[%c0_26, %c2] : memref<4x3xf32, #tpu.memory_space<smem>>
    %31 = vector.broadcast %30 : f32 to vector<16x16xf32>
    %32 = arith.mulf %31, %13 : vector<16x16xf32>
    %33 = arith.addf %29, %32 : vector<16x16xf32>
    %c0_27 = arith.constant 0 : index
    %34 = memref.load %arg3[%c0_27] : memref<4xf32, #tpu.memory_space<smem>>
    %35 = vector.broadcast %34 : f32 to vector<16x16xf32>
    %36 = arith.addf %33, %35 : vector<16x16xf32>
    %cst_28 = arith.constant 0.000000e+00 : f32
    %37 = vector.broadcast %cst_28 : f32 to vector<16x16xf32>
    %38 = arith.maximumf %36, %37 : vector<16x16xf32>
    %c0_29 = arith.constant 0 : index
    %c0_30 = arith.constant 0 : index
    %39 = memref.load %arg4[%c0_29, %c0_30] : memref<4x9xf32, #tpu.memory_space<smem>>
    %40 = vector.broadcast %39 : f32 to vector<16x16xf32>
    %41 = arith.mulf %40, %38 : vector<16x16xf32>
    %42 = arith.addf %14, %41 : vector<16x16xf32>
    %c0_31 = arith.constant 0 : index
    %c1_32 = arith.constant 1 : index
    %43 = memref.load %arg4[%c0_31, %c1_32] : memref<4x9xf32, #tpu.memory_space<smem>>
    %44 = vector.broadcast %43 : f32 to vector<16x16xf32>
    %45 = arith.mulf %44, %38 : vector<16x16xf32>
    %46 = arith.addf %15, %45 : vector<16x16xf32>
    %c0_33 = arith.constant 0 : index
    %c2_34 = arith.constant 2 : index
    %47 = memref.load %arg4[%c0_33, %c2_34] : memref<4x9xf32, #tpu.memory_space<smem>>
    %48 = vector.broadcast %47 : f32 to vector<16x16xf32>
    %49 = arith.mulf %48, %38 : vector<16x16xf32>
    %50 = arith.addf %16, %49 : vector<16x16xf32>
    %c0_35 = arith.constant 0 : index
    %c3 = arith.constant 3 : index
    %51 = memref.load %arg4[%c0_35, %c3] : memref<4x9xf32, #tpu.memory_space<smem>>
    %52 = vector.broadcast %51 : f32 to vector<16x16xf32>
    %53 = arith.mulf %52, %38 : vector<16x16xf32>
    %54 = arith.addf %17, %53 : vector<16x16xf32>
    %c0_36 = arith.constant 0 : index
    %c4 = arith.constant 4 : index
    %55 = memref.load %arg4[%c0_36, %c4] : memref<4x9xf32, #tpu.memory_space<smem>>
    %56 = vector.broadcast %55 : f32 to vector<16x16xf32>
    %57 = arith.mulf %56, %38 : vector<16x16xf32>
    %58 = arith.addf %18, %57 : vector<16x16xf32>
    %c0_37 = arith.constant 0 : index
    %c5 = arith.constant 5 : index
    %59 = memref.load %arg4[%c0_37, %c5] : memref<4x9xf32, #tpu.memory_space<smem>>
    %60 = vector.broadcast %59 : f32 to vector<16x16xf32>
    %61 = arith.mulf %60, %38 : vector<16x16xf32>
    %62 = arith.addf %19, %61 : vector<16x16xf32>
    %c0_38 = arith.constant 0 : index
    %c6 = arith.constant 6 : index
    %63 = memref.load %arg4[%c0_38, %c6] : memref<4x9xf32, #tpu.memory_space<smem>>
    %64 = vector.broadcast %63 : f32 to vector<16x16xf32>
    %65 = arith.mulf %64, %38 : vector<16x16xf32>
    %66 = arith.addf %20, %65 : vector<16x16xf32>
    %c0_39 = arith.constant 0 : index
    %c7 = arith.constant 7 : index
    %67 = memref.load %arg4[%c0_39, %c7] : memref<4x9xf32, #tpu.memory_space<smem>>
    %68 = vector.broadcast %67 : f32 to vector<16x16xf32>
    %69 = arith.mulf %68, %38 : vector<16x16xf32>
    %70 = arith.addf %21, %69 : vector<16x16xf32>
    %c0_40 = arith.constant 0 : index
    %c8 = arith.constant 8 : index
    %71 = memref.load %arg4[%c0_40, %c8] : memref<4x9xf32, #tpu.memory_space<smem>>
    %72 = vector.broadcast %71 : f32 to vector<16x16xf32>
    %73 = arith.mulf %72, %38 : vector<16x16xf32>
    %74 = arith.addf %22, %73 : vector<16x16xf32>
    %c1_41 = arith.constant 1 : index
    %c0_42 = arith.constant 0 : index
    %75 = memref.load %arg2[%c1_41, %c0_42] : memref<4x3xf32, #tpu.memory_space<smem>>
    %76 = vector.broadcast %75 : f32 to vector<16x16xf32>
    %77 = arith.mulf %76, %9 : vector<16x16xf32>
    %c1_43 = arith.constant 1 : index
    %c1_44 = arith.constant 1 : index
    %78 = memref.load %arg2[%c1_43, %c1_44] : memref<4x3xf32, #tpu.memory_space<smem>>
    %79 = vector.broadcast %78 : f32 to vector<16x16xf32>
    %80 = arith.mulf %79, %11 : vector<16x16xf32>
    %81 = arith.addf %77, %80 : vector<16x16xf32>
    %c1_45 = arith.constant 1 : index
    %c2_46 = arith.constant 2 : index
    %82 = memref.load %arg2[%c1_45, %c2_46] : memref<4x3xf32, #tpu.memory_space<smem>>
    %83 = vector.broadcast %82 : f32 to vector<16x16xf32>
    %84 = arith.mulf %83, %13 : vector<16x16xf32>
    %85 = arith.addf %81, %84 : vector<16x16xf32>
    %c1_47 = arith.constant 1 : index
    %86 = memref.load %arg3[%c1_47] : memref<4xf32, #tpu.memory_space<smem>>
    %87 = vector.broadcast %86 : f32 to vector<16x16xf32>
    %88 = arith.addf %85, %87 : vector<16x16xf32>
    %cst_48 = arith.constant 0.000000e+00 : f32
    %89 = vector.broadcast %cst_48 : f32 to vector<16x16xf32>
    %90 = arith.maximumf %88, %89 : vector<16x16xf32>
    %c1_49 = arith.constant 1 : index
    %c0_50 = arith.constant 0 : index
    %91 = memref.load %arg4[%c1_49, %c0_50] : memref<4x9xf32, #tpu.memory_space<smem>>
    %92 = vector.broadcast %91 : f32 to vector<16x16xf32>
    %93 = arith.mulf %92, %90 : vector<16x16xf32>
    %94 = arith.addf %42, %93 : vector<16x16xf32>
    %c1_51 = arith.constant 1 : index
    %c1_52 = arith.constant 1 : index
    %95 = memref.load %arg4[%c1_51, %c1_52] : memref<4x9xf32, #tpu.memory_space<smem>>
    %96 = vector.broadcast %95 : f32 to vector<16x16xf32>
    %97 = arith.mulf %96, %90 : vector<16x16xf32>
    %98 = arith.addf %46, %97 : vector<16x16xf32>
    %c1_53 = arith.constant 1 : index
    %c2_54 = arith.constant 2 : index
    %99 = memref.load %arg4[%c1_53, %c2_54] : memref<4x9xf32, #tpu.memory_space<smem>>
    %100 = vector.broadcast %99 : f32 to vector<16x16xf32>
    %101 = arith.mulf %100, %90 : vector<16x16xf32>
    %102 = arith.addf %50, %101 : vector<16x16xf32>
    %c1_55 = arith.constant 1 : index
    %c3_56 = arith.constant 3 : index
    %103 = memref.load %arg4[%c1_55, %c3_56] : memref<4x9xf32, #tpu.memory_space<smem>>
    %104 = vector.broadcast %103 : f32 to vector<16x16xf32>
    %105 = arith.mulf %104, %90 : vector<16x16xf32>
    %106 = arith.addf %54, %105 : vector<16x16xf32>
    %c1_57 = arith.constant 1 : index
    %c4_58 = arith.constant 4 : index
    %107 = memref.load %arg4[%c1_57, %c4_58] : memref<4x9xf32, #tpu.memory_space<smem>>
    %108 = vector.broadcast %107 : f32 to vector<16x16xf32>
    %109 = arith.mulf %108, %90 : vector<16x16xf32>
    %110 = arith.addf %58, %109 : vector<16x16xf32>
    %c1_59 = arith.constant 1 : index
    %c5_60 = arith.constant 5 : index
    %111 = memref.load %arg4[%c1_59, %c5_60] : memref<4x9xf32, #tpu.memory_space<smem>>
    %112 = vector.broadcast %111 : f32 to vector<16x16xf32>
    %113 = arith.mulf %112, %90 : vector<16x16xf32>
    %114 = arith.addf %62, %113 : vector<16x16xf32>
    %c1_61 = arith.constant 1 : index
    %c6_62 = arith.constant 6 : index
    %115 = memref.load %arg4[%c1_61, %c6_62] : memref<4x9xf32, #tpu.memory_space<smem>>
    %116 = vector.broadcast %115 : f32 to vector<16x16xf32>
    %117 = arith.mulf %116, %90 : vector<16x16xf32>
    %118 = arith.addf %66, %117 : vector<16x16xf32>
    %c1_63 = arith.constant 1 : index
    %c7_64 = arith.constant 7 : index
    %119 = memref.load %arg4[%c1_63, %c7_64] : memref<4x9xf32, #tpu.memory_space<smem>>
    %120 = vector.broadcast %119 : f32 to vector<16x16xf32>
    %121 = arith.mulf %120, %90 : vector<16x16xf32>
    %122 = arith.addf %70, %121 : vector<16x16xf32>
    %c1_65 = arith.constant 1 : index
    %c8_66 = arith.constant 8 : index
    %123 = memref.load %arg4[%c1_65, %c8_66] : memref<4x9xf32, #tpu.memory_space<smem>>
    %124 = vector.broadcast %123 : f32 to vector<16x16xf32>
    %125 = arith.mulf %124, %90 : vector<16x16xf32>
    %126 = arith.addf %74, %125 : vector<16x16xf32>
    %c2_67 = arith.constant 2 : index
    %c0_68 = arith.constant 0 : index
    %127 = memref.load %arg2[%c2_67, %c0_68] : memref<4x3xf32, #tpu.memory_space<smem>>
    %128 = vector.broadcast %127 : f32 to vector<16x16xf32>
    %129 = arith.mulf %128, %9 : vector<16x16xf32>
    %c2_69 = arith.constant 2 : index
    %c1_70 = arith.constant 1 : index
    %130 = memref.load %arg2[%c2_69, %c1_70] : memref<4x3xf32, #tpu.memory_space<smem>>
    %131 = vector.broadcast %130 : f32 to vector<16x16xf32>
    %132 = arith.mulf %131, %11 : vector<16x16xf32>
    %133 = arith.addf %129, %132 : vector<16x16xf32>
    %c2_71 = arith.constant 2 : index
    %c2_72 = arith.constant 2 : index
    %134 = memref.load %arg2[%c2_71, %c2_72] : memref<4x3xf32, #tpu.memory_space<smem>>
    %135 = vector.broadcast %134 : f32 to vector<16x16xf32>
    %136 = arith.mulf %135, %13 : vector<16x16xf32>
    %137 = arith.addf %133, %136 : vector<16x16xf32>
    %c2_73 = arith.constant 2 : index
    %138 = memref.load %arg3[%c2_73] : memref<4xf32, #tpu.memory_space<smem>>
    %139 = vector.broadcast %138 : f32 to vector<16x16xf32>
    %140 = arith.addf %137, %139 : vector<16x16xf32>
    %cst_74 = arith.constant 0.000000e+00 : f32
    %141 = vector.broadcast %cst_74 : f32 to vector<16x16xf32>
    %142 = arith.maximumf %140, %141 : vector<16x16xf32>
    %c2_75 = arith.constant 2 : index
    %c0_76 = arith.constant 0 : index
    %143 = memref.load %arg4[%c2_75, %c0_76] : memref<4x9xf32, #tpu.memory_space<smem>>
    %144 = vector.broadcast %143 : f32 to vector<16x16xf32>
    %145 = arith.mulf %144, %142 : vector<16x16xf32>
    %146 = arith.addf %94, %145 : vector<16x16xf32>
    %c2_77 = arith.constant 2 : index
    %c1_78 = arith.constant 1 : index
    %147 = memref.load %arg4[%c2_77, %c1_78] : memref<4x9xf32, #tpu.memory_space<smem>>
    %148 = vector.broadcast %147 : f32 to vector<16x16xf32>
    %149 = arith.mulf %148, %142 : vector<16x16xf32>
    %150 = arith.addf %98, %149 : vector<16x16xf32>
    %c2_79 = arith.constant 2 : index
    %c2_80 = arith.constant 2 : index
    %151 = memref.load %arg4[%c2_79, %c2_80] : memref<4x9xf32, #tpu.memory_space<smem>>
    %152 = vector.broadcast %151 : f32 to vector<16x16xf32>
    %153 = arith.mulf %152, %142 : vector<16x16xf32>
    %154 = arith.addf %102, %153 : vector<16x16xf32>
    %c2_81 = arith.constant 2 : index
    %c3_82 = arith.constant 3 : index
    %155 = memref.load %arg4[%c2_81, %c3_82] : memref<4x9xf32, #tpu.memory_space<smem>>
    %156 = vector.broadcast %155 : f32 to vector<16x16xf32>
    %157 = arith.mulf %156, %142 : vector<16x16xf32>
    %158 = arith.addf %106, %157 : vector<16x16xf32>
    %c2_83 = arith.constant 2 : index
    %c4_84 = arith.constant 4 : index
    %159 = memref.load %arg4[%c2_83, %c4_84] : memref<4x9xf32, #tpu.memory_space<smem>>
    %160 = vector.broadcast %159 : f32 to vector<16x16xf32>
    %161 = arith.mulf %160, %142 : vector<16x16xf32>
    %162 = arith.addf %110, %161 : vector<16x16xf32>
    %c2_85 = arith.constant 2 : index
    %c5_86 = arith.constant 5 : index
    %163 = memref.load %arg4[%c2_85, %c5_86] : memref<4x9xf32, #tpu.memory_space<smem>>
    %164 = vector.broadcast %163 : f32 to vector<16x16xf32>
    %165 = arith.mulf %164, %142 : vector<16x16xf32>
    %166 = arith.addf %114, %165 : vector<16x16xf32>
    %c2_87 = arith.constant 2 : index
    %c6_88 = arith.constant 6 : index
    %167 = memref.load %arg4[%c2_87, %c6_88] : memref<4x9xf32, #tpu.memory_space<smem>>
    %168 = vector.broadcast %167 : f32 to vector<16x16xf32>
    %169 = arith.mulf %168, %142 : vector<16x16xf32>
    %170 = arith.addf %118, %169 : vector<16x16xf32>
    %c2_89 = arith.constant 2 : index
    %c7_90 = arith.constant 7 : index
    %171 = memref.load %arg4[%c2_89, %c7_90] : memref<4x9xf32, #tpu.memory_space<smem>>
    %172 = vector.broadcast %171 : f32 to vector<16x16xf32>
    %173 = arith.mulf %172, %142 : vector<16x16xf32>
    %174 = arith.addf %122, %173 : vector<16x16xf32>
    %c2_91 = arith.constant 2 : index
    %c8_92 = arith.constant 8 : index
    %175 = memref.load %arg4[%c2_91, %c8_92] : memref<4x9xf32, #tpu.memory_space<smem>>
    %176 = vector.broadcast %175 : f32 to vector<16x16xf32>
    %177 = arith.mulf %176, %142 : vector<16x16xf32>
    %178 = arith.addf %126, %177 : vector<16x16xf32>
    %c3_93 = arith.constant 3 : index
    %c0_94 = arith.constant 0 : index
    %179 = memref.load %arg2[%c3_93, %c0_94] : memref<4x3xf32, #tpu.memory_space<smem>>
    %180 = vector.broadcast %179 : f32 to vector<16x16xf32>
    %181 = arith.mulf %180, %9 : vector<16x16xf32>
    %c3_95 = arith.constant 3 : index
    %c1_96 = arith.constant 1 : index
    %182 = memref.load %arg2[%c3_95, %c1_96] : memref<4x3xf32, #tpu.memory_space<smem>>
    %183 = vector.broadcast %182 : f32 to vector<16x16xf32>
    %184 = arith.mulf %183, %11 : vector<16x16xf32>
    %185 = arith.addf %181, %184 : vector<16x16xf32>
    %c3_97 = arith.constant 3 : index
    %c2_98 = arith.constant 2 : index
    %186 = memref.load %arg2[%c3_97, %c2_98] : memref<4x3xf32, #tpu.memory_space<smem>>
    %187 = vector.broadcast %186 : f32 to vector<16x16xf32>
    %188 = arith.mulf %187, %13 : vector<16x16xf32>
    %189 = arith.addf %185, %188 : vector<16x16xf32>
    %c3_99 = arith.constant 3 : index
    %190 = memref.load %arg3[%c3_99] : memref<4xf32, #tpu.memory_space<smem>>
    %191 = vector.broadcast %190 : f32 to vector<16x16xf32>
    %192 = arith.addf %189, %191 : vector<16x16xf32>
    %cst_100 = arith.constant 0.000000e+00 : f32
    %193 = vector.broadcast %cst_100 : f32 to vector<16x16xf32>
    %194 = arith.maximumf %192, %193 : vector<16x16xf32>
    %c3_101 = arith.constant 3 : index
    %c0_102 = arith.constant 0 : index
    %195 = memref.load %arg4[%c3_101, %c0_102] : memref<4x9xf32, #tpu.memory_space<smem>>
    %196 = vector.broadcast %195 : f32 to vector<16x16xf32>
    %197 = arith.mulf %196, %194 : vector<16x16xf32>
    %198 = arith.addf %146, %197 : vector<16x16xf32>
    %c3_103 = arith.constant 3 : index
    %c1_104 = arith.constant 1 : index
    %199 = memref.load %arg4[%c3_103, %c1_104] : memref<4x9xf32, #tpu.memory_space<smem>>
    %200 = vector.broadcast %199 : f32 to vector<16x16xf32>
    %201 = arith.mulf %200, %194 : vector<16x16xf32>
    %202 = arith.addf %150, %201 : vector<16x16xf32>
    %c3_105 = arith.constant 3 : index
    %c2_106 = arith.constant 2 : index
    %203 = memref.load %arg4[%c3_105, %c2_106] : memref<4x9xf32, #tpu.memory_space<smem>>
    %204 = vector.broadcast %203 : f32 to vector<16x16xf32>
    %205 = arith.mulf %204, %194 : vector<16x16xf32>
    %206 = arith.addf %154, %205 : vector<16x16xf32>
    %c3_107 = arith.constant 3 : index
    %c3_108 = arith.constant 3 : index
    %207 = memref.load %arg4[%c3_107, %c3_108] : memref<4x9xf32, #tpu.memory_space<smem>>
    %208 = vector.broadcast %207 : f32 to vector<16x16xf32>
    %209 = arith.mulf %208, %194 : vector<16x16xf32>
    %210 = arith.addf %158, %209 : vector<16x16xf32>
    %c3_109 = arith.constant 3 : index
    %c4_110 = arith.constant 4 : index
    %211 = memref.load %arg4[%c3_109, %c4_110] : memref<4x9xf32, #tpu.memory_space<smem>>
    %212 = vector.broadcast %211 : f32 to vector<16x16xf32>
    %213 = arith.mulf %212, %194 : vector<16x16xf32>
    %214 = arith.addf %162, %213 : vector<16x16xf32>
    %c3_111 = arith.constant 3 : index
    %c5_112 = arith.constant 5 : index
    %215 = memref.load %arg4[%c3_111, %c5_112] : memref<4x9xf32, #tpu.memory_space<smem>>
    %216 = vector.broadcast %215 : f32 to vector<16x16xf32>
    %217 = arith.mulf %216, %194 : vector<16x16xf32>
    %218 = arith.addf %166, %217 : vector<16x16xf32>
    %c3_113 = arith.constant 3 : index
    %c6_114 = arith.constant 6 : index
    %219 = memref.load %arg4[%c3_113, %c6_114] : memref<4x9xf32, #tpu.memory_space<smem>>
    %220 = vector.broadcast %219 : f32 to vector<16x16xf32>
    %221 = arith.mulf %220, %194 : vector<16x16xf32>
    %222 = arith.addf %170, %221 : vector<16x16xf32>
    %c3_115 = arith.constant 3 : index
    %c7_116 = arith.constant 7 : index
    %223 = memref.load %arg4[%c3_115, %c7_116] : memref<4x9xf32, #tpu.memory_space<smem>>
    %224 = vector.broadcast %223 : f32 to vector<16x16xf32>
    %225 = arith.mulf %224, %194 : vector<16x16xf32>
    %226 = arith.addf %174, %225 : vector<16x16xf32>
    %c3_117 = arith.constant 3 : index
    %c8_118 = arith.constant 8 : index
    %227 = memref.load %arg4[%c3_117, %c8_118] : memref<4x9xf32, #tpu.memory_space<smem>>
    %228 = vector.broadcast %227 : f32 to vector<16x16xf32>
    %229 = arith.mulf %228, %194 : vector<16x16xf32>
    %230 = arith.addf %178, %229 : vector<16x16xf32>
    %231 = vector.broadcast %2 : f32 to vector<16x16xf32>
    %232 = arith.addf %11, %231 : vector<16x16xf32>
    %233 = arith.addf %232, %214 : vector<16x16xf32>
    %c8_119 = arith.constant 8 : index
    %c128 = arith.constant 128 : index
    %234 = vector.load %arg10[%c8_119, %c128] : memref<32x152xf32, #tpu.memory_space<vmem>>, vector<16x16xf32>
    tpu.vector_store %arg10[%c8_119, %c128], %198 {strides = array<i32>} : memref<32x152xf32, #tpu.memory_space<vmem>>, vector<16x16xf32>,
    %c7_120 = arith.constant 7 : index
    %c127 = arith.constant 127 : index
    %235 = vector.load %arg10[%c7_120, %c127] : memref<32x152xf32, #tpu.memory_space<vmem>>, vector<16x16xf32>
    %236 = arith.addf %233, %235 : vector<16x16xf32>
    %c8_121 = arith.constant 8 : index
    %c128_122 = arith.constant 128 : index
    %237 = vector.load %arg10[%c8_121, %c128_122] : memref<32x152xf32, #tpu.memory_space<vmem>>, vector<16x16xf32>
    tpu.vector_store %arg10[%c8_121, %c128_122], %202 {strides = array<i32>} : memref<32x152xf32, #tpu.memory_space<vmem>>, vector<16x16xf32>,
    %c7_123 = arith.constant 7 : index
    %c128_124 = arith.constant 128 : index
    %238 = vector.load %arg10[%c7_123, %c128_124] : memref<32x152xf32, #tpu.memory_space<vmem>>, vector<16x16xf32>
    %239 = arith.addf %236, %238 : vector<16x16xf32>
    %c8_125 = arith.constant 8 : index
    %c128_126 = arith.constant 128 : index
    %240 = vector.load %arg10[%c8_125, %c128_126] : memref<32x152xf32, #tpu.memory_space<vmem>>, vector<16x16xf32>
    tpu.vector_store %arg10[%c8_125, %c128_126], %206 {strides = array<i32>} : memref<32x152xf32, #tpu.memory_space<vmem>>, vector<16x16xf32>,
    %c7_127 = arith.constant 7 : index
    %c129 = arith.constant 129 : index
    %241 = vector.load %arg10[%c7_127, %c129] : memref<32x152xf32, #tpu.memory_space<vmem>>, vector<16x16xf32>
    %242 = arith.addf %239, %241 : vector<16x16xf32>
    %c8_128 = arith.constant 8 : index
    %c128_129 = arith.constant 128 : index
    %243 = vector.load %arg10[%c8_128, %c128_129] : memref<32x152xf32, #tpu.memory_space<vmem>>, vector<16x16xf32>
    tpu.vector_store %arg10[%c8_128, %c128_129], %210 {strides = array<i32>} : memref<32x152xf32, #tpu.memory_space<vmem>>, vector<16x16xf32>,
    %c8_130 = arith.constant 8 : index
    %c127_131 = arith.constant 127 : index
    %244 = vector.load %arg10[%c8_130, %c127_131] : memref<32x152xf32, #tpu.memory_space<vmem>>, vector<16x16xf32>
    %245 = arith.addf %242, %244 : vector<16x16xf32>
    %c8_132 = arith.constant 8 : index
    %c128_133 = arith.constant 128 : index
    %246 = vector.load %arg10[%c8_132, %c128_133] : memref<32x152xf32, #tpu.memory_space<vmem>>, vector<16x16xf32>
    tpu.vector_store %arg10[%c8_132, %c128_133], %218 {strides = array<i32>} : memref<32x152xf32, #tpu.memory_space<vmem>>, vector<16x16xf32>,
    %c8_134 = arith.constant 8 : index
    %c129_135 = arith.constant 129 : index
    %247 = vector.load %arg10[%c8_134, %c129_135] : memref<32x152xf32, #tpu.memory_space<vmem>>, vector<16x16xf32>
    %248 = arith.addf %245, %247 : vector<16x16xf32>
    %c8_136 = arith.constant 8 : index
    %c128_137 = arith.constant 128 : index
    %249 = vector.load %arg10[%c8_136, %c128_137] : memref<32x152xf32, #tpu.memory_space<vmem>>, vector<16x16xf32>
    tpu.vector_store %arg10[%c8_136, %c128_137], %222 {strides = array<i32>} : memref<32x152xf32, #tpu.memory_space<vmem>>, vector<16x16xf32>,
    %c9 = arith.constant 9 : index
    %c127_138 = arith.constant 127 : index
    %250 = vector.load %arg10[%c9, %c127_138] : memref<32x152xf32, #tpu.memory_space<vmem>>, vector<16x16xf32>
    %251 = arith.addf %248, %250 : vector<16x16xf32>
    %c8_139 = arith.constant 8 : index
    %c128_140 = arith.constant 128 : index
    %252 = vector.load %arg10[%c8_139, %c128_140] : memref<32x152xf32, #tpu.memory_space<vmem>>, vector<16x16xf32>
    tpu.vector_store %arg10[%c8_139, %c128_140], %226 {strides = array<i32>} : memref<32x152xf32, #tpu.memory_space<vmem>>, vector<16x16xf32>,
    %c9_141 = arith.constant 9 : index
    %c128_142 = arith.constant 128 : index
    %253 = vector.load %arg10[%c9_141, %c128_142] : memref<32x152xf32, #tpu.memory_space<vmem>>, vector<16x16xf32>
    %254 = arith.addf %251, %253 : vector<16x16xf32>
    %c8_143 = arith.constant 8 : index
    %c128_144 = arith.constant 128 : index
    %255 = vector.load %arg10[%c8_143, %c128_144] : memref<32x152xf32, #tpu.memory_space<vmem>>, vector<16x16xf32>
    tpu.vector_store %arg10[%c8_143, %c128_144], %230 {strides = array<i32>} : memref<32x152xf32, #tpu.memory_space<vmem>>, vector<16x16xf32>,
    %c9_145 = arith.constant 9 : index
    %c129_146 = arith.constant 129 : index
    %256 = vector.load %arg10[%c9_145, %c129_146] : memref<32x152xf32, #tpu.memory_space<vmem>>, vector<16x16xf32>
    %257 = arith.addf %254, %256 : vector<16x16xf32>
    %c0_147 = arith.constant 0 : index
    %c0_148 = arith.constant 0 : index
    %c0_149 = arith.constant 0 : index
    %c0_150 = arith.constant 0 : index
    %258 = vector.load %arg9[%c0_147, %c0_148, %c0_149, %c0_150] : memref<1x4x16x16xf32, #tpu.memory_space<vmem>>, vector<1x1x16x16xf32>
    %259 = vector.shape_cast %258 : vector<1x1x16x16xf32> to vector<16x16xf32>
    %260 = vector.shape_cast %257 : vector<16x16xf32> to vector<1x1x16x16xf32>
    tpu.vector_store %arg9[%c0_147, %c0_148, %c0_149, %c0_150], %260 {strides = array<i32>} : memref<1x4x16x16xf32, #tpu.memory_space<vmem>>, vector<1x1x16x16xf32>,
    %c0_151 = arith.constant 0 : index
    %c0_152 = arith.constant 0 : index
    %c0_153 = arith.constant 0 : index
    %c0_154 = arith.constant 0 : index
    %261 = vector.load %arg7[%c0_151, %c0_152, %c0_153, %c0_154] : memref<1x4x16x16xf32, #tpu.memory_space<vmem>>, vector<1x1x16x16xf32>
    %262 = vector.shape_cast %261 : vector<1x1x16x16xf32> to vector<16x16xf32>
    %c0_155 = arith.constant 0 : index
    %c1_156 = arith.constant 1 : index
    %c0_157 = arith.constant 0 : index
    %c0_158 = arith.constant 0 : index
    %263 = vector.load %arg7[%c0_155, %c1_156, %c0_157, %c0_158] : memref<1x4x16x16xf32, #tpu.memory_space<vmem>>, vector<1x1x16x16xf32>
    %264 = vector.shape_cast %263 : vector<1x1x16x16xf32> to vector<16x16xf32>
    %c0_159 = arith.constant 0 : index
    %c2_160 = arith.constant 2 : index
    %c0_161 = arith.constant 0 : index
    %c0_162 = arith.constant 0 : index
    %265 = vector.load %arg7[%c0_159, %c2_160, %c0_161, %c0_162] : memref<1x4x16x16xf32, #tpu.memory_space<vmem>>, vector<1x1x16x16xf32>
    %266 = vector.shape_cast %265 : vector<1x1x16x16xf32> to vector<16x16xf32>
    %cst_163 = arith.constant 0.000000e+00 : f32
    %267 = vector.broadcast %cst_163 : f32 to vector<16x16xf32>
    %cst_164 = arith.constant 0.000000e+00 : f32
    %268 = vector.broadcast %cst_164 : f32 to vector<16x16xf32>
    %cst_165 = arith.constant 0.000000e+00 : f32
    %269 = vector.broadcast %cst_165 : f32 to vector<16x16xf32>
    %cst_166 = arith.constant 0.000000e+00 : f32
    %270 = vector.broadcast %cst_166 : f32 to vector<16x16xf32>
    %cst_167 = arith.constant 0.000000e+00 : f32
    %271 = vector.broadcast %cst_167 : f32 to vector<16x16xf32>
    %cst_168 = arith.constant 0.000000e+00 : f32
    %272 = vector.broadcast %cst_168 : f32 to vector<16x16xf32>
    %cst_169 = arith.constant 0.000000e+00 : f32
    %273 = vector.broadcast %cst_169 : f32 to vector<16x16xf32>
    %cst_170 = arith.constant 0.000000e+00 : f32
    %274 = vector.broadcast %cst_170 : f32 to vector<16x16xf32>
    %cst_171 = arith.constant 0.000000e+00 : f32
    %275 = vector.broadcast %cst_171 : f32 to vector<16x16xf32>
    %c0_172 = arith.constant 0 : index
    %c0_173 = arith.constant 0 : index
    %276 = memref.load %arg2[%c0_172, %c0_173] : memref<4x3xf32, #tpu.memory_space<smem>>
    %277 = vector.broadcast %276 : f32 to vector<16x16xf32>
    %278 = arith.mulf %277, %262 : vector<16x16xf32>
    %c0_174 = arith.constant 0 : index
    %c1_175 = arith.constant 1 : index
    %279 = memref.load %arg2[%c0_174, %c1_175] : memref<4x3xf32, #tpu.memory_space<smem>>
    %280 = vector.broadcast %279 : f32 to vector<16x16xf32>
    %281 = arith.mulf %280, %264 : vector<16x16xf32>
    %282 = arith.addf %278, %281 : vector<16x16xf32>
    %c0_176 = arith.constant 0 : index
    %c2_177 = arith.constant 2 : index
    %283 = memref.load %arg2[%c0_176, %c2_177] : memref<4x3xf32, #tpu.memory_space<smem>>
    %284 = vector.broadcast %283 : f32 to vector<16x16xf32>
    %285 = arith.mulf %284, %266 : vector<16x16xf32>
    %286 = arith.addf %282, %285 : vector<16x16xf32>
    %c0_178 = arith.constant 0 : index
    %287 = memref.load %arg3[%c0_178] : memref<4xf32, #tpu.memory_space<smem>>
    %288 = vector.broadcast %287 : f32 to vector<16x16xf32>
    %289 = arith.addf %286, %288 : vector<16x16xf32>
    %cst_179 = arith.constant 0.000000e+00 : f32
    %290 = vector.broadcast %cst_179 : f32 to vector<16x16xf32>
    %291 = arith.maximumf %289, %290 : vector<16x16xf32>
    %c0_180 = arith.constant 0 : index
    %c0_181 = arith.constant 0 : index
    %292 = memref.load %arg4[%c0_180, %c0_181] : memref<4x9xf32, #tpu.memory_space<smem>>
    %293 = vector.broadcast %292 : f32 to vector<16x16xf32>
    %294 = arith.mulf %293, %291 : vector<16x16xf32>
    %295 = arith.addf %267, %294 : vector<16x16xf32>
    %c0_182 = arith.constant 0 : index
    %c1_183 = arith.constant 1 : index
    %296 = memref.load %arg4[%c0_182, %c1_183] : memref<4x9xf32, #tpu.memory_space<smem>>
    %297 = vector.broadcast %296 : f32 to vector<16x16xf32>
    %298 = arith.mulf %297, %291 : vector<16x16xf32>
    %299 = arith.addf %268, %298 : vector<16x16xf32>
    %c0_184 = arith.constant 0 : index
    %c2_185 = arith.constant 2 : index
    %300 = memref.load %arg4[%c0_184, %c2_185] : memref<4x9xf32, #tpu.memory_space<smem>>
    %301 = vector.broadcast %300 : f32 to vector<16x16xf32>
    %302 = arith.mulf %301, %291 : vector<16x16xf32>
    %303 = arith.addf %269, %302 : vector<16x16xf32>
    %c0_186 = arith.constant 0 : index
    %c3_187 = arith.constant 3 : index
    %304 = memref.load %arg4[%c0_186, %c3_187] : memref<4x9xf32, #tpu.memory_space<smem>>
    %305 = vector.broadcast %304 : f32 to vector<16x16xf32>
    %306 = arith.mulf %305, %291 : vector<16x16xf32>
    %307 = arith.addf %270, %306 : vector<16x16xf32>
    %c0_188 = arith.constant 0 : index
    %c4_189 = arith.constant 4 : index
    %308 = memref.load %arg4[%c0_188, %c4_189] : memref<4x9xf32, #tpu.memory_space<smem>>
    %309 = vector.broadcast %308 : f32 to vector<16x16xf32>
    %310 = arith.mulf %309, %291 : vector<16x16xf32>
    %311 = arith.addf %271, %310 : vector<16x16xf32>
    %c0_190 = arith.constant 0 : index
    %c5_191 = arith.constant 5 : index
    %312 = memref.load %arg4[%c0_190, %c5_191] : memref<4x9xf32, #tpu.memory_space<smem>>
    %313 = vector.broadcast %312 : f32 to vector<16x16xf32>
    %314 = arith.mulf %313, %291 : vector<16x16xf32>
    %315 = arith.addf %272, %314 : vector<16x16xf32>
    %c0_192 = arith.constant 0 : index
    %c6_193 = arith.constant 6 : index
    %316 = memref.load %arg4[%c0_192, %c6_193] : memref<4x9xf32, #tpu.memory_space<smem>>
    %317 = vector.broadcast %316 : f32 to vector<16x16xf32>
    %318 = arith.mulf %317, %291 : vector<16x16xf32>
    %319 = arith.addf %273, %318 : vector<16x16xf32>
    %c0_194 = arith.constant 0 : index
    %c7_195 = arith.constant 7 : index
    %320 = memref.load %arg4[%c0_194, %c7_195] : memref<4x9xf32, #tpu.memory_space<smem>>
    %321 = vector.broadcast %320 : f32 to vector<16x16xf32>
    %322 = arith.mulf %321, %291 : vector<16x16xf32>
    %323 = arith.addf %274, %322 : vector<16x16xf32>
    %c0_196 = arith.constant 0 : index
    %c8_197 = arith.constant 8 : index
    %324 = memref.load %arg4[%c0_196, %c8_197] : memref<4x9xf32, #tpu.memory_space<smem>>
    %325 = vector.broadcast %324 : f32 to vector<16x16xf32>
    %326 = arith.mulf %325, %291 : vector<16x16xf32>
    %327 = arith.addf %275, %326 : vector<16x16xf32>
    %c1_198 = arith.constant 1 : index
    %c0_199 = arith.constant 0 : index
    %328 = memref.load %arg2[%c1_198, %c0_199] : memref<4x3xf32, #tpu.memory_space<smem>>
    %329 = vector.broadcast %328 : f32 to vector<16x16xf32>
    %330 = arith.mulf %329, %262 : vector<16x16xf32>
    %c1_200 = arith.constant 1 : index
    %c1_201 = arith.constant 1 : index
    %331 = memref.load %arg2[%c1_200, %c1_201] : memref<4x3xf32, #tpu.memory_space<smem>>
    %332 = vector.broadcast %331 : f32 to vector<16x16xf32>
    %333 = arith.mulf %332, %264 : vector<16x16xf32>
    %334 = arith.addf %330, %333 : vector<16x16xf32>
    %c1_202 = arith.constant 1 : index
    %c2_203 = arith.constant 2 : index
    %335 = memref.load %arg2[%c1_202, %c2_203] : memref<4x3xf32, #tpu.memory_space<smem>>
    %336 = vector.broadcast %335 : f32 to vector<16x16xf32>
    %337 = arith.mulf %336, %266 : vector<16x16xf32>
    %338 = arith.addf %334, %337 : vector<16x16xf32>
    %c1_204 = arith.constant 1 : index
    %339 = memref.load %arg3[%c1_204] : memref<4xf32, #tpu.memory_space<smem>>
    %340 = vector.broadcast %339 : f32 to vector<16x16xf32>
    %341 = arith.addf %338, %340 : vector<16x16xf32>
    %cst_205 = arith.constant 0.000000e+00 : f32
    %342 = vector.broadcast %cst_205 : f32 to vector<16x16xf32>
    %343 = arith.maximumf %341, %342 : vector<16x16xf32>
    %c1_206 = arith.constant 1 : index
    %c0_207 = arith.constant 0 : index
    %344 = memref.load %arg4[%c1_206, %c0_207] : memref<4x9xf32, #tpu.memory_space<smem>>
    %345 = vector.broadcast %344 : f32 to vector<16x16xf32>
    %346 = arith.mulf %345, %343 : vector<16x16xf32>
    %347 = arith.addf %295, %346 : vector<16x16xf32>
    %c1_208 = arith.constant 1 : index
    %c1_209 = arith.constant 1 : index
    %348 = memref.load %arg4[%c1_208, %c1_209] : memref<4x9xf32, #tpu.memory_space<smem>>
    %349 = vector.broadcast %348 : f32 to vector<16x16xf32>
    %350 = arith.mulf %349, %343 : vector<16x16xf32>
    %351 = arith.addf %299, %350 : vector<16x16xf32>
    %c1_210 = arith.constant 1 : index
    %c2_211 = arith.constant 2 : index
    %352 = memref.load %arg4[%c1_210, %c2_211] : memref<4x9xf32, #tpu.memory_space<smem>>
    %353 = vector.broadcast %352 : f32 to vector<16x16xf32>
    %354 = arith.mulf %353, %343 : vector<16x16xf32>
    %355 = arith.addf %303, %354 : vector<16x16xf32>
    %c1_212 = arith.constant 1 : index
    %c3_213 = arith.constant 3 : index
    %356 = memref.load %arg4[%c1_212, %c3_213] : memref<4x9xf32, #tpu.memory_space<smem>>
    %357 = vector.broadcast %356 : f32 to vector<16x16xf32>
    %358 = arith.mulf %357, %343 : vector<16x16xf32>
    %359 = arith.addf %307, %358 : vector<16x16xf32>
    %c1_214 = arith.constant 1 : index
    %c4_215 = arith.constant 4 : index
    %360 = memref.load %arg4[%c1_214, %c4_215] : memref<4x9xf32, #tpu.memory_space<smem>>
    %361 = vector.broadcast %360 : f32 to vector<16x16xf32>
    %362 = arith.mulf %361, %343 : vector<16x16xf32>
    %363 = arith.addf %311, %362 : vector<16x16xf32>
    %c1_216 = arith.constant 1 : index
    %c5_217 = arith.constant 5 : index
    %364 = memref.load %arg4[%c1_216, %c5_217] : memref<4x9xf32, #tpu.memory_space<smem>>
    %365 = vector.broadcast %364 : f32 to vector<16x16xf32>
    %366 = arith.mulf %365, %343 : vector<16x16xf32>
    %367 = arith.addf %315, %366 : vector<16x16xf32>
    %c1_218 = arith.constant 1 : index
    %c6_219 = arith.constant 6 : index
    %368 = memref.load %arg4[%c1_218, %c6_219] : memref<4x9xf32, #tpu.memory_space<smem>>
    %369 = vector.broadcast %368 : f32 to vector<16x16xf32>
    %370 = arith.mulf %369, %343 : vector<16x16xf32>
    %371 = arith.addf %319, %370 : vector<16x16xf32>
    %c1_220 = arith.constant 1 : index
    %c7_221 = arith.constant 7 : index
    %372 = memref.load %arg4[%c1_220, %c7_221] : memref<4x9xf32, #tpu.memory_space<smem>>
    %373 = vector.broadcast %372 : f32 to vector<16x16xf32>
    %374 = arith.mulf %373, %343 : vector<16x16xf32>
    %375 = arith.addf %323, %374 : vector<16x16xf32>
    %c1_222 = arith.constant 1 : index
    %c8_223 = arith.constant 8 : index
    %376 = memref.load %arg4[%c1_222, %c8_223] : memref<4x9xf32, #tpu.memory_space<smem>>
    %377 = vector.broadcast %376 : f32 to vector<16x16xf32>
    %378 = arith.mulf %377, %343 : vector<16x16xf32>
    %379 = arith.addf %327, %378 : vector<16x16xf32>
    %c2_224 = arith.constant 2 : index
    %c0_225 = arith.constant 0 : index
    %380 = memref.load %arg2[%c2_224, %c0_225] : memref<4x3xf32, #tpu.memory_space<smem>>
    %381 = vector.broadcast %380 : f32 to vector<16x16xf32>
    %382 = arith.mulf %381, %262 : vector<16x16xf32>
    %c2_226 = arith.constant 2 : index
    %c1_227 = arith.constant 1 : index
    %383 = memref.load %arg2[%c2_226, %c1_227] : memref<4x3xf32, #tpu.memory_space<smem>>
    %384 = vector.broadcast %383 : f32 to vector<16x16xf32>
    %385 = arith.mulf %384, %264 : vector<16x16xf32>
    %386 = arith.addf %382, %385 : vector<16x16xf32>
    %c2_228 = arith.constant 2 : index
    %c2_229 = arith.constant 2 : index
    %387 = memref.load %arg2[%c2_228, %c2_229] : memref<4x3xf32, #tpu.memory_space<smem>>
    %388 = vector.broadcast %387 : f32 to vector<16x16xf32>
    %389 = arith.mulf %388, %266 : vector<16x16xf32>
    %390 = arith.addf %386, %389 : vector<16x16xf32>
    %c2_230 = arith.constant 2 : index
    %391 = memref.load %arg3[%c2_230] : memref<4xf32, #tpu.memory_space<smem>>
    %392 = vector.broadcast %391 : f32 to vector<16x16xf32>
    %393 = arith.addf %390, %392 : vector<16x16xf32>
    %cst_231 = arith.constant 0.000000e+00 : f32
    %394 = vector.broadcast %cst_231 : f32 to vector<16x16xf32>
    %395 = arith.maximumf %393, %394 : vector<16x16xf32>
    %c2_232 = arith.constant 2 : index
    %c0_233 = arith.constant 0 : index
    %396 = memref.load %arg4[%c2_232, %c0_233] : memref<4x9xf32, #tpu.memory_space<smem>>
    %397 = vector.broadcast %396 : f32 to vector<16x16xf32>
    %398 = arith.mulf %397, %395 : vector<16x16xf32>
    %399 = arith.addf %347, %398 : vector<16x16xf32>
    %c2_234 = arith.constant 2 : index
    %c1_235 = arith.constant 1 : index
    %400 = memref.load %arg4[%c2_234, %c1_235] : memref<4x9xf32, #tpu.memory_space<smem>>
    %401 = vector.broadcast %400 : f32 to vector<16x16xf32>
    %402 = arith.mulf %401, %395 : vector<16x16xf32>
    %403 = arith.addf %351, %402 : vector<16x16xf32>
    %c2_236 = arith.constant 2 : index
    %c2_237 = arith.constant 2 : index
    %404 = memref.load %arg4[%c2_236, %c2_237] : memref<4x9xf32, #tpu.memory_space<smem>>
    %405 = vector.broadcast %404 : f32 to vector<16x16xf32>
    %406 = arith.mulf %405, %395 : vector<16x16xf32>
    %407 = arith.addf %355, %406 : vector<16x16xf32>
    %c2_238 = arith.constant 2 : index
    %c3_239 = arith.constant 3 : index
    %408 = memref.load %arg4[%c2_238, %c3_239] : memref<4x9xf32, #tpu.memory_space<smem>>
    %409 = vector.broadcast %408 : f32 to vector<16x16xf32>
    %410 = arith.mulf %409, %395 : vector<16x16xf32>
    %411 = arith.addf %359, %410 : vector<16x16xf32>
    %c2_240 = arith.constant 2 : index
    %c4_241 = arith.constant 4 : index
    %412 = memref.load %arg4[%c2_240, %c4_241] : memref<4x9xf32, #tpu.memory_space<smem>>
    %413 = vector.broadcast %412 : f32 to vector<16x16xf32>
    %414 = arith.mulf %413, %395 : vector<16x16xf32>
    %415 = arith.addf %363, %414 : vector<16x16xf32>
    %c2_242 = arith.constant 2 : index
    %c5_243 = arith.constant 5 : index
    %416 = memref.load %arg4[%c2_242, %c5_243] : memref<4x9xf32, #tpu.memory_space<smem>>
    %417 = vector.broadcast %416 : f32 to vector<16x16xf32>
    %418 = arith.mulf %417, %395 : vector<16x16xf32>
    %419 = arith.addf %367, %418 : vector<16x16xf32>
    %c2_244 = arith.constant 2 : index
    %c6_245 = arith.constant 6 : index
    %420 = memref.load %arg4[%c2_244, %c6_245] : memref<4x9xf32, #tpu.memory_space<smem>>
    %421 = vector.broadcast %420 : f32 to vector<16x16xf32>
    %422 = arith.mulf %421, %395 : vector<16x16xf32>
    %423 = arith.addf %371, %422 : vector<16x16xf32>
    %c2_246 = arith.constant 2 : index
    %c7_247 = arith.constant 7 : index
    %424 = memref.load %arg4[%c2_246, %c7_247] : memref<4x9xf32, #tpu.memory_space<smem>>
    %425 = vector.broadcast %424 : f32 to vector<16x16xf32>
    %426 = arith.mulf %425, %395 : vector<16x16xf32>
    %427 = arith.addf %375, %426 : vector<16x16xf32>
    %c2_248 = arith.constant 2 : index
    %c8_249 = arith.constant 8 : index
    %428 = memref.load %arg4[%c2_248, %c8_249] : memref<4x9xf32, #tpu.memory_space<smem>>
    %429 = vector.broadcast %428 : f32 to vector<16x16xf32>
    %430 = arith.mulf %429, %395 : vector<16x16xf32>
    %431 = arith.addf %379, %430 : vector<16x16xf32>
    %c3_250 = arith.constant 3 : index
    %c0_251 = arith.constant 0 : index
    %432 = memref.load %arg2[%c3_250, %c0_251] : memref<4x3xf32, #tpu.memory_space<smem>>
    %433 = vector.broadcast %432 : f32 to vector<16x16xf32>
    %434 = arith.mulf %433, %262 : vector<16x16xf32>
    %c3_252 = arith.constant 3 : index
    %c1_253 = arith.constant 1 : index
    %435 = memref.load %arg2[%c3_252, %c1_253] : memref<4x3xf32, #tpu.memory_space<smem>>
    %436 = vector.broadcast %435 : f32 to vector<16x16xf32>
    %437 = arith.mulf %436, %264 : vector<16x16xf32>
    %438 = arith.addf %434, %437 : vector<16x16xf32>
    %c3_254 = arith.constant 3 : index
    %c2_255 = arith.constant 2 : index
    %439 = memref.load %arg2[%c3_254, %c2_255] : memref<4x3xf32, #tpu.memory_space<smem>>
    %440 = vector.broadcast %439 : f32 to vector<16x16xf32>
    %441 = arith.mulf %440, %266 : vector<16x16xf32>
    %442 = arith.addf %438, %441 : vector<16x16xf32>
    %c3_256 = arith.constant 3 : index
    %443 = memref.load %arg3[%c3_256] : memref<4xf32, #tpu.memory_space<smem>>
    %444 = vector.broadcast %443 : f32 to vector<16x16xf32>
    %445 = arith.addf %442, %444 : vector<16x16xf32>
    %cst_257 = arith.constant 0.000000e+00 : f32
    %446 = vector.broadcast %cst_257 : f32 to vector<16x16xf32>
    %447 = arith.maximumf %445, %446 : vector<16x16xf32>
    %c3_258 = arith.constant 3 : index
    %c0_259 = arith.constant 0 : index
    %448 = memref.load %arg4[%c3_258, %c0_259] : memref<4x9xf32, #tpu.memory_space<smem>>
    %449 = vector.broadcast %448 : f32 to vector<16x16xf32>
    %450 = arith.mulf %449, %447 : vector<16x16xf32>
    %451 = arith.addf %399, %450 : vector<16x16xf32>
    %c3_260 = arith.constant 3 : index
    %c1_261 = arith.constant 1 : index
    %452 = memref.load %arg4[%c3_260, %c1_261] : memref<4x9xf32, #tpu.memory_space<smem>>
    %453 = vector.broadcast %452 : f32 to vector<16x16xf32>
    %454 = arith.mulf %453, %447 : vector<16x16xf32>
    %455 = arith.addf %403, %454 : vector<16x16xf32>
    %c3_262 = arith.constant 3 : index
    %c2_263 = arith.constant 2 : index
    %456 = memref.load %arg4[%c3_262, %c2_263] : memref<4x9xf32, #tpu.memory_space<smem>>
    %457 = vector.broadcast %456 : f32 to vector<16x16xf32>
    %458 = arith.mulf %457, %447 : vector<16x16xf32>
    %459 = arith.addf %407, %458 : vector<16x16xf32>
    %c3_264 = arith.constant 3 : index
    %c3_265 = arith.constant 3 : index
    %460 = memref.load %arg4[%c3_264, %c3_265] : memref<4x9xf32, #tpu.memory_space<smem>>
    %461 = vector.broadcast %460 : f32 to vector<16x16xf32>
    %462 = arith.mulf %461, %447 : vector<16x16xf32>
    %463 = arith.addf %411, %462 : vector<16x16xf32>
    %c3_266 = arith.constant 3 : index
    %c4_267 = arith.constant 4 : index
    %464 = memref.load %arg4[%c3_266, %c4_267] : memref<4x9xf32, #tpu.memory_space<smem>>
    %465 = vector.broadcast %464 : f32 to vector<16x16xf32>
    %466 = arith.mulf %465, %447 : vector<16x16xf32>
    %467 = arith.addf %415, %466 : vector<16x16xf32>
    %c3_268 = arith.constant 3 : index
    %c5_269 = arith.constant 5 : index
    %468 = memref.load %arg4[%c3_268, %c5_269] : memref<4x9xf32, #tpu.memory_space<smem>>
    %469 = vector.broadcast %468 : f32 to vector<16x16xf32>
    %470 = arith.mulf %469, %447 : vector<16x16xf32>
    %471 = arith.addf %419, %470 : vector<16x16xf32>
    %c3_270 = arith.constant 3 : index
    %c6_271 = arith.constant 6 : index
    %472 = memref.load %arg4[%c3_270, %c6_271] : memref<4x9xf32, #tpu.memory_space<smem>>
    %473 = vector.broadcast %472 : f32 to vector<16x16xf32>
    %474 = arith.mulf %473, %447 : vector<16x16xf32>
    %475 = arith.addf %423, %474 : vector<16x16xf32>
    %c3_272 = arith.constant 3 : index
    %c7_273 = arith.constant 7 : index
    %476 = memref.load %arg4[%c3_272, %c7_273] : memref<4x9xf32, #tpu.memory_space<smem>>
    %477 = vector.broadcast %476 : f32 to vector<16x16xf32>
    %478 = arith.mulf %477, %447 : vector<16x16xf32>
    %479 = arith.addf %427, %478 : vector<16x16xf32>
    %c3_274 = arith.constant 3 : index
    %c8_275 = arith.constant 8 : index
    %480 = memref.load %arg4[%c3_274, %c8_275] : memref<4x9xf32, #tpu.memory_space<smem>>
    %481 = vector.broadcast %480 : f32 to vector<16x16xf32>
    %482 = arith.mulf %481, %447 : vector<16x16xf32>
    %483 = arith.addf %431, %482 : vector<16x16xf32>
    %484 = vector.broadcast %2 : f32 to vector<16x16xf32>
    %485 = arith.addf %264, %484 : vector<16x16xf32>
    %486 = arith.addf %485, %467 : vector<16x16xf32>
    %c8_276 = arith.constant 8 : index
    %c128_277 = arith.constant 128 : index
    %487 = vector.load %arg10[%c8_276, %c128_277] : memref<32x152xf32, #tpu.memory_space<vmem>>, vector<16x16xf32>
    tpu.vector_store %arg10[%c8_276, %c128_277], %451 {strides = array<i32>} : memref<32x152xf32, #tpu.memory_space<vmem>>, vector<16x16xf32>,
    %c7_278 = arith.constant 7 : index
    %c127_279 = arith.constant 127 : index
    %488 = vector.load %arg10[%c7_278, %c127_279] : memref<32x152xf32, #tpu.memory_space<vmem>>, vector<16x16xf32>
    %489 = arith.addf %486, %488 : vector<16x16xf32>
    %c8_280 = arith.constant 8 : index
    %c128_281 = arith.constant 128 : index
    %490 = vector.load %arg10[%c8_280, %c128_281] : memref<32x152xf32, #tpu.memory_space<vmem>>, vector<16x16xf32>
    tpu.vector_store %arg10[%c8_280, %c128_281], %455 {strides = array<i32>} : memref<32x152xf32, #tpu.memory_space<vmem>>, vector<16x16xf32>,
    %c7_282 = arith.constant 7 : index
    %c128_283 = arith.constant 128 : index
    %491 = vector.load %arg10[%c7_282, %c128_283] : memref<32x152xf32, #tpu.memory_space<vmem>>, vector<16x16xf32>
    %492 = arith.addf %489, %491 : vector<16x16xf32>
    %c8_284 = arith.constant 8 : index
    %c128_285 = arith.constant 128 : index
    %493 = vector.load %arg10[%c8_284, %c128_285] : memref<32x152xf32, #tpu.memory_space<vmem>>, vector<16x16xf32>
    tpu.vector_store %arg10[%c8_284, %c128_285], %459 {strides = array<i32>} : memref<32x152xf32, #tpu.memory_space<vmem>>, vector<16x16xf32>,
    %c7_286 = arith.constant 7 : index
    %c129_287 = arith.constant 129 : index
    %494 = vector.load %arg10[%c7_286, %c129_287] : memref<32x152xf32, #tpu.memory_space<vmem>>, vector<16x16xf32>
    %495 = arith.addf %492, %494 : vector<16x16xf32>
    %c8_288 = arith.constant 8 : index
    %c128_289 = arith.constant 128 : index
    %496 = vector.load %arg10[%c8_288, %c128_289] : memref<32x152xf32, #tpu.memory_space<vmem>>, vector<16x16xf32>
    tpu.vector_store %arg10[%c8_288, %c128_289], %463 {strides = array<i32>} : memref<32x152xf32, #tpu.memory_space<vmem>>, vector<16x16xf32>,
    %c8_290 = arith.constant 8 : index
    %c127_291 = arith.constant 127 : index
    %497 = vector.load %arg10[%c8_290, %c127_291] : memref<32x152xf32, #tpu.memory_space<vmem>>, vector<16x16xf32>
    %498 = arith.addf %495, %497 : vector<16x16xf32>
    %c8_292 = arith.constant 8 : index
    %c128_293 = arith.constant 128 : index
    %499 = vector.load %arg10[%c8_292, %c128_293] : memref<32x152xf32, #tpu.memory_space<vmem>>, vector<16x16xf32>
    tpu.vector_store %arg10[%c8_292, %c128_293], %471 {strides = array<i32>} : memref<32x152xf32, #tpu.memory_space<vmem>>, vector<16x16xf32>,
    %c8_294 = arith.constant 8 : index
    %c129_295 = arith.constant 129 : index
    %500 = vector.load %arg10[%c8_294, %c129_295] : memref<32x152xf32, #tpu.memory_space<vmem>>, vector<16x16xf32>
    %501 = arith.addf %498, %500 : vector<16x16xf32>
    %c8_296 = arith.constant 8 : index
    %c128_297 = arith.constant 128 : index
    %502 = vector.load %arg10[%c8_296, %c128_297] : memref<32x152xf32, #tpu.memory_space<vmem>>, vector<16x16xf32>
    tpu.vector_store %arg10[%c8_296, %c128_297], %475 {strides = array<i32>} : memref<32x152xf32, #tpu.memory_space<vmem>>, vector<16x16xf32>,
    %c9_298 = arith.constant 9 : index
    %c127_299 = arith.constant 127 : index
    %503 = vector.load %arg10[%c9_298, %c127_299] : memref<32x152xf32, #tpu.memory_space<vmem>>, vector<16x16xf32>
    %504 = arith.addf %501, %503 : vector<16x16xf32>
    %c8_300 = arith.constant 8 : index
    %c128_301 = arith.constant 128 : index
    %505 = vector.load %arg10[%c8_300, %c128_301] : memref<32x152xf32, #tpu.memory_space<vmem>>, vector<16x16xf32>
    tpu.vector_store %arg10[%c8_300, %c128_301], %479 {strides = array<i32>} : memref<32x152xf32, #tpu.memory_space<vmem>>, vector<16x16xf32>,
    %c9_302 = arith.constant 9 : index
    %c128_303 = arith.constant 128 : index
    %506 = vector.load %arg10[%c9_302, %c128_303] : memref<32x152xf32, #tpu.memory_space<vmem>>, vector<16x16xf32>
    %507 = arith.addf %504, %506 : vector<16x16xf32>
    %c8_304 = arith.constant 8 : index
    %c128_305 = arith.constant 128 : index
    %508 = vector.load %arg10[%c8_304, %c128_305] : memref<32x152xf32, #tpu.memory_space<vmem>>, vector<16x16xf32>
    tpu.vector_store %arg10[%c8_304, %c128_305], %483 {strides = array<i32>} : memref<32x152xf32, #tpu.memory_space<vmem>>, vector<16x16xf32>,
    %c9_306 = arith.constant 9 : index
    %c129_307 = arith.constant 129 : index
    %509 = vector.load %arg10[%c9_306, %c129_307] : memref<32x152xf32, #tpu.memory_space<vmem>>, vector<16x16xf32>
    %510 = arith.addf %507, %509 : vector<16x16xf32>
    %c0_308 = arith.constant 0 : index
    %c1_309 = arith.constant 1 : index
    %c0_310 = arith.constant 0 : index
    %c0_311 = arith.constant 0 : index
    %511 = vector.load %arg9[%c0_308, %c1_309, %c0_310, %c0_311] : memref<1x4x16x16xf32, #tpu.memory_space<vmem>>, vector<1x1x16x16xf32>
    %512 = vector.shape_cast %511 : vector<1x1x16x16xf32> to vector<16x16xf32>
    %513 = vector.shape_cast %510 : vector<16x16xf32> to vector<1x1x16x16xf32>
    tpu.vector_store %arg9[%c0_308, %c1_309, %c0_310, %c0_311], %513 {strides = array<i32>} : memref<1x4x16x16xf32, #tpu.memory_space<vmem>>, vector<1x1x16x16xf32>,
    %c0_312 = arith.constant 0 : index
    %c1_313 = arith.constant 1 : index
    %c0_314 = arith.constant 0 : index
    %c0_315 = arith.constant 0 : index
    %514 = vector.load %arg7[%c0_312, %c1_313, %c0_314, %c0_315] : memref<1x4x16x16xf32, #tpu.memory_space<vmem>>, vector<1x1x16x16xf32>
    %515 = vector.shape_cast %514 : vector<1x1x16x16xf32> to vector<16x16xf32>
    %c0_316 = arith.constant 0 : index
    %c2_317 = arith.constant 2 : index
    %c0_318 = arith.constant 0 : index
    %c0_319 = arith.constant 0 : index
    %516 = vector.load %arg7[%c0_316, %c2_317, %c0_318, %c0_319] : memref<1x4x16x16xf32, #tpu.memory_space<vmem>>, vector<1x1x16x16xf32>
    %517 = vector.shape_cast %516 : vector<1x1x16x16xf32> to vector<16x16xf32>
    %c0_320 = arith.constant 0 : index
    %c3_321 = arith.constant 3 : index
    %c0_322 = arith.constant 0 : index
    %c0_323 = arith.constant 0 : index
    %518 = vector.load %arg7[%c0_320, %c3_321, %c0_322, %c0_323] : memref<1x4x16x16xf32, #tpu.memory_space<vmem>>, vector<1x1x16x16xf32>
    %519 = vector.shape_cast %518 : vector<1x1x16x16xf32> to vector<16x16xf32>
    %cst_324 = arith.constant 0.000000e+00 : f32
    %520 = vector.broadcast %cst_324 : f32 to vector<16x16xf32>
    %cst_325 = arith.constant 0.000000e+00 : f32
    %521 = vector.broadcast %cst_325 : f32 to vector<16x16xf32>
    %cst_326 = arith.constant 0.000000e+00 : f32
    %522 = vector.broadcast %cst_326 : f32 to vector<16x16xf32>
    %cst_327 = arith.constant 0.000000e+00 : f32
    %523 = vector.broadcast %cst_327 : f32 to vector<16x16xf32>
    %cst_328 = arith.constant 0.000000e+00 : f32
    %524 = vector.broadcast %cst_328 : f32 to vector<16x16xf32>
    %cst_329 = arith.constant 0.000000e+00 : f32
    %525 = vector.broadcast %cst_329 : f32 to vector<16x16xf32>
    %cst_330 = arith.constant 0.000000e+00 : f32
    %526 = vector.broadcast %cst_330 : f32 to vector<16x16xf32>
    %cst_331 = arith.constant 0.000000e+00 : f32
    %527 = vector.broadcast %cst_331 : f32 to vector<16x16xf32>
    %cst_332 = arith.constant 0.000000e+00 : f32
    %528 = vector.broadcast %cst_332 : f32 to vector<16x16xf32>
    %c0_333 = arith.constant 0 : index
    %c0_334 = arith.constant 0 : index
    %529 = memref.load %arg2[%c0_333, %c0_334] : memref<4x3xf32, #tpu.memory_space<smem>>
    %530 = vector.broadcast %529 : f32 to vector<16x16xf32>
    %531 = arith.mulf %530, %515 : vector<16x16xf32>
    %c0_335 = arith.constant 0 : index
    %c1_336 = arith.constant 1 : index
    %532 = memref.load %arg2[%c0_335, %c1_336] : memref<4x3xf32, #tpu.memory_space<smem>>
    %533 = vector.broadcast %532 : f32 to vector<16x16xf32>
    %534 = arith.mulf %533, %517 : vector<16x16xf32>
    %535 = arith.addf %531, %534 : vector<16x16xf32>
    %c0_337 = arith.constant 0 : index
    %c2_338 = arith.constant 2 : index
    %536 = memref.load %arg2[%c0_337, %c2_338] : memref<4x3xf32, #tpu.memory_space<smem>>
    %537 = vector.broadcast %536 : f32 to vector<16x16xf32>
    %538 = arith.mulf %537, %519 : vector<16x16xf32>
    %539 = arith.addf %535, %538 : vector<16x16xf32>
    %c0_339 = arith.constant 0 : index
    %540 = memref.load %arg3[%c0_339] : memref<4xf32, #tpu.memory_space<smem>>
    %541 = vector.broadcast %540 : f32 to vector<16x16xf32>
    %542 = arith.addf %539, %541 : vector<16x16xf32>
    %cst_340 = arith.constant 0.000000e+00 : f32
    %543 = vector.broadcast %cst_340 : f32 to vector<16x16xf32>
    %544 = arith.maximumf %542, %543 : vector<16x16xf32>
    %c0_341 = arith.constant 0 : index
    %c0_342 = arith.constant 0 : index
    %545 = memref.load %arg4[%c0_341, %c0_342] : memref<4x9xf32, #tpu.memory_space<smem>>
    %546 = vector.broadcast %545 : f32 to vector<16x16xf32>
    %547 = arith.mulf %546, %544 : vector<16x16xf32>
    %548 = arith.addf %520, %547 : vector<16x16xf32>
    %c0_343 = arith.constant 0 : index
    %c1_344 = arith.constant 1 : index
    %549 = memref.load %arg4[%c0_343, %c1_344] : memref<4x9xf32, #tpu.memory_space<smem>>
    %550 = vector.broadcast %549 : f32 to vector<16x16xf32>
    %551 = arith.mulf %550, %544 : vector<16x16xf32>
    %552 = arith.addf %521, %551 : vector<16x16xf32>
    %c0_345 = arith.constant 0 : index
    %c2_346 = arith.constant 2 : index
    %553 = memref.load %arg4[%c0_345, %c2_346] : memref<4x9xf32, #tpu.memory_space<smem>>
    %554 = vector.broadcast %553 : f32 to vector<16x16xf32>
    %555 = arith.mulf %554, %544 : vector<16x16xf32>
    %556 = arith.addf %522, %555 : vector<16x16xf32>
    %c0_347 = arith.constant 0 : index
    %c3_348 = arith.constant 3 : index
    %557 = memref.load %arg4[%c0_347, %c3_348] : memref<4x9xf32, #tpu.memory_space<smem>>
    %558 = vector.broadcast %557 : f32 to vector<16x16xf32>
    %559 = arith.mulf %558, %544 : vector<16x16xf32>
    %560 = arith.addf %523, %559 : vector<16x16xf32>
    %c0_349 = arith.constant 0 : index
    %c4_350 = arith.constant 4 : index
    %561 = memref.load %arg4[%c0_349, %c4_350] : memref<4x9xf32, #tpu.memory_space<smem>>
    %562 = vector.broadcast %561 : f32 to vector<16x16xf32>
    %563 = arith.mulf %562, %544 : vector<16x16xf32>
    %564 = arith.addf %524, %563 : vector<16x16xf32>
    %c0_351 = arith.constant 0 : index
    %c5_352 = arith.constant 5 : index
    %565 = memref.load %arg4[%c0_351, %c5_352] : memref<4x9xf32, #tpu.memory_space<smem>>
    %566 = vector.broadcast %565 : f32 to vector<16x16xf32>
    %567 = arith.mulf %566, %544 : vector<16x16xf32>
    %568 = arith.addf %525, %567 : vector<16x16xf32>
    %c0_353 = arith.constant 0 : index
    %c6_354 = arith.constant 6 : index
    %569 = memref.load %arg4[%c0_353, %c6_354] : memref<4x9xf32, #tpu.memory_space<smem>>
    %570 = vector.broadcast %569 : f32 to vector<16x16xf32>
    %571 = arith.mulf %570, %544 : vector<16x16xf32>
    %572 = arith.addf %526, %571 : vector<16x16xf32>
    %c0_355 = arith.constant 0 : index
    %c7_356 = arith.constant 7 : index
    %573 = memref.load %arg4[%c0_355, %c7_356] : memref<4x9xf32, #tpu.memory_space<smem>>
    %574 = vector.broadcast %573 : f32 to vector<16x16xf32>
    %575 = arith.mulf %574, %544 : vector<16x16xf32>
    %576 = arith.addf %527, %575 : vector<16x16xf32>
    %c0_357 = arith.constant 0 : index
    %c8_358 = arith.constant 8 : index
    %577 = memref.load %arg4[%c0_357, %c8_358] : memref<4x9xf32, #tpu.memory_space<smem>>
    %578 = vector.broadcast %577 : f32 to vector<16x16xf32>
    %579 = arith.mulf %578, %544 : vector<16x16xf32>
    %580 = arith.addf %528, %579 : vector<16x16xf32>
    %c1_359 = arith.constant 1 : index
    %c0_360 = arith.constant 0 : index
    %581 = memref.load %arg2[%c1_359, %c0_360] : memref<4x3xf32, #tpu.memory_space<smem>>
    %582 = vector.broadcast %581 : f32 to vector<16x16xf32>
    %583 = arith.mulf %582, %515 : vector<16x16xf32>
    %c1_361 = arith.constant 1 : index
    %c1_362 = arith.constant 1 : index
    %584 = memref.load %arg2[%c1_361, %c1_362] : memref<4x3xf32, #tpu.memory_space<smem>>
    %585 = vector.broadcast %584 : f32 to vector<16x16xf32>
    %586 = arith.mulf %585, %517 : vector<16x16xf32>
    %587 = arith.addf %583, %586 : vector<16x16xf32>
    %c1_363 = arith.constant 1 : index
    %c2_364 = arith.constant 2 : index
    %588 = memref.load %arg2[%c1_363, %c2_364] : memref<4x3xf32, #tpu.memory_space<smem>>
    %589 = vector.broadcast %588 : f32 to vector<16x16xf32>
    %590 = arith.mulf %589, %519 : vector<16x16xf32>
    %591 = arith.addf %587, %590 : vector<16x16xf32>
    %c1_365 = arith.constant 1 : index
    %592 = memref.load %arg3[%c1_365] : memref<4xf32, #tpu.memory_space<smem>>
    %593 = vector.broadcast %592 : f32 to vector<16x16xf32>
    %594 = arith.addf %591, %593 : vector<16x16xf32>
    %cst_366 = arith.constant 0.000000e+00 : f32
    %595 = vector.broadcast %cst_366 : f32 to vector<16x16xf32>
    %596 = arith.maximumf %594, %595 : vector<16x16xf32>
    %c1_367 = arith.constant 1 : index
    %c0_368 = arith.constant 0 : index
    %597 = memref.load %arg4[%c1_367, %c0_368] : memref<4x9xf32, #tpu.memory_space<smem>>
    %598 = vector.broadcast %597 : f32 to vector<16x16xf32>
    %599 = arith.mulf %598, %596 : vector<16x16xf32>
    %600 = arith.addf %548, %599 : vector<16x16xf32>
    %c1_369 = arith.constant 1 : index
    %c1_370 = arith.constant 1 : index
    %601 = memref.load %arg4[%c1_369, %c1_370] : memref<4x9xf32, #tpu.memory_space<smem>>
    %602 = vector.broadcast %601 : f32 to vector<16x16xf32>
    %603 = arith.mulf %602, %596 : vector<16x16xf32>
    %604 = arith.addf %552, %603 : vector<16x16xf32>
    %c1_371 = arith.constant 1 : index
    %c2_372 = arith.constant 2 : index
    %605 = memref.load %arg4[%c1_371, %c2_372] : memref<4x9xf32, #tpu.memory_space<smem>>
    %606 = vector.broadcast %605 : f32 to vector<16x16xf32>
    %607 = arith.mulf %606, %596 : vector<16x16xf32>
    %608 = arith.addf %556, %607 : vector<16x16xf32>
    %c1_373 = arith.constant 1 : index
    %c3_374 = arith.constant 3 : index
    %609 = memref.load %arg4[%c1_373, %c3_374] : memref<4x9xf32, #tpu.memory_space<smem>>
    %610 = vector.broadcast %609 : f32 to vector<16x16xf32>
    %611 = arith.mulf %610, %596 : vector<16x16xf32>
    %612 = arith.addf %560, %611 : vector<16x16xf32>
    %c1_375 = arith.constant 1 : index
    %c4_376 = arith.constant 4 : index
    %613 = memref.load %arg4[%c1_375, %c4_376] : memref<4x9xf32, #tpu.memory_space<smem>>
    %614 = vector.broadcast %613 : f32 to vector<16x16xf32>
    %615 = arith.mulf %614, %596 : vector<16x16xf32>
    %616 = arith.addf %564, %615 : vector<16x16xf32>
    %c1_377 = arith.constant 1 : index
    %c5_378 = arith.constant 5 : index
    %617 = memref.load %arg4[%c1_377, %c5_378] : memref<4x9xf32, #tpu.memory_space<smem>>
    %618 = vector.broadcast %617 : f32 to vector<16x16xf32>
    %619 = arith.mulf %618, %596 : vector<16x16xf32>
    %620 = arith.addf %568, %619 : vector<16x16xf32>
    %c1_379 = arith.constant 1 : index
    %c6_380 = arith.constant 6 : index
    %621 = memref.load %arg4[%c1_379, %c6_380] : memref<4x9xf32, #tpu.memory_space<smem>>
    %622 = vector.broadcast %621 : f32 to vector<16x16xf32>
    %623 = arith.mulf %622, %596 : vector<16x16xf32>
    %624 = arith.addf %572, %623 : vector<16x16xf32>
    %c1_381 = arith.constant 1 : index
    %c7_382 = arith.constant 7 : index
    %625 = memref.load %arg4[%c1_381, %c7_382] : memref<4x9xf32, #tpu.memory_space<smem>>
    %626 = vector.broadcast %625 : f32 to vector<16x16xf32>
    %627 = arith.mulf %626, %596 : vector<16x16xf32>
    %628 = arith.addf %576, %627 : vector<16x16xf32>
    %c1_383 = arith.constant 1 : index
    %c8_384 = arith.constant 8 : index
    %629 = memref.load %arg4[%c1_383, %c8_384] : memref<4x9xf32, #tpu.memory_space<smem>>
    %630 = vector.broadcast %629 : f32 to vector<16x16xf32>
    %631 = arith.mulf %630, %596 : vector<16x16xf32>
    %632 = arith.addf %580, %631 : vector<16x16xf32>
    %c2_385 = arith.constant 2 : index
    %c0_386 = arith.constant 0 : index
    %633 = memref.load %arg2[%c2_385, %c0_386] : memref<4x3xf32, #tpu.memory_space<smem>>
    %634 = vector.broadcast %633 : f32 to vector<16x16xf32>
    %635 = arith.mulf %634, %515 : vector<16x16xf32>
    %c2_387 = arith.constant 2 : index
    %c1_388 = arith.constant 1 : index
    %636 = memref.load %arg2[%c2_387, %c1_388] : memref<4x3xf32, #tpu.memory_space<smem>>
    %637 = vector.broadcast %636 : f32 to vector<16x16xf32>
    %638 = arith.mulf %637, %517 : vector<16x16xf32>
    %639 = arith.addf %635, %638 : vector<16x16xf32>
    %c2_389 = arith.constant 2 : index
    %c2_390 = arith.constant 2 : index
    %640 = memref.load %arg2[%c2_389, %c2_390] : memref<4x3xf32, #tpu.memory_space<smem>>
    %641 = vector.broadcast %640 : f32 to vector<16x16xf32>
    %642 = arith.mulf %641, %519 : vector<16x16xf32>
    %643 = arith.addf %639, %642 : vector<16x16xf32>
    %c2_391 = arith.constant 2 : index
    %644 = memref.load %arg3[%c2_391] : memref<4xf32, #tpu.memory_space<smem>>
    %645 = vector.broadcast %644 : f32 to vector<16x16xf32>
    %646 = arith.addf %643, %645 : vector<16x16xf32>
    %cst_392 = arith.constant 0.000000e+00 : f32
    %647 = vector.broadcast %cst_392 : f32 to vector<16x16xf32>
    %648 = arith.maximumf %646, %647 : vector<16x16xf32>
    %c2_393 = arith.constant 2 : index
    %c0_394 = arith.constant 0 : index
    %649 = memref.load %arg4[%c2_393, %c0_394] : memref<4x9xf32, #tpu.memory_space<smem>>
    %650 = vector.broadcast %649 : f32 to vector<16x16xf32>
    %651 = arith.mulf %650, %648 : vector<16x16xf32>
    %652 = arith.addf %600, %651 : vector<16x16xf32>
    %c2_395 = arith.constant 2 : index
    %c1_396 = arith.constant 1 : index
    %653 = memref.load %arg4[%c2_395, %c1_396] : memref<4x9xf32, #tpu.memory_space<smem>>
    %654 = vector.broadcast %653 : f32 to vector<16x16xf32>
    %655 = arith.mulf %654, %648 : vector<16x16xf32>
    %656 = arith.addf %604, %655 : vector<16x16xf32>
    %c2_397 = arith.constant 2 : index
    %c2_398 = arith.constant 2 : index
    %657 = memref.load %arg4[%c2_397, %c2_398] : memref<4x9xf32, #tpu.memory_space<smem>>
    %658 = vector.broadcast %657 : f32 to vector<16x16xf32>
    %659 = arith.mulf %658, %648 : vector<16x16xf32>
    %660 = arith.addf %608, %659 : vector<16x16xf32>
    %c2_399 = arith.constant 2 : index
    %c3_400 = arith.constant 3 : index
    %661 = memref.load %arg4[%c2_399, %c3_400] : memref<4x9xf32, #tpu.memory_space<smem>>
    %662 = vector.broadcast %661 : f32 to vector<16x16xf32>
    %663 = arith.mulf %662, %648 : vector<16x16xf32>
    %664 = arith.addf %612, %663 : vector<16x16xf32>
    %c2_401 = arith.constant 2 : index
    %c4_402 = arith.constant 4 : index
    %665 = memref.load %arg4[%c2_401, %c4_402] : memref<4x9xf32, #tpu.memory_space<smem>>
    %666 = vector.broadcast %665 : f32 to vector<16x16xf32>
    %667 = arith.mulf %666, %648 : vector<16x16xf32>
    %668 = arith.addf %616, %667 : vector<16x16xf32>
    %c2_403 = arith.constant 2 : index
    %c5_404 = arith.constant 5 : index
    %669 = memref.load %arg4[%c2_403, %c5_404] : memref<4x9xf32, #tpu.memory_space<smem>>
    %670 = vector.broadcast %669 : f32 to vector<16x16xf32>
    %671 = arith.mulf %670, %648 : vector<16x16xf32>
    %672 = arith.addf %620, %671 : vector<16x16xf32>
    %c2_405 = arith.constant 2 : index
    %c6_406 = arith.constant 6 : index
    %673 = memref.load %arg4[%c2_405, %c6_406] : memref<4x9xf32, #tpu.memory_space<smem>>
    %674 = vector.broadcast %673 : f32 to vector<16x16xf32>
    %675 = arith.mulf %674, %648 : vector<16x16xf32>
    %676 = arith.addf %624, %675 : vector<16x16xf32>
    %c2_407 = arith.constant 2 : index
    %c7_408 = arith.constant 7 : index
    %677 = memref.load %arg4[%c2_407, %c7_408] : memref<4x9xf32, #tpu.memory_space<smem>>
    %678 = vector.broadcast %677 : f32 to vector<16x16xf32>
    %679 = arith.mulf %678, %648 : vector<16x16xf32>
    %680 = arith.addf %628, %679 : vector<16x16xf32>
    %c2_409 = arith.constant 2 : index
    %c8_410 = arith.constant 8 : index
    %681 = memref.load %arg4[%c2_409, %c8_410] : memref<4x9xf32, #tpu.memory_space<smem>>
    %682 = vector.broadcast %681 : f32 to vector<16x16xf32>
    %683 = arith.mulf %682, %648 : vector<16x16xf32>
    %684 = arith.addf %632, %683 : vector<16x16xf32>
    %c3_411 = arith.constant 3 : index
    %c0_412 = arith.constant 0 : index
    %685 = memref.load %arg2[%c3_411, %c0_412] : memref<4x3xf32, #tpu.memory_space<smem>>
    %686 = vector.broadcast %685 : f32 to vector<16x16xf32>
    %687 = arith.mulf %686, %515 : vector<16x16xf32>
    %c3_413 = arith.constant 3 : index
    %c1_414 = arith.constant 1 : index
    %688 = memref.load %arg2[%c3_413, %c1_414] : memref<4x3xf32, #tpu.memory_space<smem>>
    %689 = vector.broadcast %688 : f32 to vector<16x16xf32>
    %690 = arith.mulf %689, %517 : vector<16x16xf32>
    %691 = arith.addf %687, %690 : vector<16x16xf32>
    %c3_415 = arith.constant 3 : index
    %c2_416 = arith.constant 2 : index
    %692 = memref.load %arg2[%c3_415, %c2_416] : memref<4x3xf32, #tpu.memory_space<smem>>
    %693 = vector.broadcast %692 : f32 to vector<16x16xf32>
    %694 = arith.mulf %693, %519 : vector<16x16xf32>
    %695 = arith.addf %691, %694 : vector<16x16xf32>
    %c3_417 = arith.constant 3 : index
    %696 = memref.load %arg3[%c3_417] : memref<4xf32, #tpu.memory_space<smem>>
    %697 = vector.broadcast %696 : f32 to vector<16x16xf32>
    %698 = arith.addf %695, %697 : vector<16x16xf32>
    %cst_418 = arith.constant 0.000000e+00 : f32
    %699 = vector.broadcast %cst_418 : f32 to vector<16x16xf32>
    %700 = arith.maximumf %698, %699 : vector<16x16xf32>
    %c3_419 = arith.constant 3 : index
    %c0_420 = arith.constant 0 : index
    %701 = memref.load %arg4[%c3_419, %c0_420] : memref<4x9xf32, #tpu.memory_space<smem>>
    %702 = vector.broadcast %701 : f32 to vector<16x16xf32>
    %703 = arith.mulf %702, %700 : vector<16x16xf32>
    %704 = arith.addf %652, %703 : vector<16x16xf32>
    %c3_421 = arith.constant 3 : index
    %c1_422 = arith.constant 1 : index
    %705 = memref.load %arg4[%c3_421, %c1_422] : memref<4x9xf32, #tpu.memory_space<smem>>
    %706 = vector.broadcast %705 : f32 to vector<16x16xf32>
    %707 = arith.mulf %706, %700 : vector<16x16xf32>
    %708 = arith.addf %656, %707 : vector<16x16xf32>
    %c3_423 = arith.constant 3 : index
    %c2_424 = arith.constant 2 : index
    %709 = memref.load %arg4[%c3_423, %c2_424] : memref<4x9xf32, #tpu.memory_space<smem>>
    %710 = vector.broadcast %709 : f32 to vector<16x16xf32>
    %711 = arith.mulf %710, %700 : vector<16x16xf32>
    %712 = arith.addf %660, %711 : vector<16x16xf32>
    %c3_425 = arith.constant 3 : index
    %c3_426 = arith.constant 3 : index
    %713 = memref.load %arg4[%c3_425, %c3_426] : memref<4x9xf32, #tpu.memory_space<smem>>
    %714 = vector.broadcast %713 : f32 to vector<16x16xf32>
    %715 = arith.mulf %714, %700 : vector<16x16xf32>
    %716 = arith.addf %664, %715 : vector<16x16xf32>
    %c3_427 = arith.constant 3 : index
    %c4_428 = arith.constant 4 : index
    %717 = memref.load %arg4[%c3_427, %c4_428] : memref<4x9xf32, #tpu.memory_space<smem>>
    %718 = vector.broadcast %717 : f32 to vector<16x16xf32>
    %719 = arith.mulf %718, %700 : vector<16x16xf32>
    %720 = arith.addf %668, %719 : vector<16x16xf32>
    %c3_429 = arith.constant 3 : index
    %c5_430 = arith.constant 5 : index
    %721 = memref.load %arg4[%c3_429, %c5_430] : memref<4x9xf32, #tpu.memory_space<smem>>
    %722 = vector.broadcast %721 : f32 to vector<16x16xf32>
    %723 = arith.mulf %722, %700 : vector<16x16xf32>
    %724 = arith.addf %672, %723 : vector<16x16xf32>
    %c3_431 = arith.constant 3 : index
    %c6_432 = arith.constant 6 : index
    %725 = memref.load %arg4[%c3_431, %c6_432] : memref<4x9xf32, #tpu.memory_space<smem>>
    %726 = vector.broadcast %725 : f32 to vector<16x16xf32>
    %727 = arith.mulf %726, %700 : vector<16x16xf32>
    %728 = arith.addf %676, %727 : vector<16x16xf32>
    %c3_433 = arith.constant 3 : index
    %c7_434 = arith.constant 7 : index
    %729 = memref.load %arg4[%c3_433, %c7_434] : memref<4x9xf32, #tpu.memory_space<smem>>
    %730 = vector.broadcast %729 : f32 to vector<16x16xf32>
    %731 = arith.mulf %730, %700 : vector<16x16xf32>
    %732 = arith.addf %680, %731 : vector<16x16xf32>
    %c3_435 = arith.constant 3 : index
    %c8_436 = arith.constant 8 : index
    %733 = memref.load %arg4[%c3_435, %c8_436] : memref<4x9xf32, #tpu.memory_space<smem>>
    %734 = vector.broadcast %733 : f32 to vector<16x16xf32>
    %735 = arith.mulf %734, %700 : vector<16x16xf32>
    %736 = arith.addf %684, %735 : vector<16x16xf32>
    %737 = vector.broadcast %2 : f32 to vector<16x16xf32>
    %738 = arith.addf %517, %737 : vector<16x16xf32>
    %739 = arith.addf %738, %720 : vector<16x16xf32>
    %c8_437 = arith.constant 8 : index
    %c128_438 = arith.constant 128 : index
    %740 = vector.load %arg10[%c8_437, %c128_438] : memref<32x152xf32, #tpu.memory_space<vmem>>, vector<16x16xf32>
    tpu.vector_store %arg10[%c8_437, %c128_438], %704 {strides = array<i32>} : memref<32x152xf32, #tpu.memory_space<vmem>>, vector<16x16xf32>,
    %c7_439 = arith.constant 7 : index
    %c127_440 = arith.constant 127 : index
    %741 = vector.load %arg10[%c7_439, %c127_440] : memref<32x152xf32, #tpu.memory_space<vmem>>, vector<16x16xf32>
    %742 = arith.addf %739, %741 : vector<16x16xf32>
    %c8_441 = arith.constant 8 : index
    %c128_442 = arith.constant 128 : index
    %743 = vector.load %arg10[%c8_441, %c128_442] : memref<32x152xf32, #tpu.memory_space<vmem>>, vector<16x16xf32>
    tpu.vector_store %arg10[%c8_441, %c128_442], %708 {strides = array<i32>} : memref<32x152xf32, #tpu.memory_space<vmem>>, vector<16x16xf32>,
    %c7_443 = arith.constant 7 : index
    %c128_444 = arith.constant 128 : index
    %744 = vector.load %arg10[%c7_443, %c128_444] : memref<32x152xf32, #tpu.memory_space<vmem>>, vector<16x16xf32>
    %745 = arith.addf %742, %744 : vector<16x16xf32>
    %c8_445 = arith.constant 8 : index
    %c128_446 = arith.constant 128 : index
    %746 = vector.load %arg10[%c8_445, %c128_446] : memref<32x152xf32, #tpu.memory_space<vmem>>, vector<16x16xf32>
    tpu.vector_store %arg10[%c8_445, %c128_446], %712 {strides = array<i32>} : memref<32x152xf32, #tpu.memory_space<vmem>>, vector<16x16xf32>,
    %c7_447 = arith.constant 7 : index
    %c129_448 = arith.constant 129 : index
    %747 = vector.load %arg10[%c7_447, %c129_448] : memref<32x152xf32, #tpu.memory_space<vmem>>, vector<16x16xf32>
    %748 = arith.addf %745, %747 : vector<16x16xf32>
    %c8_449 = arith.constant 8 : index
    %c128_450 = arith.constant 128 : index
    %749 = vector.load %arg10[%c8_449, %c128_450] : memref<32x152xf32, #tpu.memory_space<vmem>>, vector<16x16xf32>
    tpu.vector_store %arg10[%c8_449, %c128_450], %716 {strides = array<i32>} : memref<32x152xf32, #tpu.memory_space<vmem>>, vector<16x16xf32>,
    %c8_451 = arith.constant 8 : index
    %c127_452 = arith.constant 127 : index
    %750 = vector.load %arg10[%c8_451, %c127_452] : memref<32x152xf32, #tpu.memory_space<vmem>>, vector<16x16xf32>
    %751 = arith.addf %748, %750 : vector<16x16xf32>
    %c8_453 = arith.constant 8 : index
    %c128_454 = arith.constant 128 : index
    %752 = vector.load %arg10[%c8_453, %c128_454] : memref<32x152xf32, #tpu.memory_space<vmem>>, vector<16x16xf32>
    tpu.vector_store %arg10[%c8_453, %c128_454], %724 {strides = array<i32>} : memref<32x152xf32, #tpu.memory_space<vmem>>, vector<16x16xf32>,
    %c8_455 = arith.constant 8 : index
    %c129_456 = arith.constant 129 : index
    %753 = vector.load %arg10[%c8_455, %c129_456] : memref<32x152xf32, #tpu.memory_space<vmem>>, vector<16x16xf32>
    %754 = arith.addf %751, %753 : vector<16x16xf32>
    %c8_457 = arith.constant 8 : index
    %c128_458 = arith.constant 128 : index
    %755 = vector.load %arg10[%c8_457, %c128_458] : memref<32x152xf32, #tpu.memory_space<vmem>>, vector<16x16xf32>
    tpu.vector_store %arg10[%c8_457, %c128_458], %728 {strides = array<i32>} : memref<32x152xf32, #tpu.memory_space<vmem>>, vector<16x16xf32>,
    %c9_459 = arith.constant 9 : index
    %c127_460 = arith.constant 127 : index
    %756 = vector.load %arg10[%c9_459, %c127_460] : memref<32x152xf32, #tpu.memory_space<vmem>>, vector<16x16xf32>
    %757 = arith.addf %754, %756 : vector<16x16xf32>
    %c8_461 = arith.constant 8 : index
    %c128_462 = arith.constant 128 : index
    %758 = vector.load %arg10[%c8_461, %c128_462] : memref<32x152xf32, #tpu.memory_space<vmem>>, vector<16x16xf32>
    tpu.vector_store %arg10[%c8_461, %c128_462], %732 {strides = array<i32>} : memref<32x152xf32, #tpu.memory_space<vmem>>, vector<16x16xf32>,
    %c9_463 = arith.constant 9 : index
    %c128_464 = arith.constant 128 : index
    %759 = vector.load %arg10[%c9_463, %c128_464] : memref<32x152xf32, #tpu.memory_space<vmem>>, vector<16x16xf32>
    %760 = arith.addf %757, %759 : vector<16x16xf32>
    %c8_465 = arith.constant 8 : index
    %c128_466 = arith.constant 128 : index
    %761 = vector.load %arg10[%c8_465, %c128_466] : memref<32x152xf32, #tpu.memory_space<vmem>>, vector<16x16xf32>
    tpu.vector_store %arg10[%c8_465, %c128_466], %736 {strides = array<i32>} : memref<32x152xf32, #tpu.memory_space<vmem>>, vector<16x16xf32>,
    %c9_467 = arith.constant 9 : index
    %c129_468 = arith.constant 129 : index
    %762 = vector.load %arg10[%c9_467, %c129_468] : memref<32x152xf32, #tpu.memory_space<vmem>>, vector<16x16xf32>
    %763 = arith.addf %760, %762 : vector<16x16xf32>
    %c0_469 = arith.constant 0 : index
    %c2_470 = arith.constant 2 : index
    %c0_471 = arith.constant 0 : index
    %c0_472 = arith.constant 0 : index
    %764 = vector.load %arg9[%c0_469, %c2_470, %c0_471, %c0_472] : memref<1x4x16x16xf32, #tpu.memory_space<vmem>>, vector<1x1x16x16xf32>
    %765 = vector.shape_cast %764 : vector<1x1x16x16xf32> to vector<16x16xf32>
    %766 = vector.shape_cast %763 : vector<16x16xf32> to vector<1x1x16x16xf32>
    tpu.vector_store %arg9[%c0_469, %c2_470, %c0_471, %c0_472], %766 {strides = array<i32>} : memref<1x4x16x16xf32, #tpu.memory_space<vmem>>, vector<1x1x16x16xf32>,
    %c0_473 = arith.constant 0 : index
    %c2_474 = arith.constant 2 : index
    %c0_475 = arith.constant 0 : index
    %c0_476 = arith.constant 0 : index
    %767 = vector.load %arg7[%c0_473, %c2_474, %c0_475, %c0_476] : memref<1x4x16x16xf32, #tpu.memory_space<vmem>>, vector<1x1x16x16xf32>
    %768 = vector.shape_cast %767 : vector<1x1x16x16xf32> to vector<16x16xf32>
    %c0_477 = arith.constant 0 : index
    %c3_478 = arith.constant 3 : index
    %c0_479 = arith.constant 0 : index
    %c0_480 = arith.constant 0 : index
    %769 = vector.load %arg7[%c0_477, %c3_478, %c0_479, %c0_480] : memref<1x4x16x16xf32, #tpu.memory_space<vmem>>, vector<1x1x16x16xf32>
    %770 = vector.shape_cast %769 : vector<1x1x16x16xf32> to vector<16x16xf32>
    %c0_481 = arith.constant 0 : index
    %c0_482 = arith.constant 0 : index
    %c0_483 = arith.constant 0 : index
    %c0_484 = arith.constant 0 : index
    %771 = vector.load %arg8[%c0_481, %c0_482, %c0_483, %c0_484] : memref<1x1x16x16xf32, #tpu.memory_space<vmem>>, vector<1x1x16x16xf32>
    %772 = vector.shape_cast %771 : vector<1x1x16x16xf32> to vector<16x16xf32>
    %c1_i32 = arith.constant 1 : i32
    %773 = arith.cmpi slt, %arg1, %c1_i32 : i32
    %774 = arith.extui %773 : i1 to i32
    %775 = arith.sitofp %774 : i32 to f32
    %776 = vector.broadcast %775 : f32 to vector<16x16xf32>
    %777 = arith.mulf %772, %776 : vector<16x16xf32>
    %cst_485 = arith.constant 0.000000e+00 : f32
    %778 = vector.broadcast %cst_485 : f32 to vector<16x16xf32>
    %cst_486 = arith.constant 0.000000e+00 : f32
    %779 = vector.broadcast %cst_486 : f32 to vector<16x16xf32>
    %cst_487 = arith.constant 0.000000e+00 : f32
    %780 = vector.broadcast %cst_487 : f32 to vector<16x16xf32>
    %cst_488 = arith.constant 0.000000e+00 : f32
    %781 = vector.broadcast %cst_488 : f32 to vector<16x16xf32>
    %cst_489 = arith.constant 0.000000e+00 : f32
    %782 = vector.broadcast %cst_489 : f32 to vector<16x16xf32>
    %cst_490 = arith.constant 0.000000e+00 : f32
    %783 = vector.broadcast %cst_490 : f32 to vector<16x16xf32>
    %cst_491 = arith.constant 0.000000e+00 : f32
    %784 = vector.broadcast %cst_491 : f32 to vector<16x16xf32>
    %cst_492 = arith.constant 0.000000e+00 : f32
    %785 = vector.broadcast %cst_492 : f32 to vector<16x16xf32>
    %cst_493 = arith.constant 0.000000e+00 : f32
    %786 = vector.broadcast %cst_493 : f32 to vector<16x16xf32>
    %c0_494 = arith.constant 0 : index
    %c0_495 = arith.constant 0 : index
    %787 = memref.load %arg2[%c0_494, %c0_495] : memref<4x3xf32, #tpu.memory_space<smem>>
    %788 = vector.broadcast %787 : f32 to vector<16x16xf32>
    %789 = arith.mulf %788, %768 : vector<16x16xf32>
    %c0_496 = arith.constant 0 : index
    %c1_497 = arith.constant 1 : index
    %790 = memref.load %arg2[%c0_496, %c1_497] : memref<4x3xf32, #tpu.memory_space<smem>>
    %791 = vector.broadcast %790 : f32 to vector<16x16xf32>
    %792 = arith.mulf %791, %770 : vector<16x16xf32>
    %793 = arith.addf %789, %792 : vector<16x16xf32>
    %c0_498 = arith.constant 0 : index
    %c2_499 = arith.constant 2 : index
    %794 = memref.load %arg2[%c0_498, %c2_499] : memref<4x3xf32, #tpu.memory_space<smem>>
    %795 = vector.broadcast %794 : f32 to vector<16x16xf32>
    %796 = arith.mulf %795, %777 : vector<16x16xf32>
    %797 = arith.addf %793, %796 : vector<16x16xf32>
    %c0_500 = arith.constant 0 : index
    %798 = memref.load %arg3[%c0_500] : memref<4xf32, #tpu.memory_space<smem>>
    %799 = vector.broadcast %798 : f32 to vector<16x16xf32>
    %800 = arith.addf %797, %799 : vector<16x16xf32>
    %cst_501 = arith.constant 0.000000e+00 : f32
    %801 = vector.broadcast %cst_501 : f32 to vector<16x16xf32>
    %802 = arith.maximumf %800, %801 : vector<16x16xf32>
    %c0_502 = arith.constant 0 : index
    %c0_503 = arith.constant 0 : index
    %803 = memref.load %arg4[%c0_502, %c0_503] : memref<4x9xf32, #tpu.memory_space<smem>>
    %804 = vector.broadcast %803 : f32 to vector<16x16xf32>
    %805 = arith.mulf %804, %802 : vector<16x16xf32>
    %806 = arith.addf %778, %805 : vector<16x16xf32>
    %c0_504 = arith.constant 0 : index
    %c1_505 = arith.constant 1 : index
    %807 = memref.load %arg4[%c0_504, %c1_505] : memref<4x9xf32, #tpu.memory_space<smem>>
    %808 = vector.broadcast %807 : f32 to vector<16x16xf32>
    %809 = arith.mulf %808, %802 : vector<16x16xf32>
    %810 = arith.addf %779, %809 : vector<16x16xf32>
    %c0_506 = arith.constant 0 : index
    %c2_507 = arith.constant 2 : index
    %811 = memref.load %arg4[%c0_506, %c2_507] : memref<4x9xf32, #tpu.memory_space<smem>>
    %812 = vector.broadcast %811 : f32 to vector<16x16xf32>
    %813 = arith.mulf %812, %802 : vector<16x16xf32>
    %814 = arith.addf %780, %813 : vector<16x16xf32>
    %c0_508 = arith.constant 0 : index
    %c3_509 = arith.constant 3 : index
    %815 = memref.load %arg4[%c0_508, %c3_509] : memref<4x9xf32, #tpu.memory_space<smem>>
    %816 = vector.broadcast %815 : f32 to vector<16x16xf32>
    %817 = arith.mulf %816, %802 : vector<16x16xf32>
    %818 = arith.addf %781, %817 : vector<16x16xf32>
    %c0_510 = arith.constant 0 : index
    %c4_511 = arith.constant 4 : index
    %819 = memref.load %arg4[%c0_510, %c4_511] : memref<4x9xf32, #tpu.memory_space<smem>>
    %820 = vector.broadcast %819 : f32 to vector<16x16xf32>
    %821 = arith.mulf %820, %802 : vector<16x16xf32>
    %822 = arith.addf %782, %821 : vector<16x16xf32>
    %c0_512 = arith.constant 0 : index
    %c5_513 = arith.constant 5 : index
    %823 = memref.load %arg4[%c0_512, %c5_513] : memref<4x9xf32, #tpu.memory_space<smem>>
    %824 = vector.broadcast %823 : f32 to vector<16x16xf32>
    %825 = arith.mulf %824, %802 : vector<16x16xf32>
    %826 = arith.addf %783, %825 : vector<16x16xf32>
    %c0_514 = arith.constant 0 : index
    %c6_515 = arith.constant 6 : index
    %827 = memref.load %arg4[%c0_514, %c6_515] : memref<4x9xf32, #tpu.memory_space<smem>>
    %828 = vector.broadcast %827 : f32 to vector<16x16xf32>
    %829 = arith.mulf %828, %802 : vector<16x16xf32>
    %830 = arith.addf %784, %829 : vector<16x16xf32>
    %c0_516 = arith.constant 0 : index
    %c7_517 = arith.constant 7 : index
    %831 = memref.load %arg4[%c0_516, %c7_517] : memref<4x9xf32, #tpu.memory_space<smem>>
    %832 = vector.broadcast %831 : f32 to vector<16x16xf32>
    %833 = arith.mulf %832, %802 : vector<16x16xf32>
    %834 = arith.addf %785, %833 : vector<16x16xf32>
    %c0_518 = arith.constant 0 : index
    %c8_519 = arith.constant 8 : index
    %835 = memref.load %arg4[%c0_518, %c8_519] : memref<4x9xf32, #tpu.memory_space<smem>>
    %836 = vector.broadcast %835 : f32 to vector<16x16xf32>
    %837 = arith.mulf %836, %802 : vector<16x16xf32>
    %838 = arith.addf %786, %837 : vector<16x16xf32>
    %c1_520 = arith.constant 1 : index
    %c0_521 = arith.constant 0 : index
    %839 = memref.load %arg2[%c1_520, %c0_521] : memref<4x3xf32, #tpu.memory_space<smem>>
    %840 = vector.broadcast %839 : f32 to vector<16x16xf32>
    %841 = arith.mulf %840, %768 : vector<16x16xf32>
    %c1_522 = arith.constant 1 : index
    %c1_523 = arith.constant 1 : index
    %842 = memref.load %arg2[%c1_522, %c1_523] : memref<4x3xf32, #tpu.memory_space<smem>>
    %843 = vector.broadcast %842 : f32 to vector<16x16xf32>
    %844 = arith.mulf %843, %770 : vector<16x16xf32>
    %845 = arith.addf %841, %844 : vector<16x16xf32>
    %c1_524 = arith.constant 1 : index
    %c2_525 = arith.constant 2 : index
    %846 = memref.load %arg2[%c1_524, %c2_525] : memref<4x3xf32, #tpu.memory_space<smem>>
    %847 = vector.broadcast %846 : f32 to vector<16x16xf32>
    %848 = arith.mulf %847, %777 : vector<16x16xf32>
    %849 = arith.addf %845, %848 : vector<16x16xf32>
    %c1_526 = arith.constant 1 : index
    %850 = memref.load %arg3[%c1_526] : memref<4xf32, #tpu.memory_space<smem>>
    %851 = vector.broadcast %850 : f32 to vector<16x16xf32>
    %852 = arith.addf %849, %851 : vector<16x16xf32>
    %cst_527 = arith.constant 0.000000e+00 : f32
    %853 = vector.broadcast %cst_527 : f32 to vector<16x16xf32>
    %854 = arith.maximumf %852, %853 : vector<16x16xf32>
    %c1_528 = arith.constant 1 : index
    %c0_529 = arith.constant 0 : index
    %855 = memref.load %arg4[%c1_528, %c0_529] : memref<4x9xf32, #tpu.memory_space<smem>>
    %856 = vector.broadcast %855 : f32 to vector<16x16xf32>
    %857 = arith.mulf %856, %854 : vector<16x16xf32>
    %858 = arith.addf %806, %857 : vector<16x16xf32>
    %c1_530 = arith.constant 1 : index
    %c1_531 = arith.constant 1 : index
    %859 = memref.load %arg4[%c1_530, %c1_531] : memref<4x9xf32, #tpu.memory_space<smem>>
    %860 = vector.broadcast %859 : f32 to vector<16x16xf32>
    %861 = arith.mulf %860, %854 : vector<16x16xf32>
    %862 = arith.addf %810, %861 : vector<16x16xf32>
    %c1_532 = arith.constant 1 : index
    %c2_533 = arith.constant 2 : index
    %863 = memref.load %arg4[%c1_532, %c2_533] : memref<4x9xf32, #tpu.memory_space<smem>>
    %864 = vector.broadcast %863 : f32 to vector<16x16xf32>
    %865 = arith.mulf %864, %854 : vector<16x16xf32>
    %866 = arith.addf %814, %865 : vector<16x16xf32>
    %c1_534 = arith.constant 1 : index
    %c3_535 = arith.constant 3 : index
    %867 = memref.load %arg4[%c1_534, %c3_535] : memref<4x9xf32, #tpu.memory_space<smem>>
    %868 = vector.broadcast %867 : f32 to vector<16x16xf32>
    %869 = arith.mulf %868, %854 : vector<16x16xf32>
    %870 = arith.addf %818, %869 : vector<16x16xf32>
    %c1_536 = arith.constant 1 : index
    %c4_537 = arith.constant 4 : index
    %871 = memref.load %arg4[%c1_536, %c4_537] : memref<4x9xf32, #tpu.memory_space<smem>>
    %872 = vector.broadcast %871 : f32 to vector<16x16xf32>
    %873 = arith.mulf %872, %854 : vector<16x16xf32>
    %874 = arith.addf %822, %873 : vector<16x16xf32>
    %c1_538 = arith.constant 1 : index
    %c5_539 = arith.constant 5 : index
    %875 = memref.load %arg4[%c1_538, %c5_539] : memref<4x9xf32, #tpu.memory_space<smem>>
    %876 = vector.broadcast %875 : f32 to vector<16x16xf32>
    %877 = arith.mulf %876, %854 : vector<16x16xf32>
    %878 = arith.addf %826, %877 : vector<16x16xf32>
    %c1_540 = arith.constant 1 : index
    %c6_541 = arith.constant 6 : index
    %879 = memref.load %arg4[%c1_540, %c6_541] : memref<4x9xf32, #tpu.memory_space<smem>>
    %880 = vector.broadcast %879 : f32 to vector<16x16xf32>
    %881 = arith.mulf %880, %854 : vector<16x16xf32>
    %882 = arith.addf %830, %881 : vector<16x16xf32>
    %c1_542 = arith.constant 1 : index
    %c7_543 = arith.constant 7 : index
    %883 = memref.load %arg4[%c1_542, %c7_543] : memref<4x9xf32, #tpu.memory_space<smem>>
    %884 = vector.broadcast %883 : f32 to vector<16x16xf32>
    %885 = arith.mulf %884, %854 : vector<16x16xf32>
    %886 = arith.addf %834, %885 : vector<16x16xf32>
    %c1_544 = arith.constant 1 : index
    %c8_545 = arith.constant 8 : index
    %887 = memref.load %arg4[%c1_544, %c8_545] : memref<4x9xf32, #tpu.memory_space<smem>>
    %888 = vector.broadcast %887 : f32 to vector<16x16xf32>
    %889 = arith.mulf %888, %854 : vector<16x16xf32>
    %890 = arith.addf %838, %889 : vector<16x16xf32>
    %c2_546 = arith.constant 2 : index
    %c0_547 = arith.constant 0 : index
    %891 = memref.load %arg2[%c2_546, %c0_547] : memref<4x3xf32, #tpu.memory_space<smem>>
    %892 = vector.broadcast %891 : f32 to vector<16x16xf32>
    %893 = arith.mulf %892, %768 : vector<16x16xf32>
    %c2_548 = arith.constant 2 : index
    %c1_549 = arith.constant 1 : index
    %894 = memref.load %arg2[%c2_548, %c1_549] : memref<4x3xf32, #tpu.memory_space<smem>>
    %895 = vector.broadcast %894 : f32 to vector<16x16xf32>
    %896 = arith.mulf %895, %770 : vector<16x16xf32>
    %897 = arith.addf %893, %896 : vector<16x16xf32>
    %c2_550 = arith.constant 2 : index
    %c2_551 = arith.constant 2 : index
    %898 = memref.load %arg2[%c2_550, %c2_551] : memref<4x3xf32, #tpu.memory_space<smem>>
    %899 = vector.broadcast %898 : f32 to vector<16x16xf32>
    %900 = arith.mulf %899, %777 : vector<16x16xf32>
    %901 = arith.addf %897, %900 : vector<16x16xf32>
    %c2_552 = arith.constant 2 : index
    %902 = memref.load %arg3[%c2_552] : memref<4xf32, #tpu.memory_space<smem>>
    %903 = vector.broadcast %902 : f32 to vector<16x16xf32>
    %904 = arith.addf %901, %903 : vector<16x16xf32>
    %cst_553 = arith.constant 0.000000e+00 : f32
    %905 = vector.broadcast %cst_553 : f32 to vector<16x16xf32>
    %906 = arith.maximumf %904, %905 : vector<16x16xf32>
    %c2_554 = arith.constant 2 : index
    %c0_555 = arith.constant 0 : index
    %907 = memref.load %arg4[%c2_554, %c0_555] : memref<4x9xf32, #tpu.memory_space<smem>>
    %908 = vector.broadcast %907 : f32 to vector<16x16xf32>
    %909 = arith.mulf %908, %906 : vector<16x16xf32>
    %910 = arith.addf %858, %909 : vector<16x16xf32>
    %c2_556 = arith.constant 2 : index
    %c1_557 = arith.constant 1 : index
    %911 = memref.load %arg4[%c2_556, %c1_557] : memref<4x9xf32, #tpu.memory_space<smem>>
    %912 = vector.broadcast %911 : f32 to vector<16x16xf32>
    %913 = arith.mulf %912, %906 : vector<16x16xf32>
    %914 = arith.addf %862, %913 : vector<16x16xf32>
    %c2_558 = arith.constant 2 : index
    %c2_559 = arith.constant 2 : index
    %915 = memref.load %arg4[%c2_558, %c2_559] : memref<4x9xf32, #tpu.memory_space<smem>>
    %916 = vector.broadcast %915 : f32 to vector<16x16xf32>
    %917 = arith.mulf %916, %906 : vector<16x16xf32>
    %918 = arith.addf %866, %917 : vector<16x16xf32>
    %c2_560 = arith.constant 2 : index
    %c3_561 = arith.constant 3 : index
    %919 = memref.load %arg4[%c2_560, %c3_561] : memref<4x9xf32, #tpu.memory_space<smem>>
    %920 = vector.broadcast %919 : f32 to vector<16x16xf32>
    %921 = arith.mulf %920, %906 : vector<16x16xf32>
    %922 = arith.addf %870, %921 : vector<16x16xf32>
    %c2_562 = arith.constant 2 : index
    %c4_563 = arith.constant 4 : index
    %923 = memref.load %arg4[%c2_562, %c4_563] : memref<4x9xf32, #tpu.memory_space<smem>>
    %924 = vector.broadcast %923 : f32 to vector<16x16xf32>
    %925 = arith.mulf %924, %906 : vector<16x16xf32>
    %926 = arith.addf %874, %925 : vector<16x16xf32>
    %c2_564 = arith.constant 2 : index
    %c5_565 = arith.constant 5 : index
    %927 = memref.load %arg4[%c2_564, %c5_565] : memref<4x9xf32, #tpu.memory_space<smem>>
    %928 = vector.broadcast %927 : f32 to vector<16x16xf32>
    %929 = arith.mulf %928, %906 : vector<16x16xf32>
    %930 = arith.addf %878, %929 : vector<16x16xf32>
    %c2_566 = arith.constant 2 : index
    %c6_567 = arith.constant 6 : index
    %931 = memref.load %arg4[%c2_566, %c6_567] : memref<4x9xf32, #tpu.memory_space<smem>>
    %932 = vector.broadcast %931 : f32 to vector<16x16xf32>
    %933 = arith.mulf %932, %906 : vector<16x16xf32>
    %934 = arith.addf %882, %933 : vector<16x16xf32>
    %c2_568 = arith.constant 2 : index
    %c7_569 = arith.constant 7 : index
    %935 = memref.load %arg4[%c2_568, %c7_569] : memref<4x9xf32, #tpu.memory_space<smem>>
    %936 = vector.broadcast %935 : f32 to vector<16x16xf32>
    %937 = arith.mulf %936, %906 : vector<16x16xf32>
    %938 = arith.addf %886, %937 : vector<16x16xf32>
    %c2_570 = arith.constant 2 : index
    %c8_571 = arith.constant 8 : index
    %939 = memref.load %arg4[%c2_570, %c8_571] : memref<4x9xf32, #tpu.memory_space<smem>>
    %940 = vector.broadcast %939 : f32 to vector<16x16xf32>
    %941 = arith.mulf %940, %906 : vector<16x16xf32>
    %942 = arith.addf %890, %941 : vector<16x16xf32>
    %c3_572 = arith.constant 3 : index
    %c0_573 = arith.constant 0 : index
    %943 = memref.load %arg2[%c3_572, %c0_573] : memref<4x3xf32, #tpu.memory_space<smem>>
    %944 = vector.broadcast %943 : f32 to vector<16x16xf32>
    %945 = arith.mulf %944, %768 : vector<16x16xf32>
    %c3_574 = arith.constant 3 : index
    %c1_575 = arith.constant 1 : index
    %946 = memref.load %arg2[%c3_574, %c1_575] : memref<4x3xf32, #tpu.memory_space<smem>>
    %947 = vector.broadcast %946 : f32 to vector<16x16xf32>
    %948 = arith.mulf %947, %770 : vector<16x16xf32>
    %949 = arith.addf %945, %948 : vector<16x16xf32>
    %c3_576 = arith.constant 3 : index
    %c2_577 = arith.constant 2 : index
    %950 = memref.load %arg2[%c3_576, %c2_577] : memref<4x3xf32, #tpu.memory_space<smem>>
    %951 = vector.broadcast %950 : f32 to vector<16x16xf32>
    %952 = arith.mulf %951, %777 : vector<16x16xf32>
    %953 = arith.addf %949, %952 : vector<16x16xf32>
    %c3_578 = arith.constant 3 : index
    %954 = memref.load %arg3[%c3_578] : memref<4xf32, #tpu.memory_space<smem>>
    %955 = vector.broadcast %954 : f32 to vector<16x16xf32>
    %956 = arith.addf %953, %955 : vector<16x16xf32>
    %cst_579 = arith.constant 0.000000e+00 : f32
    %957 = vector.broadcast %cst_579 : f32 to vector<16x16xf32>
    %958 = arith.maximumf %956, %957 : vector<16x16xf32>
    %c3_580 = arith.constant 3 : index
    %c0_581 = arith.constant 0 : index
    %959 = memref.load %arg4[%c3_580, %c0_581] : memref<4x9xf32, #tpu.memory_space<smem>>
    %960 = vector.broadcast %959 : f32 to vector<16x16xf32>
    %961 = arith.mulf %960, %958 : vector<16x16xf32>
    %962 = arith.addf %910, %961 : vector<16x16xf32>
    %c3_582 = arith.constant 3 : index
    %c1_583 = arith.constant 1 : index
    %963 = memref.load %arg4[%c3_582, %c1_583] : memref<4x9xf32, #tpu.memory_space<smem>>
    %964 = vector.broadcast %963 : f32 to vector<16x16xf32>
    %965 = arith.mulf %964, %958 : vector<16x16xf32>
    %966 = arith.addf %914, %965 : vector<16x16xf32>
    %c3_584 = arith.constant 3 : index
    %c2_585 = arith.constant 2 : index
    %967 = memref.load %arg4[%c3_584, %c2_585] : memref<4x9xf32, #tpu.memory_space<smem>>
    %968 = vector.broadcast %967 : f32 to vector<16x16xf32>
    %969 = arith.mulf %968, %958 : vector<16x16xf32>
    %970 = arith.addf %918, %969 : vector<16x16xf32>
    %c3_586 = arith.constant 3 : index
    %c3_587 = arith.constant 3 : index
    %971 = memref.load %arg4[%c3_586, %c3_587] : memref<4x9xf32, #tpu.memory_space<smem>>
    %972 = vector.broadcast %971 : f32 to vector<16x16xf32>
    %973 = arith.mulf %972, %958 : vector<16x16xf32>
    %974 = arith.addf %922, %973 : vector<16x16xf32>
    %c3_588 = arith.constant 3 : index
    %c4_589 = arith.constant 4 : index
    %975 = memref.load %arg4[%c3_588, %c4_589] : memref<4x9xf32, #tpu.memory_space<smem>>
    %976 = vector.broadcast %975 : f32 to vector<16x16xf32>
    %977 = arith.mulf %976, %958 : vector<16x16xf32>
    %978 = arith.addf %926, %977 : vector<16x16xf32>
    %c3_590 = arith.constant 3 : index
    %c5_591 = arith.constant 5 : index
    %979 = memref.load %arg4[%c3_590, %c5_591] : memref<4x9xf32, #tpu.memory_space<smem>>
    %980 = vector.broadcast %979 : f32 to vector<16x16xf32>
    %981 = arith.mulf %980, %958 : vector<16x16xf32>
    %982 = arith.addf %930, %981 : vector<16x16xf32>
    %c3_592 = arith.constant 3 : index
    %c6_593 = arith.constant 6 : index
    %983 = memref.load %arg4[%c3_592, %c6_593] : memref<4x9xf32, #tpu.memory_space<smem>>
    %984 = vector.broadcast %983 : f32 to vector<16x16xf32>
    %985 = arith.mulf %984, %958 : vector<16x16xf32>
    %986 = arith.addf %934, %985 : vector<16x16xf32>
    %c3_594 = arith.constant 3 : index
    %c7_595 = arith.constant 7 : index
    %987 = memref.load %arg4[%c3_594, %c7_595] : memref<4x9xf32, #tpu.memory_space<smem>>
    %988 = vector.broadcast %987 : f32 to vector<16x16xf32>
    %989 = arith.mulf %988, %958 : vector<16x16xf32>
    %990 = arith.addf %938, %989 : vector<16x16xf32>
    %c3_596 = arith.constant 3 : index
    %c8_597 = arith.constant 8 : index
    %991 = memref.load %arg4[%c3_596, %c8_597] : memref<4x9xf32, #tpu.memory_space<smem>>
    %992 = vector.broadcast %991 : f32 to vector<16x16xf32>
    %993 = arith.mulf %992, %958 : vector<16x16xf32>
    %994 = arith.addf %942, %993 : vector<16x16xf32>
    %995 = vector.broadcast %2 : f32 to vector<16x16xf32>
    %996 = arith.addf %770, %995 : vector<16x16xf32>
    %997 = arith.addf %996, %978 : vector<16x16xf32>
    %c8_598 = arith.constant 8 : index
    %c128_599 = arith.constant 128 : index
    %998 = vector.load %arg10[%c8_598, %c128_599] : memref<32x152xf32, #tpu.memory_space<vmem>>, vector<16x16xf32>
    tpu.vector_store %arg10[%c8_598, %c128_599], %962 {strides = array<i32>} : memref<32x152xf32, #tpu.memory_space<vmem>>, vector<16x16xf32>,
    %c7_600 = arith.constant 7 : index
    %c127_601 = arith.constant 127 : index
    %999 = vector.load %arg10[%c7_600, %c127_601] : memref<32x152xf32, #tpu.memory_space<vmem>>, vector<16x16xf32>
    %1000 = arith.addf %997, %999 : vector<16x16xf32>
    %c8_602 = arith.constant 8 : index
    %c128_603 = arith.constant 128 : index
    %1001 = vector.load %arg10[%c8_602, %c128_603] : memref<32x152xf32, #tpu.memory_space<vmem>>, vector<16x16xf32>
    tpu.vector_store %arg10[%c8_602, %c128_603], %966 {strides = array<i32>} : memref<32x152xf32, #tpu.memory_space<vmem>>, vector<16x16xf32>,
    %c7_604 = arith.constant 7 : index
    %c128_605 = arith.constant 128 : index
    %1002 = vector.load %arg10[%c7_604, %c128_605] : memref<32x152xf32, #tpu.memory_space<vmem>>, vector<16x16xf32>
    %1003 = arith.addf %1000, %1002 : vector<16x16xf32>
    %c8_606 = arith.constant 8 : index
    %c128_607 = arith.constant 128 : index
    %1004 = vector.load %arg10[%c8_606, %c128_607] : memref<32x152xf32, #tpu.memory_space<vmem>>, vector<16x16xf32>
    tpu.vector_store %arg10[%c8_606, %c128_607], %970 {strides = array<i32>} : memref<32x152xf32, #tpu.memory_space<vmem>>, vector<16x16xf32>,
    %c7_608 = arith.constant 7 : index
    %c129_609 = arith.constant 129 : index
    %1005 = vector.load %arg10[%c7_608, %c129_609] : memref<32x152xf32, #tpu.memory_space<vmem>>, vector<16x16xf32>
    %1006 = arith.addf %1003, %1005 : vector<16x16xf32>
    %c8_610 = arith.constant 8 : index
    %c128_611 = arith.constant 128 : index
    %1007 = vector.load %arg10[%c8_610, %c128_611] : memref<32x152xf32, #tpu.memory_space<vmem>>, vector<16x16xf32>
    tpu.vector_store %arg10[%c8_610, %c128_611], %974 {strides = array<i32>} : memref<32x152xf32, #tpu.memory_space<vmem>>, vector<16x16xf32>,
    %c8_612 = arith.constant 8 : index
    %c127_613 = arith.constant 127 : index
    %1008 = vector.load %arg10[%c8_612, %c127_613] : memref<32x152xf32, #tpu.memory_space<vmem>>, vector<16x16xf32>
    %1009 = arith.addf %1006, %1008 : vector<16x16xf32>
    %c8_614 = arith.constant 8 : index
    %c128_615 = arith.constant 128 : index
    %1010 = vector.load %arg10[%c8_614, %c128_615] : memref<32x152xf32, #tpu.memory_space<vmem>>, vector<16x16xf32>
    tpu.vector_store %arg10[%c8_614, %c128_615], %982 {strides = array<i32>} : memref<32x152xf32, #tpu.memory_space<vmem>>, vector<16x16xf32>,
    %c8_616 = arith.constant 8 : index
    %c129_617 = arith.constant 129 : index
    %1011 = vector.load %arg10[%c8_616, %c129_617] : memref<32x152xf32, #tpu.memory_space<vmem>>, vector<16x16xf32>
    %1012 = arith.addf %1009, %1011 : vector<16x16xf32>
    %c8_618 = arith.constant 8 : index
    %c128_619 = arith.constant 128 : index
    %1013 = vector.load %arg10[%c8_618, %c128_619] : memref<32x152xf32, #tpu.memory_space<vmem>>, vector<16x16xf32>
    tpu.vector_store %arg10[%c8_618, %c128_619], %986 {strides = array<i32>} : memref<32x152xf32, #tpu.memory_space<vmem>>, vector<16x16xf32>,
    %c9_620 = arith.constant 9 : index
    %c127_621 = arith.constant 127 : index
    %1014 = vector.load %arg10[%c9_620, %c127_621] : memref<32x152xf32, #tpu.memory_space<vmem>>, vector<16x16xf32>
    %1015 = arith.addf %1012, %1014 : vector<16x16xf32>
    %c8_622 = arith.constant 8 : index
    %c128_623 = arith.constant 128 : index
    %1016 = vector.load %arg10[%c8_622, %c128_623] : memref<32x152xf32, #tpu.memory_space<vmem>>, vector<16x16xf32>
    tpu.vector_store %arg10[%c8_622, %c128_623], %990 {strides = array<i32>} : memref<32x152xf32, #tpu.memory_space<vmem>>, vector<16x16xf32>,
    %c9_624 = arith.constant 9 : index
    %c128_625 = arith.constant 128 : index
    %1017 = vector.load %arg10[%c9_624, %c128_625] : memref<32x152xf32, #tpu.memory_space<vmem>>, vector<16x16xf32>
    %1018 = arith.addf %1015, %1017 : vector<16x16xf32>
    %c8_626 = arith.constant 8 : index
    %c128_627 = arith.constant 128 : index
    %1019 = vector.load %arg10[%c8_626, %c128_627] : memref<32x152xf32, #tpu.memory_space<vmem>>, vector<16x16xf32>
    tpu.vector_store %arg10[%c8_626, %c128_627], %994 {strides = array<i32>} : memref<32x152xf32, #tpu.memory_space<vmem>>, vector<16x16xf32>,
    %c9_628 = arith.constant 9 : index
    %c129_629 = arith.constant 129 : index
    %1020 = vector.load %arg10[%c9_628, %c129_629] : memref<32x152xf32, #tpu.memory_space<vmem>>, vector<16x16xf32>
    %1021 = arith.addf %1018, %1020 : vector<16x16xf32>
    %c0_630 = arith.constant 0 : index
    %c3_631 = arith.constant 3 : index
    %c0_632 = arith.constant 0 : index
    %c0_633 = arith.constant 0 : index
    %1022 = vector.load %arg9[%c0_630, %c3_631, %c0_632, %c0_633] : memref<1x4x16x16xf32, #tpu.memory_space<vmem>>, vector<1x1x16x16xf32>
    %1023 = vector.shape_cast %1022 : vector<1x1x16x16xf32> to vector<16x16xf32>
    %1024 = vector.shape_cast %1021 : vector<16x16xf32> to vector<1x1x16x16xf32>
    tpu.vector_store %arg9[%c0_630, %c3_631, %c0_632, %c0_633], %1024 {strides = array<i32>} : memref<1x4x16x16xf32, #tpu.memory_space<vmem>>, vector<1x1x16x16xf32>,
    return
  }
  func.func @transform_0(%arg0: i32, %arg1: i32) -> (i32, i32) {
    %c0_i32 = arith.constant 0 : i32
    %c0_i32_0 = arith.constant 0 : i32
    %c0_i32_1 = arith.constant 0 : i32
    return %c0_i32, %c0_i32_0 : i32, i32
  }
  func.func @transform_1(%arg0: i32, %arg1: i32) -> i32 {
    %c0_i32 = arith.constant 0 : i32
    %c0_i32_0 = arith.constant 0 : i32
    return %c0_i32 : i32
  }
  func.func @transform_2(%arg0: i32, %arg1: i32) -> (i32, i32) {
    %c0_i32 = arith.constant 0 : i32
    %c0_i32_0 = arith.constant 0 : i32
    %c0_i32_1 = arith.constant 0 : i32
    return %c0_i32, %c0_i32_0 : i32, i32
  }
  func.func @transform_3(%arg0: i32, %arg1: i32) -> i32 {
    %c0_i32 = arith.constant 0 : i32
    %c0_i32_0 = arith.constant 0 : i32
    return %c0_i32 : i32
  }
  func.func @transform_4(%arg0: i32, %arg1: i32) -> (i32, i32, i32, i32) {
    %c4_i32 = arith.constant 4 : i32
    %0 = arith.muli %arg1, %c4_i32 : i32
    %c1_i32 = arith.constant 1 : i32
    %1 = arith.subi %0, %c1_i32 : i32
    %c0_i32 = arith.constant 0 : i32
    %2 = arith.maxsi %1, %c0_i32 : i32
    %c0_i32_0 = arith.constant 0 : i32
    %c0_i32_1 = arith.constant 0 : i32
    %c0_i32_2 = arith.constant 0 : i32
    return %arg0, %2, %c0_i32_0, %c0_i32_1 : i32, i32, i32, i32
  }
  func.func @transform_5(%arg0: i32, %arg1: i32) -> (i32, i32, i32, i32) {
    %c0_i32 = arith.constant 0 : i32
    %c0_i32_0 = arith.constant 0 : i32
    %c0_i32_1 = arith.constant 0 : i32
    return %arg0, %arg1, %c0_i32, %c0_i32_0 : i32, i32, i32, i32
  }
  func.func @transform_6(%arg0: i32, %arg1: i32) -> (i32, i32, i32, i32) {
    %c4_i32 = arith.constant 4 : i32
    %0 = arith.muli %arg1, %c4_i32 : i32
    %c4_i32_0 = arith.constant 4 : i32
    %1 = arith.addi %0, %c4_i32_0 : i32
    %c7_i32 = arith.constant 7 : i32
    %2 = arith.minsi %1, %c7_i32 : i32
    %c0_i32 = arith.constant 0 : i32
    %c0_i32_1 = arith.constant 0 : i32
    %c0_i32_2 = arith.constant 0 : i32
    return %arg0, %2, %c0_i32, %c0_i32_1 : i32, i32, i32, i32
  }
  func.func @transform_7(%arg0: i32, %arg1: i32) -> (i32, i32, i32, i32) {
    %c0_i32 = arith.constant 0 : i32
    %c0_i32_0 = arith.constant 0 : i32
    %c0_i32_1 = arith.constant 0 : i32
    return %arg0, %arg1, %c0_i32, %c0_i32_0 : i32, i32, i32, i32
  }
}

</mosaic_0001>

<bundles_post_ra>
// kernel: tpu_custom_call.1
= control target key start
LH: loop header
LB: loop body
LE: loop exit
PB: predicated region body
PF: predicated region fallthrough
CT: control target
= control target key end

     0   :  { %s6232_s0 = inlined_call_operand.hbm [shape: f32[4,3], index: 0, kind: input, shape index: {}]   ;;  %s6233_s1 = inlined_call_operand.vmem [shape: f32[4], index: 1, kind: input, shape index: {}]   ;;  %s6234_s2 = inlined_call_operand.vmem [shape: f32[4,9], index: 2, kind: input, shape index: {}]   ;;  %s6235_s3 = inlined_call_operand.<no memory space> [shape: f32[1], index: 3, kind: input, shape index: {}]   ;;  %s6236_s4 = inlined_call_operand.hbm [shape: f32[2,8,16,16], index: 4, kind: input, shape index: {}]   ;;  %s6237_s5 = inlined_call_operand.hbm [shape: f32[2,8,16,16], index: 5, kind: input, shape index: {}]   ;;  %s6238_s6 = inlined_call_operand.hbm [shape: f32[2,8,16,16], index: 6, kind: input, shape index: {}]   ;;  %s6239_s7 = inlined_call_operand.hbm [shape: f32[2,8,16,16], index: 7, kind: output, shape index: {}]  }
   0x1   :  { %6399 = sst [smem:[#allocation106_spill]] %s6232_s0 }
   0x2   :  { %6400 = sst [smem:[#allocation107_spill]] %s6233_s1 }
   0x3   :  { %6401 = sst [smem:[#allocation108_spill]] %s6234_s2 }
   0x4   :  { %6402 = sst [smem:[#allocation109_spill]] %s6236_s4 }
   0x5   :  { %6403 = sst [smem:[#allocation110_spill]] %s6237_s5 }
   0x6   :  { %6404 = sst [smem:[#allocation111_spill]] %s6238_s6 }
   0x7   :  { %6405 = sst [smem:[#allocation112_spill]] %s6239_s7 }
   0x8   :  { %12 = sst [smem:[#allocation3]] %s6235_s3 }
   0x9   :  { %13 = vsyncpa [#allocation7], 0 }
   0xa   :  { %14 = vsyncpa [#allocation8], 0 }
   0xb   :  { %15 = vsyncpa [#allocation11], 0 }
   0xc   :  { %16 = vsyncpa [#allocation5], 0 }
   0xd   :  { %18 = vsyncpa [#allocation5 + $0x1], 0 }
   0xe   :  { %19 = vsyncpa [#allocation14], 0 }
   0xf   :  { %21 = vsyncpa [#allocation14 + $0x1], 0 }
  0x10   :  { %22 = vsyncpa [#allocation6], 0 }
  0x11   :  { %24 = vsyncpa [#allocation6 + $0x1], 0  ;;  %s3585_s26 = smov 0   ;;  %s3587_s27 = smov 0  }
  0x12   :  { %s3589_s28 = smov 0   ;;  %s3591_s29 = smov 0  }
  0x13   :  { %s3593_s30 = smov 0   ;;  %s3595_s3 = smov 0  }
  0x14   :  { %s3597_s8 = smov 0   ;;  %s3599_s9 = smov 0  }
  0x15   :  { %s3601_s10 = smov 0   ;;  %s3603_s11 = smov 0  }
  0x16   :  { %s3605_s12 = smov 0   ;;  %s3607_s13 = smov 0  }
  0x17   :  { %s3609_s14 = smov 0   ;;  %s3611_s15 = smov 0  }
  0x18 LB: > { %6406 = sst [smem:[#allocation24_spill]] %s3474_s26  ;;  %s2722_s16 = sadd.s32 4294967294, %s3526_s15   ;;  %s3526_s15 = sphi %s3611_s15, %s30_s15   ;;  %s3522_s14 = sphi %s3609_s14, %s6688_s14   ;;  %s3518_s13 = sphi %s3607_s13, %s6687_s13   ;;  %s3514_s12 = sphi %s3605_s12, %s6686_s12   ;;  %s3510_s11 = sphi %s3603_s11, %s6673_s11   ;;  %s3506_s10 = sphi %s3601_s10, %s6685_s10   ;;  %s3502_s9 = sphi %s3599_s9, %s6684_s9   ;;  %s3498_s8 = sphi %s3597_s8, %s6683_s8   ;;  %s3494_s3 = sphi %s3595_s3, %s6682_s3   ;;  %s3490_s30 = sphi %s3593_s30, %s6681_s30   ;;  %s3486_s29 = sphi %s3591_s29, %s6680_s29   ;;  %s3482_s28 = sphi %s3589_s28, %s6679_s28   ;;  %s3478_s27 = sphi %s3587_s27, %s6678_s27   ;;  %s3474_s26 = sphi %s3585_s26, %s6669_s26  }
  0x19   : > { %6407 = sst [smem:[#allocation25_spill]] %s3478_s27  ;;  %s39_s17 = sadd.s32 1, %s3518_s13 }
  0x1a   : > { %6408 = sst [smem:[#allocation26_spill]] %s3486_s29  ;;  %p40_p0 = scmp.ge.s32.totalorder %s39_s17, 2 }
  0x1b   : > { %6409 = sst [smem:[#allocation27_spill]] %s3506_s10  ;;  %s42_s18 = sadd.s32 1, %s3522_s14 }
  0x1c   : > { %6410 = sst [smem:[#allocation28_spill]] %s3510_s11  ;;  %p6245_p1 = scmp.eq.s32.totalorder %s3526_s15, 0 }
  0x1d   : > { %6411 = sst [smem:[#allocation29_spill]] %s3514_s12  ;;  %s6690_s17 = smov (%p40_p0, %s39_s17), 0 }
  0x1e   : > { %6412 = sst [smem:[#allocation30_spill]] %s3518_s13  ;;  %s6692_s18 = smov (!%p40_p0, %s42_s18), %s3522_s14 }
  0x1f   : > { %6413 = sst [smem:[#allocation31_spill]] %s3522_s14  ;;  %p6246_p2 = scmp.ne.s32.totalorder %s3494_s3, %s3490_s30 }
  0x20   : > { %6414 = sst [smem:[#allocation32_spill]] %s6690_s17  ;;  %p6247_p3 = scmp.ne.s32.totalorder %s3490_s30, %s3486_s29 }
  0x21   : > { %p252_p4 = scmp.eq.s32.totalorder %s2722_s16, 3  ;;  %p3676_p5 = por %p6246_p2, %p6245_p1 }
  0x22   : > { %p6244_p7 = scmp.lt.s32.totalorder %s3526_s15, 4  ;;  %s3689_s23 = sshll.u32 %s3522_s14, 4 }
  0x23   : > { %p3683_p6 = por %p252_p4, %p6247_p3  ;;  %s333_s24 = sand.u32 1, %s3526_s15  }
  0x24   : > { %s335_s25 = sand.u32 1, %s3494_s3   ;;  %s2983_s16 = sshll.u32 %s3518_s13, 3 }
  0x25   : > { %s6416_s22 = scalar_select %p3683_p6, 1, 0 }
  0x26   : > { %s2740_s19 = sshll.u32 %s335_s25, 6  ;;  %s344_s20 = sadd.s32 %s2983_s16, %s3689_s23 }
  0x27   : > { %6417 = sst [smem:[#allocation33_spill]] %s6416_s22  ;;  %s2744_s7 = sshll.u32 %s344_s20, 7 }
  0x28   : > { %s337_s12 = scalar_lea.vmem [#allocation13], %s2740_s19  ;;  %s6418_s5 = sld [smem:[#allocation110_spill]] }
  0x29   : > { %s347_s11 = sshll.u32 %s337_s12, 4  ;;  %p3706_p8 = pnand %p6244_p7, %p3676_p5  ;;  %s3700_s11 = int_to_ptr.vmem [resolvable:$true] %s347_s11 }
  0x2a   : > { %s3710_s12 = scalar_lea.sflag [#allocation14], %s333_s24 }
  0x2b   : > { %p3229_p10 = pneg %p3706_p8 }
  0x2e   : > { %s3698_s27 = scalar_lea.hbm %s6418_s5, %s2744_s7  ;;  %s3232_s26 = scalar_lea.hbm %s6418_s5, 4096 }
  0x2f   : > { %s3227_s19 = scalar_lea.hbm %s3698_s27, 1024  ;;  %p3233_p13 = scmp.lt.u32.totalorder %s3698_s27, %s6418_s5 }
  0x30   : > { %p3228_p9 = scmp.ne.s32.totalorder %s3698_s27, %s3227_s19  ;;  %p3234_p0 = scmp.lt.u32.totalorder %s3232_s26, %s3227_s19 }
  0x31   : > { %p3236_p5 = scmp.lt.u32.totalorder %s3227_s19, %s3698_s27 }
  0x32   : > { %p3230_p11 = pnand %p3229_p10, %p3228_p9  ;;  %p3235_p4 = por %p3234_p0, %p3233_p13 }
  0x34   : > { %p3231_p12 = pneg %p3230_p11  ;;  %p3237_p7 = por %p3236_p5, %p3235_p4 }
  0x36   : > { %p3238_p1 = pnand %p3237_p7, %p3231_p12 }
  0x38   : > { %3241 = shalt.err (!%p3238_p1)
}
  0x39   : > { %s3242_s24 = scalar_lea.vmem %s3700_s11, 1024  ;;  %s3528_s16 = smov [#allocation13]  }
  0x3a   : > { %p3243_p9 = scmp.ne.s32.totalorder %s3700_s11, %s3242_s24  ;;  %s3247_s6 = sshll.u32 %s3528_s16, 4  ;;  %s3248_s6 = int_to_ptr.vmem [resolvable:$false] %s3247_s6 }
  0x3b   : > { %s3249_s7 = scalar_lea.vmem %s3248_s6, 2048  ;;  %p3250_p3 = scmp.lt.s32.totalorder %s3700_s11, %s3248_s6 }
  0x3c   : > { %p3245_p11 = pnand %p3243_p9, %p3229_p10  ;;  %p3251_p13 = scmp.lt.s32.totalorder %s3249_s7, %s3242_s24 }
  0x3e   : > { %p3246_p2 = pneg %p3245_p11  ;;  %p3252_p0 = por %p3251_p13, %p3250_p3 }
  0x40   : > { %p3253_p4 = pnand %p3252_p0, %p3246_p2 }
  0x42   : > { %3256 = shalt.err (!%p3253_p4)
}
  0x43   : > { %s6248_s19 = smov 128   ;;  %s6250_s26 = smov 8  }
  0x44   : > { %3021 = dma.hbm_to_vmem [thread:$0]  (!%p3706_p8), %s3698_s27, 1024, %s3700_s11, %s3710_s12, %s6248_s19, %s6248_s19, %s6250_s26  }
  0x45   : > { %s3742_s20 = sadd.s32 4294967295, %s3526_s15   ;;  %p2729_p1 = scmp.ge.s32.totalorder %s3526_s15, 1 }
  0x46   : > { %p6253_p2 = scmp.eq.s32.totalorder %s3742_s20, 0  ;;  %p246_p3 = scmp.eq.s32.totalorder %s3742_s20, 3 }
  0x47   : > { %p259_p7 = scmp.lt.s32.totalorder %s3526_s15, 5  ;;  %p6420_p10 = scmp.ne.s32.totalorder %s3490_s30, %s3486_s29 }
  0x48   : > { %p6422_p5 = scmp.ne.s32.totalorder %s3494_s3, %s3490_s30  ;;  %s6426_s1 = sld [smem:[#allocation107_spill]] }
  0x49   : > { %p3753_p12 = por %p6420_p10, %p6253_p2  ;;  %p3764_p8 = pnand %p2729_p1, %p259_p7 }
  0x4a   : > { %p3760_p9 = por %p246_p3, %p6422_p5  ;;  %s6427_s2 = sld [smem:[#allocation108_spill]] }
  0x4b   : > { %s6421_s21 = scalar_select %p3753_p12, 1, 0 }
  0x4c   : > { %s6423_s25 = scalar_select %p3760_p9, 1, 0 }
  0x4d   : > { %p3005_p11 = pneg %p3764_p8  ;;  %s6429_s0 = sld [smem:[#allocation106_spill]] }
  0x4e   : > { %6424 = sst [smem:[#allocation34_spill]] %s6423_s25  ;;  %s281_s16 = sshll.u32 %s6426_s1, 4  ;;  %s282_s16 = int_to_ptr.vmem [resolvable:$true] %s281_s16 }
  0x4f   : > { %p3778_p13 = pnand %p3005_p11, %p6253_p2 }
  0x50   : > { %s292_s19 = sshll.u32 %s6427_s2, 4  ;;  %s3782_s19 = int_to_ptr.vmem [resolvable:$true] %s292_s19 }
  0x51   : > { %p3259_p4 = pneg %p3778_p13 }
  0x53   : > { %s3257_s24 = scalar_lea.hbm %s6429_s0, 64 }
  0x54   : > { %p3258_p0 = scmp.ne.s32.totalorder %s6429_s0, %s3257_s24  ;;  %p3264_p7 = scmp.lt.u32.totalorder %s3257_s24, %s6429_s0 }
  0x56   : > { %p3260_p1 = pnand %p3259_p4, %p3258_p0 }
  0x58   : > { %p3261_p3 = pneg %p3260_p1 }
  0x5a   : > { %p3266_p10 = pnand %p3264_p7, %p3261_p3 }
  0x5c   : > { %3269 = shalt.err (!%p3266_p10)
}
  0x5d   : > { %s3531_s2 = smov [#allocation4]   ;;  %s3270_s1 = scalar_lea.vmem %s282_s16, 16 }
  0x5e   : > { %3008 = dma.hbm_to_smem (!%p3778_p13), %s6429_s0, 64, %s3531_s2, [#allocation7]  }
  0x5f   : > { %p3271_p5 = scmp.ne.s32.totalorder %s282_s16, %s3270_s1  ;;  %p3278_p1 = scmp.lt.s32.totalorder %s282_s16, %s282_s16 }
  0x60   : > { %p3279_p2 = scmp.lt.s32.totalorder %s3270_s1, %s3270_s1 }
  0x61   : > { %p3273_p11 = pnand %p3271_p5, %p3259_p4 }
  0x62   : > { %p3280_p6 = por %p3279_p2, %p3278_p1 }
  0x63   : > { %p3274_p0 = pneg %p3273_p11 }
  0x65   : > { %p3281_p9 = pnand %p3280_p6, %p3274_p0 }
  0x67   : > { %3284 = shalt.err (!%p3281_p9)
}
  0x68   : > { %s3532_s22 = smov [#allocation9]   ;;  %s3285_s2 = scalar_lea.vmem %s3782_s19, 64 }
  0x69   : > { %3011 = dma.vmem_to_smem (!%p3778_p13), %s282_s16, 16, %s3532_s22, [#allocation8]  }
  0x6a   : > { %p3286_p3 = scmp.ne.s32.totalorder %s3782_s19, %s3285_s2  ;;  %p3293_p5 = scmp.lt.s32.totalorder %s3782_s19, %s3782_s19 }
  0x6b   : > { %p3294_p11 = scmp.lt.s32.totalorder %s3285_s2, %s3285_s2 }
  0x6c   : > { %p3288_p7 = pnand %p3286_p3, %p3259_p4 }
  0x6d   : > { %p3295_p2 = por %p3294_p11, %p3293_p5 }
  0x6e   : > { %p3289_p10 = pneg %p3288_p7 }
  0x70   : > { %p3296_p6 = pnand %p3295_p2, %p3289_p10 }
  0x72   : > { %3299 = shalt.err (!%p3296_p6)
}
  0x73   : > { %s3533_s24 = smov [#allocation10]   ;;  %p44_p9 = scmp.ge.s32.totalorder %s6692_s18, 2 }
  0x74   : > { %3014 = dma.vmem_to_smem (!%p3778_p13), %s3782_s19, 64, %s3533_s24, [#allocation11]  }
  0x75   : > { %s2723_s16 = sshll.u32 %s3518_s13, 2  ;;  %s2725_s6 = sshll.u32 %s6690_s17, 2 }
  0x76   : > { %s6694_s18 = smov (%p44_p9, %s6692_s18), 0  ;;  %s2724_s26 = sadd.s32 4294967295, %s2723_s16 }
  0x77   : > { %6430 = sst [smem:[#allocation35_spill]] %s6694_s18  ;;  %s2726_s7 = sadd.s32 4294967295, %s2725_s6 }
  0x78   : > { %p132_p4 = scmp.gt.s32.totalorder %s2724_s26, 0  ;;  %p136_p0 = scmp.gt.s32.totalorder %s2726_s7, 0 }
  0x79   : > { %s3826_s5 = ssub.s32 %s3522_s14, %s6694_s18  ;;  %s143_s19 = sadd.s32 1, %s3506_s10 }
  0x7a   : > { %s6696_s26 = smov (!%p132_p4, %s2724_s26), 0  ;;  %s6698_s7 = smov (!%p136_p0, %s2726_s7), 0 }
  0x7b   : > { %p150_p13 = scmp.ne.s32.totalorder %s3506_s10, %s3502_s9  ;;  %p156_p1 = scmp.ne.s32.totalorder %s3502_s9, %s3498_s8 }
  0x7c   : > { %s139_s11 = ssub.s32 %s6696_s26, %s6698_s7  ;;  %s6431_s1 = ssub.s32 %s3518_s13, %s6690_s17 }
  0x7d   : > { %s168_s22 = sor.u32 %s6431_s1, %s3826_s5  ;;  %s140_s2 = sor.u32 %s139_s11, %s3826_s5 }
  0x7e   : > { %p6432_p3 = scmp.eq.s32.totalorder %s3526_s15, 0  ;;  %p141_p10 = scmp.eq.s32.totalorder %s140_s2, 0 }
  0x7f   : > { %p6434_p5 = scmp.eq.s32.totalorder %s3742_s20, 0  ;;  %p169_p2 = scmp.eq.s32.totalorder %s168_s22, 0 }
  0x80   : > { %p3840_p7 = por %p6432_p3, %p150_p13  ;;  %s3850_s8 = sadd.s32 4, %s2723_s16 }
  0x81   : > { %p3846_p11 = por %p6434_p5, %p156_p1  ;;  %s6437_s11 = sadd.s32 1, %s3494_s3 }
  0x82   : > { %s3853_s7 = scalar_select %p141_p10, %s3506_s10, %s143_s19  }
  0x83   : > { %s6435_s0 = scalar_select %p3846_p11, 1, 0 }
  0x84   : > { %6436 = sst [smem:[#allocation36_spill]] %s3853_s7  ;;  %s3861_s18 = sadd.s32 4, %s2725_s6 }
  0x85   : > { %s3858_s1 = scalar_select %p169_p2, %s3494_s3, %s6437_s11  }
  0x86   : > { %s306_s2 = sand.u32 1, %s3506_s10   ;;  %s2737_s14 = sshll.u32 %s6696_s26, 1 }
  0x87   : > { %6438 = sst [smem:[#allocation37_spill]] %s3858_s1  ;;  %s2734_s17 = sshll.u32 %s306_s2, 4 }
  0x88   : > { %s320_s13 = sadd.s32 %s3689_s23, %s2737_s14  ;;  %s310_s22 = scalar_lea.vmem [#allocation12], %s2734_s17 }
  0x89   : > { %s323_s29 = sshll.u32 %s310_s22, 4  ;;  %s2739_s25 = sshll.u32 %s320_s13, 7  ;;  %s3866_s29 = int_to_ptr.vmem [resolvable:$true] %s323_s29 }
  0x8a   : > { %s6439_s4 = sld [smem:[#allocation109_spill]]  ;;  %p6440_p4 = scmp.lt.s32.totalorder %s3526_s15, 4 }
  0x8b   : > { %s3881_s13 = scalar_lea.sflag [#allocation5], %s306_s2 }
  0x8c   : > { %p3877_p0 = pnand %p6440_p4, %p3840_p7 }
  0x8e   : > { %p3302_p1 = pneg %p3877_p0 }
  0x90   : > { %s3871_s7 = scalar_lea.hbm %s6439_s4, %s2739_s25  ;;  %s3305_s26 = scalar_lea.hbm %s6439_s4, 4096 }
  0x91   : > { %s3300_s14 = scalar_lea.hbm %s3871_s7, 256  ;;  %p3306_p7 = scmp.lt.u32.totalorder %s3871_s7, %s6439_s4 }
  0x92   : > { %p3301_p13 = scmp.ne.s32.totalorder %s3871_s7, %s3300_s14  ;;  %p3307_p5 = scmp.lt.u32.totalorder %s3305_s26, %s3300_s14 }
  0x93   : > { %p3309_p4 = scmp.lt.u32.totalorder %s3300_s14, %s3871_s7 }
  0x94   : > { %p3303_p3 = pnand %p3302_p1, %p3301_p13  ;;  %p3308_p2 = por %p3307_p5, %p3306_p7 }
  0x96   : > { %p3304_p10 = pneg %p3303_p3  ;;  %p3310_p9 = por %p3309_p4, %p3308_p2 }
  0x98   : > { %p3311_p6 = pnand %p3310_p9, %p3304_p10 }
  0x9a   : > { %3314 = shalt.err (!%p3311_p6)
}
  0x9b   : > { %s3315_s2 = scalar_lea.vmem %s3866_s29, 256  ;;  %s3534_s22 = smov [#allocation12]  }
  0x9c   : > { %p3316_p13 = scmp.ne.s32.totalorder %s3866_s29, %s3315_s2  ;;  %s3320_s16 = sshll.u32 %s3534_s22, 4  ;;  %s3321_s16 = int_to_ptr.vmem [resolvable:$false] %s3320_s16 }
  0x9d   : > { %s3322_s19 = scalar_lea.vmem %s3321_s16, 512  ;;  %p3323_p11 = scmp.lt.s32.totalorder %s3866_s29, %s3321_s16 }
  0x9e   : > { %p3318_p3 = pnand %p3316_p13, %p3302_p1  ;;  %p3324_p7 = scmp.lt.s32.totalorder %s3322_s19, %s3315_s2 }
  0xa0   : > { %p3319_p12 = pneg %p3318_p3  ;;  %p3325_p5 = por %p3324_p7, %p3323_p11 }
  0xa2   : > { %p3326_p2 = pnand %p3325_p5, %p3319_p12 }
  0xa4   : > { %3329 = shalt.err (!%p3326_p2)
}
  0xa5   : > { %s6442_s14 = smov 8   ;;  %s6443_s17 = smov 128  }
  0xa6   : > { %s6444_s25 = sld [smem:[#allocation25_spill]]  ;;  %s207_s6 = sadd.s32 1, %s3482_s28 }
  0xa7   : > { %s6445_s26 = sld [smem:[#allocation24_spill]]  ;;  %p6446_p12 = scmp.lt.s32.totalorder %s3850_s8, 7 }
  0xa8   : > { %3018 = dma.hbm_to_vmem [thread:$0]  (!%p3877_p0), %s3871_s7, 256, %s3866_s29, %s3881_s13, %s6443_s17, %s6443_s17, %s6442_s14  }
  0xa9   : > { %s6700_s8 = smov (!%p6446_p12, %s3850_s8), 7  ;;  %p6447_p11 = scmp.lt.s32.totalorder %s3861_s18, 7 }
  0xaa   : > { %s359_s11 = sand.u32 1, %s3482_s28   ;;  %p6448_p1 = scmp.eq.s32.totalorder %s3526_s15, 0 }
  0xab   : > { %s6702_s18 = smov (!%p6447_p11, %s3861_s18), 7  ;;  %p6449_p13 = scmp.eq.s32.totalorder %s3742_s20, 0 }
  0xac   : > { %p214_p6 = scmp.ne.s32.totalorder %s3482_s28, %s6444_s25  ;;  %s203_s24 = ssub.s32 %s6700_s8, %s6702_s18 }
  0xad   : > { %p220_p9 = scmp.ne.s32.totalorder %s6444_s25, %s6445_s26  ;;  %s204_s2 = sor.u32 %s203_s24, %s3826_s5 }
  0xae   : > { %p216_p10 = por %p214_p6, %p6448_p1  ;;  %p205_p4 = scmp.eq.s32.totalorder %s204_s2, 0 }
  0xaf   : > { %p3929_p3 = por %p220_p9, %p6449_p13  ;;  %s2745_s29 = sshll.u32 %s359_s11, 4 }
  0xb0   : > { %s2747_s7 = sshll.u32 %s6700_s8, 1  ;;  %s361_s4 = scalar_lea.vmem [#allocation15], %s2745_s29 }
  0xb1   : > { %s6450_s22 = scalar_select %p3929_p3, 1, 0 }
  0xb2   : > { %s3934_s13 = scalar_select %p205_p4, %s3482_s28, %s207_s6  }
  0xb3   : > { %s371_s16 = sadd.s32 %s2747_s7, %s3689_s23  ;;  %s374_s25 = sshll.u32 %s361_s4, 4  ;;  %s3942_s25 = int_to_ptr.vmem [resolvable:$true] %s374_s25 }
  0xb4   : > { %s2749_s19 = sshll.u32 %s371_s16, 7  ;;  %s6451_s10 = sld [smem:[#allocation111_spill]] }
  0xb5   : > { %p6453_p0 = scmp.lt.s32.totalorder %s3526_s15, 4 }
  0xb7   : > { %p3946_p7 = pnand %p6453_p0, %p216_p10 }
  0xb9   : > { %p3332_p2 = pneg %p3946_p7 }
  0xba   : > { %s6452_s1 = smov %s6451_s10  ;;  %s3940_s5 = scalar_lea.hbm %s6451_s10, %s2749_s19 }
  0xbb   : > { %s3330_s23 = scalar_lea.hbm %s3940_s5, 256  ;;  %s3335_s6 = scalar_lea.hbm %s6452_s1, 4096 }
  0xbc   : > { %p3331_p5 = scmp.ne.s32.totalorder %s3940_s5, %s3330_s23  ;;  %p3336_p6 = scmp.lt.u32.totalorder %s3940_s5, %s6452_s1 }
  0xbd   : > { %p3337_p9 = scmp.lt.u32.totalorder %s3335_s6, %s3330_s23  ;;  %p3339_p10 = scmp.lt.u32.totalorder %s3330_s23, %s3940_s5 }
  0xbe   : > { %p3333_p12 = pnand %p3332_p2, %p3331_p5 }
  0xbf   : > { %p3338_p1 = por %p3337_p9, %p3336_p6 }
  0xc0   : > { %p3334_p11 = pneg %p3333_p12 }
  0xc1   : > { %p3340_p4 = por %p3339_p10, %p3338_p1 }
  0xc3   : > { %p3341_p13 = pnand %p3340_p4, %p3334_p11 }
  0xc5   : > { %3344 = shalt.err (!%p3341_p13)
}
  0xc6   : > { %s3345_s2 = scalar_lea.vmem %s3942_s25, 256  ;;  %s3535_s29 = smov [#allocation15]  }
  0xc7   : > { %p3346_p0 = scmp.ne.s32.totalorder %s3942_s25, %s3345_s2  ;;  %s3350_s7 = sshll.u32 %s3535_s29, 4  ;;  %s3351_s7 = int_to_ptr.vmem [resolvable:$false] %s3350_s7 }
  0xc8   : > { %s3352_s16 = scalar_lea.vmem %s3351_s7, 512  ;;  %p3353_p3 = scmp.lt.s32.totalorder %s3942_s25, %s3351_s7 }
  0xc9   : > { %p3348_p5 = pnand %p3346_p0, %p3332_p2  ;;  %p3354_p6 = scmp.lt.s32.totalorder %s3352_s16, %s3345_s2 }
  0xcb   : > { %p3349_p12 = pneg %p3348_p5  ;;  %p3355_p9 = por %p3354_p6, %p3353_p3 }
  0xcd   : > { %p3356_p1 = pnand %p3355_p9, %p3349_p12 }
  0xcf   : > { %3359 = shalt.err (!%p3356_p1)
}
  0xd0   : > { %3024 = dma.hbm_to_vmem [thread:$0]  (!%p3946_p7), %s3940_s5, 256, %s3942_s25, %s3710_s12, %s6443_s17, %s6443_s17, %s6442_s14  }
  0xd1   : > { %386 = sbr.rel (%p3764_p8) target bundleno = 696 (0x2b8), region = 48 }
  0xd8   : > { %p6455_p2 = scmp.eq.s32.totalorder %s3742_s20, 0 }
  0xda   : > { %3445 = dma.done.wait (%p6455_p2), [#allocation7], 64   ;;  %p6456_p11 = pmov %p6455_p2 }
  0xdb   : > { %p6457_p3 = pmov %p6455_p2 }
  0xdc   : > { %3447 = vsyncadd (%p6456_p11), [#allocation7], 4294967232 }
  0xdd   : > { %3449 = dma.done.wait (%p6457_p3), [#allocation8], 16   ;;  %p6458_p10 = pmov %p6455_p2 }
  0xde   : > { %p6459_p4 = pmov %p6455_p2 }
  0xdf   : > { %3451 = vsyncadd (%p6458_p10), [#allocation8], 4294967280 }
  0xe0   : > { %3453 = dma.done.wait (%p6459_p4), [#allocation11], 64   ;;  %p6460_p7 = pmov %p6455_p2 }
  0xe1   : > { %s400_s12 = sand.u32 1, %s3502_s9   ;;  %p6461_p8 = scmp.ne.s32.totalorder %s6435_s0, 0 }
  0xe2   : > { %3455 = vsyncadd (%p6460_p7), [#allocation11], 4294967232  ;;  %s3994_s27 = sshll.u32 %s400_s12, 4  ;;  %s401_s14 = scalar_lea.sflag [#allocation5], %s400_s12 }
  0xe3   : > { %s404_s17 = scalar_lea.vmem [#allocation12], %s3994_s27 }
  0xe4   : > { %3457 = dma.done.wait (%p6461_p8), %s401_s14, 256  }
  0xe5   : > { %3459 = vsyncadd (%p6461_p8), %s401_s14, 4294967040  ;;  %s409_s19 = sand.u32 1, %s3742_s20   ;;  %s411_s25 = sand.u32 1, %s3490_s30  }
  0xe6   : > { %s4005_s26 = sshll.u32 %s411_s25, 6  ;;  %s410_s18 = scalar_lea.sflag [#allocation14], %s409_s19 }
  0xe7   : > { %s4008_s5 = scalar_lea.vmem [#allocation13], %s4005_s26  ;;  %p6462_p13 = scmp.ne.s32.totalorder %s6421_s21, 0 }
  0xe9   : > { %3461 = dma.done.wait (%p6462_p13), %s410_s18, 1024  }
  0xea   : > { %3463 = vsyncadd (%p6462_p13), %s410_s18, 4294966272  ;;  %s6463_s0 = sld [smem:[#allocation25_spill]]  ;;  %p6464_p0 = scmp.ne.s32.totalorder %s6450_s22, 0 }
  0xf0   : > { %s420_s8 = sand.u32 1, %s6463_s0  }
  0xf1   : > { %s4015_s23 = sshll.u32 %s420_s8, 4 }
  0xf2   : > { %s422_s20 = scalar_lea.vmem [#allocation15], %s4015_s23 }
  0xf3   : > { %3465 = dma.done.wait (%p6464_p0), %s410_s18, 256  }
  0xf4   : > { %3467 = vsyncadd (%p6464_p0), %s410_s18, 4294967040 }
  0xf5   : > { %427 = sfence }
  0xf6   : > { %vm475_vm0 = vcmask 195584   ;;  %s6465_s4 = sld [smem:[#allocation28_spill]]  ;;  %v3536_v0 = vmov 0.0   ;;  %s497_s21 = sld [smem:[#allocation4]]  ;;  %vm821_vm1 = vcmask 1040384   ;;  %vm937_vm2 = vcmask 1046528  }
  0xf7   : > { %477 = vst [vmem:[#allocation2 + $0x10] sm:$0xff] %v3536_v0  ;;  %479 = vst [vmem:[#allocation2 + $0x20] sm:$0xff] %v3536_v0  ;;  %s2760_s22 = sld [smem:[#allocation4 + $0x1]]  ;;  %s3537_s10 = smov 1   ;;  %v484_v1 = vld [vmem:[%s404_s17] sm:$0xff]  ;;  %v485_v2 = vld [vmem:[%s404_s17 + $0x8] sm:$0xff] }
  0xf8   : > { %474 = vst [vmem:[#allocation2] sm:$0xff] %v3536_v0  ;;  %481 = vst [vmem:[#allocation2 + $0x30] sm:$0xff] %v3536_v0  ;;  %3165 = vrot.lane.b32.xlu0 %v3536_v0, %s3537_s10  ;;  %3160 = vrot.lane.b32.xlu1 %v3536_v0, %s3537_s10  ;;  %s4039_s11 = sld [smem:[#allocation4 + $0x2]]  ;;  %v4042_v3 = vrot.slane %v3536_v0, 7  ;;  %v4045_v4 = vld [vmem:[%s4008_s5] sm:$0xff]  ;;  %s4047_s2 = sld [smem:[#allocation9]] }
  0xf9   : > { %476 = vst.msk [vmem:[#allocation2 + $0x8] sm:$0xff] %vm475_vm0, %v3536_v0  ;;  %478 = vst.msk [vmem:[#allocation2 + $0x18] sm:$0xff] %vm475_vm0, %v3536_v0  ;;  %s4049_s29 = sld [smem:[#allocation10]]  ;;  %v4052_v5 = vrot.slane %v3536_v0, 1  ;;  %v4055_v7 = vld [vmem:[%s4008_s5 + $0x8] sm:$0xff]  ;;  %s4059_s16 = sld [smem:[#allocation4 + $0x81]] }
  0xfa   : > { %480 = vst.msk [vmem:[#allocation2 + $0x28] sm:$0xff] %vm475_vm0, %v3536_v0  ;;  %482 = vst.msk [vmem:[#allocation2 + $0x38] sm:$0xff] %vm475_vm0, %v3536_v0  ;;  %s4057_s7 = sld [smem:[#allocation4 + $0x80]]  ;;  %v4102_v60 = vld [vmem:[%s4008_s5 + $0x10] sm:$0xff]  ;;  %v4105_v61 = vld [vmem:[%s4008_s5 + $0x18] sm:$0xff]  ;;  %s4107_s12 = sld [smem:[#allocation4 + $0x82]] }
  0xfb   : > { %s4111_s27 = sld [smem:[#allocation10 + $0x1]]  ;;  %s4113_s14 = sld [smem:[#allocation10 + $0x2]]  ;;  %vm806_vm3 = vcmask 130048   ;;  %vm840_vm4 = vcmask 7168  }
  0xfc   : > { %p486_p5 = scmp.gt.s32.totalorder %s6465_s4, 0  ;;  %v4065_v13 = vstv %s497_s21  ;;  %s4120_s17 = sld [smem:[#allocation9 + $0x1]] }
  0xfd   : > { %v4067_v14 = vstv %s2760_s22  ;;  %s4128_s19 = sld [smem:[#allocation10 + $0x80]]  ;;  %s4136_s0 = sld [smem:[#allocation10 + $0x81]] }
  0xfe   : > { %s487_s6 = scalar_select %p486_p5, 1, 0  ;;  %v1323_v9 = vld [vmem:[#allocation2 + $0x20] sm:$0x7f]  ;;  %v503_v19 = vmul.f32 %v4067_v14, %v4045_v4  ;;  %v1433_v21 = vld [vmem:[#allocation2 + $0x10] sm:$0xfe]  ;;  %v504_v25 = vmul.f32 %v4067_v14, %v4055_v7 }
  0xff   : > { %v1319_v8 = vld [vmem:[#allocation2] sm:$0x80]  ;;  %v1337_v16 = vrot.slane %v1323_v9, 7  ;;  %v813_v17 = vld [vmem:[#allocation2 + $0x20] sm:$0x7f]  ;;  %v1445_v29 = vrot.slane %v1433_v21, 1 }
 0x100   : > { %s488_s24 = scvt.s32.f32 %s487_s6  ;;  %v809_v10 = vld [vmem:[#allocation2] sm:$0x80]  ;;  %v1331_v15 = vrot.slane %v1319_v8, 7  ;;  %v828_v20 = vrot.slane %v813_v17, 7  ;;  %v1437_v22 = vld [vmem:[#allocation2 + $0x30] sm:$0x1] }
 0x101   : > { %v822_v18 = vrot.slane %v809_v10, 7  ;;  %v1338_v27 = vsel %vm821_vm1, %v4042_v3, %v1337_v16  ;;  %v925_v30 = vld [vmem:[#allocation2 + $0x10] sm:$0xfe]  ;;  %v929_v31 = vld [vmem:[#allocation2 + $0x30] sm:$0x1]  ;;  %v1451_v34 = vrot.slane %v1437_v22, 1  ;;  %v1447_v39 = vsel %vm937_vm2, %v1445_v29, %v4052_v5 }
 0x102   : > { %v489_v6 = vstv %s488_s24  ;;  %v1333_v26 = vsel %vm821_vm1, %v1331_v15, %v4042_v3  ;;  %v829_v33 = vsel %vm821_vm1, %v4042_v3, %v828_v20  ;;  %v938_v35 = vrot.slane %v925_v30, 1  ;;  %v2340_v36 = vld [vmem:[#allocation2] sm:$0x80]  ;;  %v2344_v37 = vld [vmem:[#allocation2 + $0x20] sm:$0x7f]  ;;  %s4130_s18 = sld [smem:[#allocation4 + $0x100]] }
 0x103   : > { %v4061_v11 = vmul.f32 %v489_v6, %v484_v1  ;;  %v4063_v12 = vmul.f32 %v489_v6, %v485_v2  ;;  %v824_v28 = vsel %vm821_vm1, %v822_v18, %v4042_v3  ;;  %v3179_v32 = vpack.i.bf16 %v1338_v27, %v1333_v26  ;;  %v1827_v42 = vld [vmem:[#allocation2] sm:$0x80]  ;;  %v1831_v43 = vld [vmem:[#allocation2 + $0x20] sm:$0x7f]  ;;  %v2454_v48 = vld [vmem:[#allocation2 + $0x10] sm:$0xfe] }
 0x104   : > { %v3169_v38 = vpack.i.bf16 %v829_v33, %v824_v28  ;;  %v944_v40 = vrot.slane %v929_v31, 1  ;;  %v2352_v41 = vrot.slane %v2340_v36, 7  ;;  %v1452_v44 = vsel %vm937_vm2, %v4052_v5, %v1451_v34  ;;  %v2458_v49 = vld [vmem:[#allocation2 + $0x30] sm:$0x1]  ;;  %v1941_v54 = vld [vmem:[#allocation2 + $0x10] sm:$0xfe] }
 0x105   : > { %v499_v23 = vmul.f32 %v4065_v13, %v4061_v11  ;;  %v500_v24 = vmul.f32 %v4065_v13, %v4063_v12  ;;  %3180 = vrot.lane.b32.xlu1 %v3179_v32, %s3537_s10  ;;  %v940_v45 = vsel %vm937_vm2, %v938_v35, %v4052_v5  ;;  %v2358_v46 = vrot.slane %v2344_v37, 7  ;;  %v1945_v55 = vld [vmem:[#allocation2 + $0x30] sm:$0x1]  ;;  %s4138_s8 = sld [smem:[#allocation10 + $0x82]]  ;;  %s4155_s21 = sld [smem:[#allocation4 + $0x101]] }
 0x106   : > { %v1839_v47 = vrot.slane %v1827_v42, 7  ;;  %3170 = vrot.lane.b32.xlu0 %v3169_v38, %s3537_s10  ;;  %v3184_v50 = vpack.i.bf16 %v1452_v44, %v1447_v39  ;;  %v945_v51 = vsel %vm937_vm2, %v4052_v5, %v944_v40  ;;  %v2354_v52 = vsel %vm821_vm1, %v2352_v41, %v4042_v3  ;;  %s4157_s22 = sld [smem:[#allocation4 + $0x102]]  ;;  %s4188_s24 = sld [smem:[#allocation10 + $0x100]] }
 0x107   : > { %v1845_v53 = vrot.slane %v1831_v43, 7  ;;  %v3174_v56 = vpack.i.bf16 %v945_v51, %v940_v45  ;;  %v2359_v57 = vsel %vm821_vm1, %v4042_v3, %v2358_v46  ;;  %v2466_v59 = vrot.slane %v2454_v48, 1  ;;  %s4186_s6 = sld [smem:[#allocation9 + $0x2]]  ;;  %p2024_p12 = scmp.lt.s32.totalorder %s6465_s4, 1 }
 0x108   : > { %v1841_v58 = vsel %vm821_vm1, %v1839_v47, %v4042_v3  ;;  %v2472_v63 = vrot.slane %v2458_v49, 1  ;;  %v1953_v1 = vrot.slane %v1941_v54, 1  ;;  %v3194_v2 = vpack.i.bf16 %v2359_v57, %v2354_v52  ;;  %s5605_s23 = sld [smem:[#allocation10 + $0x4]] }
 0x109   : > { %v1846_v62 = vsel %vm821_vm1, %v4042_v3, %v1845_v53  ;;  %3185 = vrot.lane.b32.xlu1 %v3184_v50, %s3537_s10  ;;  %v4118_v6 = vsel %vm937_vm2, %v2466_v59, %v4052_v5  ;;  %v1959_v8 = vrot.slane %v1945_v55, 1  ;;  %v505_v9 = vadd.f32 %v503_v19, %v499_v23 }
 0x10a   : > { %3175 = vrot.lane.b32.xlu0 %v3174_v56, %s3537_s10  ;;  %v3189_v3 = vpack.i.bf16 %v1846_v62, %v1841_v58  ;;  %v2473_v10 = vsel %vm937_vm2, %v4052_v5, %v2472_v63  ;;  %v506_v15 = vadd.f32 %v504_v25, %v500_v24  ;;  %v4126_v16 = vstv %s4039_s11  ;;  %s4196_s11 = sld [smem:[#allocation10 + $0x101]] }
 0x10b   : > { %v509_v17 = vmul.f32 %v4102_v60, %v4126_v16  ;;  %v510_v18 = vmul.f32 %v4105_v61, %v4126_v16  ;;  %v3214_v19 = vpack.i.bf16 %v2473_v10, %v4118_v6  ;;  %v1955_v20 = vsel %vm937_vm2, %v1953_v1, %v4052_v5 }
 0x10c   : > { %v1960_v21 = vsel %vm937_vm2, %v4052_v5, %v1959_v8  ;;  %v4146_v22 = vstv %s4047_s2  ;;  %v4150_v25 = vstv %s4049_s29  ;;  %v4153_v26 = vstv %s4057_s7  ;;  %s4198_s2 = sld [smem:[#allocation10 + $0x102]]  ;;  %s4221_s29 = sld [smem:[#allocation4 + $0x180]] }
 0x10d   : > { %3195 = vrot.lane.b32.xlu1 %v3194_v2, %s3537_s10  ;;  %v511_v23 = vadd.f32 %v509_v17, %v505_v9  ;;  %v512_v24 = vadd.f32 %v510_v18, %v506_v15  ;;  %v575_v5 = vmul.f32 %v4153_v26, %v4061_v11  ;;  %v576_v27 = vmul.f32 %v4153_v26, %v4063_v12  ;;  %s4223_s7 = sld [smem:[#allocation4 + $0x181]] }
 0x10e   : > { %3190 = vrot.lane.b32.xlu0 %v3189_v3, %s3537_s10  ;;  %v4165_v28 = vstv %s4059_s16  ;;  %v4168_v29 = vstv %s4107_s12  ;;  %v4177_v34 = vstv %s4111_s27  ;;  %v3209_v42 = vpack.i.bf16 %v1960_v21, %v1955_v20  ;;  %s4255_s16 = sld [smem:[#allocation4 + $0x182]]  ;;  %s4257_s12 = sld [smem:[#allocation9 + $0x3]] }
 0x10f   : > { %v515_v30 = vadd.f32 %v4146_v22, %v511_v23  ;;  %v516_v31 = vadd.f32 %v4146_v22, %v512_v24  ;;  %v579_v32 = vmul.f32 %v4165_v28, %v4045_v4  ;;  %v580_v33 = vmul.f32 %v4165_v28, %v4055_v7  ;;  %s4293_s27 = sld [smem:[#allocation10 + $0x180]] }
 0x110   : > { %v4180_v35 = vstv %s4113_s14  ;;  %v585_v36 = vmul.f32 %v4102_v60, %v4168_v29  ;;  %v586_v37 = vmul.f32 %v4105_v61, %v4168_v29  ;;  %v4203_v43 = vstv %s4120_s17  ;;  %s4297_s14 = sld [smem:[#allocation10 + $0x181]]  ;;  %s4299_s17 = sld [smem:[#allocation10 + $0x182]] }
 0x111   : > { %3205 = vrot.lane.b32.xlu1 %v3536_v0, %s3537_s10  ;;  %v4192_v38 = vmax.f32 %v515_v30, 0.0  ;;  %v4194_v39 = vmax.f32 %v516_v31, 0.0  ;;  %v581_v40 = vadd.f32 %v579_v32, %v575_v5  ;;  %v582_v41 = vadd.f32 %v580_v33, %v576_v27 }
 0x112   : > { %3200 = vrot.lane.b32.xlu0 %v3536_v0, %s3537_s10  ;;  %v4206_v44 = vstv %s4128_s19  ;;  %v4209_v45 = vstv %s4130_s18  ;;  %v4216_v48 = vstv %s4136_s0  ;;  %s4311_s19 = sld [smem:[#allocation10 + $0x3]]  ;;  %s4313_s18 = sld [smem:[#allocation10 + $0x5]] }
 0x113   : > { %6466 = vst [vmem:[#allocation38_spill] sm:$0xff] %v4192_v38  ;;  %6467 = vst [vmem:[#allocation39_spill] sm:$0xff] %v4194_v39  ;;  %v521_v46 = vmul.f32 %v4150_v25, %v4192_v38  ;;  %v522_v47 = vmul.f32 %v4150_v25, %v4194_v39  ;;  %v4219_v49 = vstv %s4138_s8  ;;  %v527_v0 = vmul.f32 %v4177_v34, %v4192_v38  ;;  %s4325_s0 = sld [smem:[#allocation10 + $0x83]]  ;;  %s4327_s8 = sld [smem:[#allocation10 + $0x85]] }
 0x114   : > { %6468 = vst [vmem:[#allocation40_spill] sm:$0xff] %v4216_v48  ;;  %6469 = vst [vmem:[#allocation41_spill] sm:$0xff] %v4219_v49  ;;  %v528_v50 = vmul.f32 %v4177_v34, %v4194_v39  ;;  %v587_v51 = vadd.f32 %v585_v36, %v581_v40  ;;  %v588_v52 = vadd.f32 %v586_v37, %v582_v41  ;;  %v4235_v55 = vstv %s4155_s21  ;;  %s4346_s21 = sld [smem:[#allocation10 + $0x103]] }
 0x115   : > { %3215 = vrot.lane.b32.xlu1 %v3214_v19, %s3537_s10  ;;  %v651_v53 = vmul.f32 %v4209_v45, %v4061_v11  ;;  %v652_v54 = vmul.f32 %v4209_v45, %v4063_v12  ;;  %v4238_v56 = vstv %s4157_s22  ;;  %v655_v59 = vmul.f32 %v4235_v55, %v4045_v4  ;;  %s4348_s22 = sld [smem:[#allocation10 + $0x105]] }
 0x116   : > { %3210 = vrot.lane.b32.xlu0 %v3209_v42, %s3537_s10  ;;  %v591_v57 = vadd.f32 %v4203_v43, %v587_v51  ;;  %v592_v58 = vadd.f32 %v4203_v43, %v588_v52  ;;  %v656_v62 = vmul.f32 %v4235_v55, %v4055_v7  ;;  %v533_v63 = vmul.f32 %v4180_v35, %v4192_v38 }
 0x117   : > { %v534_v1 = vmul.f32 %v4180_v35, %v4194_v39  ;;  %v661_v2 = vmul.f32 %v4102_v60, %v4238_v56  ;;  %v662_v6 = vmul.f32 %v4105_v61, %v4238_v56  ;;  %v657_v3 = vadd.f32 %v655_v59, %v651_v53 }
 0x118   : > { %v4259_v8 = vmax.f32 %v591_v57, 0.0  ;;  %v4261_v9 = vmax.f32 %v592_v58, 0.0  ;;  %v658_v10 = vadd.f32 %v656_v62, %v652_v54  ;;  %v4264_v15 = vstv %s4186_s6  ;;  %s4352_s6 = sld [smem:[#allocation10 + $0x183]] }
 0x119   : > { %v4267_v17 = vstv %s4188_s24  ;;  %v4270_v18 = vstv %s4196_s11  ;;  %v4273_v19 = vstv %s4198_s2  ;;  %v663_v5 = vadd.f32 %v661_v2, %v657_v3  ;;  %s4354_s24 = sld [smem:[#allocation10 + $0x185]]  ;;  %s4399_s11 = sld [smem:[#allocation10 + $0x6]] }
 0x11a   : > { %6470 = vst [vmem:[#allocation42_spill] sm:$0xff] %v4259_v8  ;;  %6471 = vst [vmem:[#allocation43_spill] sm:$0xff] %v4261_v9  ;;  %v597_v20 = vmul.f32 %v4206_v44, %v4259_v8  ;;  %v598_v21 = vmul.f32 %v4206_v44, %v4261_v9  ;;  %v603_v23 = vmul.f32 %v4216_v48, %v4259_v8  ;;  %v4284_v30 = vstv %s4221_s29  ;;  %s4401_s2 = sld [smem:[#allocation10 + $0x86]] }
 0x11b   : > { %6472 = vst [vmem:[#allocation44_spill] sm:$0xff] %v4270_v18  ;;  %6473 = vst [vmem:[#allocation45_spill] sm:$0xff] %v4273_v19  ;;  %v604_v24 = vmul.f32 %v4216_v48, %v4261_v9  ;;  %v664_v27 = vadd.f32 %v662_v6, %v658_v10  ;;  %v4287_v31 = vstv %s4223_s7  ;;  %v609_v36 = vmul.f32 %v4219_v49, %v4259_v8  ;;  %s4408_s29 = sld [smem:[#allocation10 + $0x106]]  ;;  %s4410_s7 = sld [smem:[#allocation10 + $0x7]] }
 0x11c   : > { %v599_v32 = vadd.f32 %v597_v20, %v521_v46  ;;  %v600_v33 = vadd.f32 %v598_v21, %v522_v47  ;;  %v610_v37 = vmul.f32 %v4219_v49, %v4261_v9  ;;  %v605_v40 = vadd.f32 %v603_v23, %v527_v0 }
 0x11d   : > { %v606_v41 = vadd.f32 %v604_v24, %v528_v50  ;;  %v667_v42 = vadd.f32 %v4264_v15, %v663_v5  ;;  %v668_v51 = vadd.f32 %v4264_v15, %v664_v27  ;;  %v727_v46 = vmul.f32 %v4284_v30, %v4061_v11  ;;  %v4309_v50 = vld [vmem:[#allocation2 + $0x8] sm:$0x80] }
 0x11e   : > { %v728_v47 = vmul.f32 %v4284_v30, %v4063_v12  ;;  %v731_v52 = vmul.f32 %v4287_v31, %v4045_v4  ;;  %v732_v0 = vmul.f32 %v4287_v31, %v4055_v7  ;;  %v4320_v11 = vstv %s4255_s16  ;;  %s4426_s16 = sld [smem:[#allocation10 + $0x186]] }
 0x11f   : > { %v4315_v53 = vmax.f32 %v667_v42, 0.0  ;;  %v4317_v54 = vmax.f32 %v668_v51, 0.0  ;;  %v4323_v57 = vstv %s4257_s12  ;;  %v737_v59 = vmul.f32 %v4102_v60, %v4320_v11  ;;  %s4442_s12 = sld [smem:[#allocation10 + $0x8]] }
 0x120   : > { %6476 = vst [vmem:[#allocation48_spill] sm:$0xff] %v4323_v57  ;;  %v733_v12 = vadd.f32 %v731_v52, %v727_v46  ;;  %v734_v58 = vadd.f32 %v732_v0, %v728_v47  ;;  %v738_v62 = vmul.f32 %v4105_v61, %v4320_v11  ;;  %v611_v20 = vadd.f32 %v609_v36, %v533_v63 }
 0x121   : > { %6474 = vst [vmem:[#allocation46_spill] sm:$0xff] %v4315_v53  ;;  %6475 = vst [vmem:[#allocation47_spill] sm:$0xff] %v4317_v54  ;;  %v673_v2 = vmul.f32 %v4267_v17, %v4315_v53  ;;  %v674_v6 = vmul.f32 %v4267_v17, %v4317_v54  ;;  %v679_v3 = vmul.f32 %v4270_v18, %v4315_v53  ;;  %v4360_v47 = vstv %s4297_s14  ;;  %s4450_s14 = sld [smem:[#allocation10 + $0x88]] }
 0x122   : > { %v680_v10 = vmul.f32 %v4270_v18, %v4317_v54  ;;  %v739_v21 = vadd.f32 %v737_v59, %v733_v12  ;;  %v740_v23 = vadd.f32 %v738_v62, %v734_v58  ;;  %v612_v5 = vadd.f32 %v610_v37, %v534_v1  ;;  %6478 = vst [vmem:[#allocation50_spill] sm:$0xff] %v4360_v47  ;;  %v4375_v58 = vld [vmem:[#allocation2 + $0x8] sm:$0x80] }
 0x123   : > { %v675_v27 = vadd.f32 %v673_v2, %v599_v32  ;;  %v685_v42 = vmul.f32 %v4273_v19, %v4315_v53  ;;  %v686_v51 = vmul.f32 %v4273_v19, %v4317_v54  ;;  %v676_v63 = vadd.f32 %v674_v6, %v600_v33 }
 0x124   : > { %v681_v36 = vadd.f32 %v679_v3, %v605_v40  ;;  %v743_v46 = vadd.f32 %v4323_v57, %v739_v21  ;;  %v744_v1 = vadd.f32 %v4323_v57, %v740_v23  ;;  %v682_v32 = vadd.f32 %v680_v10, %v606_v41 }
 0x125   : > { %v4357_v37 = vstv %s4293_s27  ;;  %v4363_v52 = vstv %s4299_s17  ;;  %v4370_v40 = vstv %s4311_s19  ;;  %v4373_v12 = vstv %s4313_s18  ;;  %s4448_s27 = sld [smem:[#allocation10 + $0x87]]  ;;  %s4464_s19 = sld [smem:[#allocation10 + $0x108]] }
 0x126   : > { %6477 = vst [vmem:[#allocation49_spill] sm:$0xff] %v4357_v37  ;;  %6479 = vst [vmem:[#allocation51_spill] sm:$0xff] %v4363_v52  ;;  %v4365_v0 = vmax.f32 %v743_v46, 0.0  ;;  %v4367_v33 = vmax.f32 %v744_v1, 0.0  ;;  %v540_v59 = vmul.f32 %v4370_v40, %v4194_v39  ;;  %v552_v41 = vmul.f32 %v4373_v12, %v4194_v39  ;;  %s4462_s17 = sld [smem:[#allocation10 + $0x107]] }
 0x127   : > { %6482 = vst [vmem:[#allocation54_spill] sm:$0xff] %v4370_v40  ;;  %6483 = vst [vmem:[#allocation55_spill] sm:$0xff] %v4373_v12  ;;  %v4382_v62 = vstv %s4325_s0  ;;  %v4385_v2 = vstv %s4327_s8  ;;  %v687_v6 = vadd.f32 %v685_v42, %v611_v20  ;;  %v688_v23 = vadd.f32 %v686_v51, %v612_v5  ;;  %s4474_s18 = sld [smem:[#allocation10 + $0x187]]  ;;  %s4484_s0 = sld [smem:[#allocation10 + $0x188]] }
 0x128   : > { %6480 = vst [vmem:[#allocation52_spill] sm:$0xff] %v4365_v0  ;;  %6481 = vst [vmem:[#allocation53_spill] sm:$0xff] %v4367_v33  ;;  %v749_v3 = vmul.f32 %v4357_v37, %v4365_v0  ;;  %v750_v10 = vmul.f32 %v4357_v37, %v4367_v33  ;;  %v755_v21 = vmul.f32 %v4360_v47, %v4365_v0  ;;  %s3538_s8 = smov 127  }
 0x129   : > { %6484 = vst [vmem:[#allocation56_spill] sm:$0xff] %v4382_v62  ;;  %6485 = vst [vmem:[#allocation57_spill] sm:$0xff] %v4385_v2  ;;  %v756_v46 = vmul.f32 %v4360_v47, %v4367_v33  ;;  %v616_v1 = vmul.f32 %v4382_v62, %v4261_v9  ;;  %v628_v20 = vmul.f32 %v4385_v2, %v4261_v9 }
 0x12a   : > { %v751_v42 = vadd.f32 %v749_v3, %v675_v27  ;;  %v752_v24 = vadd.f32 %v750_v10, %v676_v63  ;;  %v761_v5 = vmul.f32 %v4363_v52, %v4365_v0  ;;  %v757_v47 = vadd.f32 %v755_v21, %v681_v36 }
 0x12b   : > { %v762_v19 = vmul.f32 %v4363_v52, %v4367_v33  ;;  %v618_v18 = vadd.f32 %v616_v1, %v540_v59  ;;  %v630_v37 = vadd.f32 %v628_v20, %v552_v41  ;;  %v4415_v27 = vstv %s4346_s21  ;;  %s4839_s21 = sld [smem:[#allocation4]] }
 0x12c   : > { %807 = vst.msk [vmem:[#allocation2 + $0x18] sm:$0xff] %vm806_vm3, %v751_v42  ;;  %808 = vst.msk [vmem:[#allocation2 + $0x28] sm:$0xff] %vm806_vm3, %v752_v24  ;;  %v4418_v63 = vstv %s4348_s22  ;;  %v4421_v3 = vstv %s4352_s6  ;;  %v4424_v36 = vstv %s4354_s24  ;;  %v758_v59 = vadd.f32 %v756_v46, %v682_v32  ;;  %s4841_s22 = sld [smem:[#allocation4 + $0x1]]  ;;  %s4853_s6 = sld [smem:[#allocation4 + $0x2]] }
 0x12d   : > { %6486 = vst [vmem:[#allocation58_spill] sm:$0xff] %v4415_v27  ;;  %6487 = vst [vmem:[#allocation59_spill] sm:$0xff] %v4418_v63  ;;  %v692_v41 = vmul.f32 %v4415_v27, %v4317_v54  ;;  %v704_v10 = vmul.f32 %v4418_v63, %v4317_v54  ;;  %v768_v24 = vmul.f32 %v4421_v3, %v4367_v33  ;;  %s4863_s24 = sld [smem:[#allocation4 + $0x80]] }
 0x12e   : > { %6488 = vst [vmem:[#allocation60_spill] sm:$0xff] %v4421_v3  ;;  %6489 = vst [vmem:[#allocation61_spill] sm:$0xff] %v4424_v36  ;;  %v539_v21 = vmul.f32 %v4370_v40, %v4192_v38  ;;  %v551_v1 = vmul.f32 %v4373_v12, %v4192_v38  ;;  %v615_v20 = vmul.f32 %v4382_v62, %v4259_v8 }
 0x12f   : > { %v627_v32 = vmul.f32 %v4385_v2, %v4259_v8  ;;  %v694_v46 = vadd.f32 %v692_v41, %v618_v18  ;;  %v706_v42 = vadd.f32 %v704_v10, %v630_v37  ;;  %v780_v51 = vmul.f32 %v4424_v36, %v4367_v33 }
 0x130   : > { %v691_v40 = vmul.f32 %v4415_v27, %v4315_v53  ;;  %v763_v12 = vadd.f32 %v761_v5, %v687_v6  ;;  %v764_v62 = vadd.f32 %v762_v19, %v688_v23  ;;  %v617_v52 = vadd.f32 %v615_v20, %v539_v21 }
 0x131   : > { %v703_v2 = vmul.f32 %v4418_v63, %v4315_v53  ;;  %v629_v49 = vadd.f32 %v627_v32, %v551_v1  ;;  %v767_v18 = vmul.f32 %v4421_v3, %v4365_v0  ;;  %v4457_v37 = vstv %s4399_s11  ;;  %s4873_s11 = sld [smem:[#allocation4 + $0x81]] }
 0x132   : > { %6490 = vst [vmem:[#allocation62_spill] sm:$0xff] %v4457_v37  ;;  %v4460_v41 = vstv %s4401_s2  ;;  %v4466_v6 = vadd.f32 %v768_v24, %v694_v46  ;;  %v779_v19 = vmul.f32 %v4424_v36, %v4365_v0  ;;  %v558_v23 = vmul.f32 %v4457_v37, %v4194_v39  ;;  %s4875_s2 = sld [smem:[#allocation4 + $0x82]] }
 0x133   : > { %6491 = vst [vmem:[#allocation63_spill] sm:$0xff] %v4460_v41  ;;  %v634_v5 = vmul.f32 %v4460_v41, %v4261_v9  ;;  %v812_v10 = vld [vmem:[#allocation2 + $0x18] sm:$0xff]  ;;  %v814_v21 = vld [vmem:[#allocation2 + $0x28] sm:$0x7f]  ;;  %v4476_v1 = vadd.f32 %v780_v51, %v706_v42  ;;  %v693_v20 = vadd.f32 %v691_v40, %v617_v52  ;;  %v4479_v24 = vstv %s4408_s29  ;;  %s4901_s29 = sld [smem:[#allocation9]] }
 0x134   : > { %6492 = vst [vmem:[#allocation64_spill] sm:$0xff] %v4479_v24  ;;  %v4482_v32 = vstv %s4410_s7  ;;  %v826_v46 = vrot.slane %v812_v10, 7  ;;  %v830_v36 = vrot.slane %v814_v21, 7  ;;  %847 = vst.msk [vmem:[#allocation2 + $0x18] sm:$0xff] %vm806_vm3, %v757_v47  ;;  %v4489_v63 = vstv %s4426_s16  ;;  %s4912_s7 = sld [smem:[#allocation4 + $0x100]]  ;;  %s4914_s16 = sld [smem:[#allocation4 + $0x101]] }
 0x135   : > { %848 = vst.msk [vmem:[#allocation2 + $0x28] sm:$0xff] %vm806_vm3, %v758_v59  ;;  %v557_v52 = vmul.f32 %v4457_v37, %v4192_v38  ;;  %v705_v40 = vadd.f32 %v703_v2, %v629_v49  ;;  %v636_v51 = vadd.f32 %v634_v5, %v558_v23  ;;  %v710_v42 = vmul.f32 %v4479_v24, %v4317_v54 }
 0x136   : > { %v563_v10 = vmul.f32 %v4482_v32, %v4192_v38  ;;  %v831_v47 = vsel %vm821_vm1, %v826_v46, %v830_v36  ;;  %v6493_v21 = vrot.slane %v4309_v50, 7  ;;  %v4502_v3 = vstv %s4442_s12  ;;  %s4925_s12 = sld [smem:[#allocation9 + $0x1]] }
 0x137   : > { %v633_v49 = vmul.f32 %v4460_v41, %v4259_v8  ;;  %838 = vrot.lane.b32.xlu1 %v831_v47, %s3537_s10  ;;  %v786_v2 = vmul.f32 %v4489_v63, %v4367_v33  ;;  %v569_v36 = vmul.f32 %v4502_v3, %v4192_v38  ;;  %v4513_v23 = vstv %s4448_s27  ;;  %s4939_s27 = sld [smem:[#allocation4 + $0x102]] }
 0x138   : > { %v827_v59 = vsel %vm821_vm1, %v6493_v21, %v826_v46  ;;  %v4516_v50 = vstv %s4450_s14  ;;  %v639_v46 = vmul.f32 %v4513_v23, %v4259_v8  ;;  %v709_v21 = vmul.f32 %v4479_v24, %v4315_v53  ;;  %s4963_s14 = sld [smem:[#allocation4 + $0x180]] }
 0x139   : > { %834 = vrot.lane.b32.xlu0 %v827_v59, %s3537_s10  ;;  %v635_v5 = vadd.f32 %v633_v49, %v557_v52  ;;  %v645_v47 = vmul.f32 %v4516_v50, %v4259_v8  ;;  %v712_v59 = vadd.f32 %v710_v42, %v636_v51  ;;  %v4525_v41 = vstv %s4462_s17  ;;  %s4965_s17 = sld [smem:[#allocation4 + $0x181]] }
 0x13a   : > { %v4528_v38 = vstv %s4464_s19  ;;  %v785_v37 = vmul.f32 %v4489_v63, %v4365_v0  ;;  %v641_v27 = vadd.f32 %v639_v46, %v563_v10  ;;  %v715_v48 = vmul.f32 %v4525_v41, %v4315_v53  ;;  %s4972_s19 = sld [smem:[#allocation9 + $0x2]] }
 0x13b   : > { %v647_v52 = vadd.f32 %v645_v47, %v569_v36  ;;  %v711_v49 = vadd.f32 %v709_v21, %v635_v5  ;;  %v4534_v57 = vld [vmem:[#allocation2 + $0x18] sm:$0xff]  ;;  %v721_v51 = vmul.f32 %v4528_v38, %v4315_v53  ;;  %v4541_v42 = vstv %s4474_s18  ;;  %s4974_s18 = sld [smem:[#allocation10]] }
 0x13c   : > { %6494 = vst [vmem:[#allocation65_spill] sm:$0xff] %v4534_v57  ;;  %v4536_v8 = vld [vmem:[#allocation2 + $0x28] sm:$0x7f]  ;;  %v4544_v24 = vstv %s4484_s0  ;;  %v564_v10 = vmul.f32 %v4482_v32, %v4194_v39  ;;  %864 = vst.msk [vmem:[#allocation2 + $0x18] sm:$0xff] %vm806_vm3, %v763_v12  ;;  %v769_v36 = vadd.f32 %v767_v18, %v693_v20  ;;  %v4550_v5 = vadd.f32 %v779_v19, %v705_v40  ;;  %v4573_v18 = vld [vmem:[%s4008_s5 + $0x20] sm:$0xff]  ;;  %s4985_s0 = sld [smem:[#allocation10 + $0x80]] }
 0x13d   : > { %6495 = vst [vmem:[#allocation66_spill] sm:$0xff] %v4536_v8  ;;  %865 = vst.msk [vmem:[#allocation2 + $0x28] sm:$0xff] %vm806_vm3, %v764_v62  ;;  %v717_v46 = vadd.f32 %v715_v48, %v641_v27  ;;  %v791_v47 = vmul.f32 %v4541_v42, %v4365_v0  ;;  %v4554_v21 = vadd.f32 %v786_v2, %v712_v59 }
 0x13e   : > { %v4556_v8 = vadd.f32 %v785_v37, %v711_v49  ;;  %v640_v57 = vmul.f32 %v4513_v23, %v4261_v9  ;;  %v716_v53 = vmul.f32 %v4525_v41, %v4317_v54  ;;  %v4562_v12 = vadd.f32 %v721_v51, %v647_v52  ;;  %v4576_v37 = vld [vmem:[%s4008_s5 + $0x28] sm:$0xff] }
 0x13f   : > { %v4566_v62 = vmul.f32 %v4544_v24, %v4365_v0  ;;  %v570_v48 = vmul.f32 %v4502_v3, %v4194_v39  ;;  %v646_v27 = vmul.f32 %v4516_v50, %v4261_v9  ;;  %v4578_v19 = vadd.f32 %v791_v47, %v717_v46 }
 0x140   : > { %v642_v20 = vadd.f32 %v640_v57, %v564_v10  ;;  %v792_v40 = vmul.f32 %v4541_v42, %v4367_v33  ;;  %v722_v2 = vmul.f32 %v4528_v38, %v4317_v54  ;;  %v1011_v52 = vmul.f32 %v4065_v13, %v4045_v4 }
 0x141   : > { %v648_v59 = vadd.f32 %v646_v27, %v570_v48  ;;  %v1012_v49 = vmul.f32 %v4065_v13, %v4055_v7  ;;  %v1015_v51 = vmul.f32 %v4102_v60, %v4067_v14  ;;  %v1016_v57 = vmul.f32 %v4105_v61, %v4067_v14 }
 0x142   : > { %v718_v0 = vadd.f32 %v716_v53, %v642_v20  ;;  %v1021_v10 = vmul.f32 %v4573_v18, %v4126_v16  ;;  %v1022_v46 = vmul.f32 %v4576_v37, %v4126_v16  ;;  %v4598_v47 = vmul.f32 %v4544_v24, %v4367_v33 }
 0x143   : > { %v1017_v48 = vadd.f32 %v1015_v51, %v1011_v52  ;;  %v1087_v13 = vmul.f32 %v4153_v26, %v4045_v4  ;;  %v1088_v53 = vmul.f32 %v4153_v26, %v4055_v7  ;;  %v867_v27 = vld [vmem:[#allocation2 + $0x18] sm:$0xff]  ;;  %v4604_v14 = vadd.f32 %v722_v2, %v648_v59 }
 0x144   : > { %v868_v20 = vld [vmem:[#allocation2 + $0x28] sm:$0x7f]  ;;  %v1018_v54 = vadd.f32 %v1016_v57, %v1012_v49  ;;  %v1091_v9 = vmul.f32 %v4102_v60, %v4165_v28  ;;  %v1092_v16 = vmul.f32 %v4105_v61, %v4165_v28  ;;  %v873_v33 = vrot.slane %v867_v27, 7  ;;  %885 = vst.msk [vmem:[#allocation2 + $0x18] sm:$0xff] %vm806_vm3, %v769_v36  ;;  %v4615_v26 = vld [vmem:[#allocation2 + $0x38] sm:$0x1] }
 0x145   : > { %v875_v39 = vrot.slane %v868_v20, 7  ;;  %886 = vst.msk [vmem:[#allocation2 + $0x28] sm:$0xff] %vm806_vm3, %v4466_v6  ;;  %v4613_v52 = vadd.f32 %v792_v40, %v718_v0  ;;  %v1023_v2 = vadd.f32 %v1021_v10, %v1017_v48  ;;  %v1097_v57 = vmul.f32 %v4573_v18, %v4168_v29 }
 0x146   : > { %v1024_v59 = vadd.f32 %v1022_v46, %v1018_v54  ;;  %v1093_v49 = vadd.f32 %v1091_v9, %v1087_v13  ;;  %v1094_v51 = vadd.f32 %v1092_v16, %v1088_v53  ;;  %v6496_v28 = vrot.slane %v4375_v58, 7 }
 0x147   : > { %v876_v20 = vsel %vm821_vm1, %v873_v33, %v875_v39  ;;  %v1027_v6 = vadd.f32 %v1023_v2, %v4146_v22  ;;  %v1098_v0 = vmul.f32 %v4576_v37, %v4168_v29  ;;  %v946_v9 = vrot.slane %v4615_v26, 1 }
 0x148   : > { %v874_v27 = vsel %vm821_vm1, %v6496_v28, %v873_v33  ;;  %879 = vrot.lane.b32.xlu0 %v876_v20, %s3538_s8  ;;  %v1028_v54 = vadd.f32 %v1024_v59, %v4146_v22  ;;  %v1099_v36 = vadd.f32 %v1097_v57, %v1093_v49  ;;  %v1163_v58 = vmul.f32 %v4209_v45, %v4045_v4 }
 0x149   : > { %877 = vrot.lane.b32.xlu1 %v874_v27, %s3538_s8  ;;  %v4632_v40 = vmax.f32 %v1027_v6, 0.0  ;;  %v1100_v39 = vadd.f32 %v1098_v0, %v1094_v51  ;;  %v1164_v33 = vmul.f32 %v4209_v45, %v4055_v7  ;;  %v1167_v29 = vmul.f32 %v4102_v60, %v4235_v55 }
 0x14a   : > { %v4638_v10 = vmax.f32 %v1028_v54, 0.0  ;;  %v1103_v46 = vadd.f32 %v1099_v36, %v4203_v43  ;;  %v1168_v22 = vmul.f32 %v4105_v61, %v4235_v55  ;;  %v1173_v48 = vmul.f32 %v4573_v18, %v4238_v56 }
 0x14b   : > { %6497 = vst [vmem:[#allocation67_spill] sm:$0xff] %v4632_v40  ;;  %v1033_v13 = vmul.f32 %v4632_v40, %v4150_v25  ;;  %v1104_v53 = vadd.f32 %v1100_v39, %v4203_v43  ;;  %v1169_v16 = vadd.f32 %v1167_v29, %v1163_v58  ;;  %v1174_v45 = vmul.f32 %v4576_v37, %v4238_v56  ;;  %v888_v59 = vld [vmem:[#allocation2 + $0x18] sm:$0xff] }
 0x14c   : > { %6498 = vst [vmem:[#allocation68_spill] sm:$0xff] %v4638_v10  ;;  %v890_v2 = vld [vmem:[#allocation2 + $0x28] sm:$0xff]  ;;  %v1034_v49 = vmul.f32 %v4638_v10, %v4150_v25  ;;  %v4652_v51 = vmax.f32 %v1103_v46, 0.0  ;;  %v1170_v55 = vadd.f32 %v1168_v22, %v1164_v33  ;;  %v1239_v57 = vmul.f32 %v4284_v30, %v4045_v4  ;;  %909 = vst.msk [vmem:[#allocation2 + $0x18] sm:$0xff] %vm806_vm3, %v4550_v5  ;;  %v6503_v46 = vld [vmem:[#allocation48_spill] sm:$0xff] }
 0x14d   : > { %910 = vst.msk [vmem:[#allocation2 + $0x28] sm:$0xff] %vm806_vm3, %v4476_v1  ;;  %901 = vrot.lane.b32.xlu1 %v890_v2, %s3537_s10  ;;  %897 = vrot.lane.b32.xlu0 %v888_v59, %s3537_s10  ;;  %v4662_v43 = vmax.f32 %v1104_v53, 0.0  ;;  %v1175_v56 = vadd.f32 %v1173_v48, %v1169_v16  ;;  %v1240_v25 = vmul.f32 %v4284_v30, %v4055_v7  ;;  %v6504_v48 = vld [vmem:[#allocation40_spill] sm:$0xff]  ;;  %v6505_v59 = vld [vmem:[#allocation41_spill] sm:$0xff] }
 0x14e   : > { %6499 = vst [vmem:[#allocation69_spill] sm:$0xff] %v4652_v51  ;;  %v1243_v28 = vmul.f32 %v4102_v60, %v4287_v31  ;;  %v1109_v4 = vmul.f32 %v4652_v51, %v4206_v44  ;;  %v1176_v1 = vadd.f32 %v1174_v45, %v1170_v55  ;;  %v1244_v27 = vmul.f32 %v4105_v61, %v4287_v31 }
 0x14f   : > { %6500 = vst [vmem:[#allocation70_spill] sm:$0xff] %v4662_v43  ;;  %v1249_v5 = vmul.f32 %v4573_v18, %v4320_v11  ;;  %v1110_v20 = vmul.f32 %v4662_v43, %v4206_v44  ;;  %v1179_v6 = vadd.f32 %v1175_v56, %v4264_v15  ;;  %v1250_v7 = vmul.f32 %v4576_v37, %v4320_v11 }
 0x150   : > { %v1245_v0 = vadd.f32 %v1243_v28, %v1239_v57  ;;  %v1111_v60 = vadd.f32 %v1109_v4, %v1033_v13  ;;  %v1180_v30 = vadd.f32 %v1176_v1, %v4264_v15  ;;  %v1246_v54 = vadd.f32 %v1244_v27, %v1240_v25  ;;  %v6508_v27 = vld [vmem:[#allocation49_spill] sm:$0xff] }
 0x151   : > { %v1039_v36 = vmul.f32 %v4632_v40, %v4177_v34  ;;  %v1112_v61 = vadd.f32 %v1110_v20, %v1034_v49  ;;  %v4682_v31 = vmax.f32 %v1179_v6, 0.0  ;;  %v1040_v44 = vmul.f32 %v4638_v10, %v4177_v34  ;;  %v6510_v6 = vld [vmem:[#allocation45_spill] sm:$0xff] }
 0x152   : > { %v1251_v58 = vadd.f32 %v1249_v5, %v1245_v0  ;;  %v4686_v39 = vmax.f32 %v1180_v30, 0.0  ;;  %v1252_v33 = vadd.f32 %v1250_v7, %v1246_v54  ;;  %v1045_v11 = vmul.f32 %v4632_v40, %v4180_v35  ;;  %v6509_v5 = vld [vmem:[#allocation44_spill] sm:$0xff]  ;;  %v6511_v30 = vld [vmem:[#allocation50_spill] sm:$0xff] }
 0x153   : > { %6501 = vst [vmem:[#allocation71_spill] sm:$0xff] %v4682_v31  ;;  %v1046_v15 = vmul.f32 %v4638_v10, %v4180_v35  ;;  %v1185_v29 = vmul.f32 %v4682_v31, %v4267_v17  ;;  %v1115_v13 = vmul.f32 %v4652_v51, %v6504_v48  ;;  %v1116_v34 = vmul.f32 %v4662_v43, %v6504_v48  ;;  %v911_v16 = vld [vmem:[#allocation2 + $0x18] sm:$0xff] }
 0x154   : > { %6502 = vst [vmem:[#allocation72_spill] sm:$0xff] %v4686_v39  ;;  %v1255_v22 = vadd.f32 %v1251_v58, %v6503_v46  ;;  %v912_v53 = vld [vmem:[#allocation2 + $0x28] sm:$0xff]  ;;  %v1186_v45 = vmul.f32 %v4686_v39, %v4267_v17  ;;  %v1256_v2 = vadd.f32 %v1252_v33, %v6503_v46  ;;  %v1121_v35 = vmul.f32 %v4652_v51, %v6505_v59 }
 0x155   : > { %v1122_v49 = vmul.f32 %v4662_v43, %v6505_v59  ;;  %924 = vst.msk [vmem:[#allocation2 + $0x28] sm:$0xff] %vm806_vm3, %v4554_v21  ;;  %917 = vrot.lane.b32.xlu1 %v912_v53, %s3538_s8  ;;  %923 = vst.msk [vmem:[#allocation2 + $0x18] sm:$0xff] %vm806_vm3, %v4556_v8  ;;  %915 = vrot.lane.b32.xlu0 %v911_v16, %s3538_s8  ;;  %v1187_v55 = vadd.f32 %v1185_v29, %v1111_v60  ;;  %v6512_v29 = vld [vmem:[#allocation51_spill] sm:$0xff]  ;;  %v6513_v53 = vld [vmem:[#allocation54_spill] sm:$0xff] }
 0x156   : > { %v4712_v17 = vmax.f32 %v1255_v22, 0.0  ;;  %v1117_v57 = vadd.f32 %v1115_v13, %v1039_v36  ;;  %v1118_v56 = vadd.f32 %v1116_v34, %v1040_v44  ;;  %v1188_v25 = vadd.f32 %v1186_v45, %v1112_v61 }
 0x157   : > { %v4714_v28 = vmax.f32 %v1256_v2, 0.0  ;;  %v1123_v4 = vadd.f32 %v1121_v35, %v1045_v11  ;;  %v1124_v1 = vadd.f32 %v1122_v49, %v1046_v15  ;;  %v1191_v20 = vmul.f32 %v4682_v31, %v6509_v5  ;;  %v6514_v49 = vld [vmem:[#allocation56_spill] sm:$0xff] }
 0x158   : > { %6506 = vst [vmem:[#allocation48_spill] sm:$0xff] %v4712_v17  ;;  %v1261_v21 = vmul.f32 %v4712_v17, %v6508_v27  ;;  %v1192_v8 = vmul.f32 %v4686_v39, %v6509_v5  ;;  %v1197_v0 = vmul.f32 %v4682_v31, %v6510_v6  ;;  %v1198_v60 = vmul.f32 %v4686_v39, %v6510_v6  ;;  %v6517_v5 = vld [vmem:[#allocation55_spill] sm:$0xff] }
 0x159   : > { %6507 = vst [vmem:[#allocation40_spill] sm:$0xff] %v4714_v28  ;;  %v1262_v7 = vmul.f32 %v4714_v28, %v6508_v27  ;;  %v1267_v54 = vmul.f32 %v4712_v17, %v6511_v30  ;;  %v1268_v36 = vmul.f32 %v4714_v28, %v6511_v30  ;;  %v1193_v58 = vadd.f32 %v1191_v20, %v1117_v57  ;;  %v6515_v57 = vld [vmem:[#allocation58_spill] sm:$0xff]  ;;  %v6519_v6 = vld [vmem:[#allocation59_spill] sm:$0xff] }
 0x15a   : > { %v4732_v61 = vadd.f32 %v1261_v21, %v1187_v55  ;;  %v1194_v44 = vadd.f32 %v1192_v8, %v1118_v56  ;;  %v1199_v33 = vadd.f32 %v1197_v0, %v1123_v4  ;;  %v1200_v15 = vadd.f32 %v1198_v60, %v1124_v1  ;;  %v4762_v4 = vld [vmem:[#allocation2 + $0x38] sm:$0x1]  ;;  %v6516_v1 = vld [vmem:[#allocation60_spill] sm:$0xff] }
 0x15b   : > { %v4734_v11 = vadd.f32 %v1262_v7, %v1188_v25  ;;  %v1273_v46 = vmul.f32 %v4712_v17, %v6512_v29  ;;  %v1274_v22 = vmul.f32 %v4714_v28, %v6512_v29  ;;  %v799_v48 = vadd.f32 %v4566_v62, %v4562_v12  ;;  %v6518_v8 = vld [vmem:[#allocation57_spill] sm:$0xff] }
 0x15c   : > { %v4742_v13 = vadd.f32 %v1267_v54, %v1193_v58  ;;  %v4744_v34 = vadd.f32 %v1268_v36, %v1194_v44  ;;  %v1051_v16 = vmul.f32 %v4632_v40, %v6513_v53  ;;  %v926_v45 = vld [vmem:[#allocation2 + $0x18] sm:$0xfe]  ;;  %v928_v2 = vld [vmem:[#allocation2 + $0x28] sm:$0xff]  ;;  %v1127_v55 = vmul.f32 %v4652_v51, %v6514_v49 }
 0x15d   : > { %v4748_v59 = vadd.f32 %v1273_v46, %v1199_v33  ;;  %v4750_v35 = vadd.f32 %v1274_v22, %v1200_v15  ;;  %v1203_v56 = vmul.f32 %v4682_v31, %v6515_v57  ;;  %962 = vst.msk [vmem:[#allocation2 + $0x18] sm:$0xff] %vm806_vm3, %v4578_v19  ;;  %v941_v12 = vrot.slane %v926_v45, 1  ;;  %963 = vst.msk [vmem:[#allocation2 + $0x28] sm:$0xff] %vm806_vm3, %v4613_v52  ;;  %v6521_v45 = vld [vmem:[#allocation62_spill] sm:$0xff] }
 0x15e   : > { %v942_v62 = vrot.slane %v928_v2, 1  ;;  %v800_v25 = vadd.f32 %v4598_v47, %v4604_v14  ;;  %v1279_v27 = vmul.f32 %v4712_v17, %v6516_v1  ;;  %v1129_v21 = vadd.f32 %v1127_v55, %v1051_v16  ;;  %v6520_v14 = vld [vmem:[#allocation61_spill] sm:$0xff] }
 0x15f   : > { %v1063_v20 = vmul.f32 %v4632_v40, %v6517_v5  ;;  %v1139_v19 = vmul.f32 %v4652_v51, %v6518_v8  ;;  %v1215_v0 = vmul.f32 %v4682_v31, %v6519_v6  ;;  %v1291_v7 = vmul.f32 %v4712_v17, %v6520_v14 }
 0x160   : > { %v943_v52 = vsel %vm937_vm2, %v941_v12, %v942_v62  ;;  %v947_v47 = vsel %vm937_vm2, %v942_v62, %v946_v9  ;;  %v1052_v60 = vmul.f32 %v4638_v10, %v6513_v53  ;;  %v990_v30 = vrot.slane %v4762_v4, 1  ;;  %v6525_v62 = vld [vmem:[#allocation64_spill] sm:$0xff] }
 0x161   : > { %950 = vrot.lane.b32.xlu1 %v943_v52, %s3537_s10  ;;  %954 = vrot.lane.b32.xlu0 %v947_v47, %s3537_s10  ;;  %v1205_v54 = vadd.f32 %v1203_v56, %v1129_v21  ;;  %v1141_v36 = vadd.f32 %v1139_v19, %v1063_v20  ;;  %v1064_v58 = vmul.f32 %v4638_v10, %v6517_v5 }
 0x162   : > { %v1128_v26 = vmul.f32 %v4662_v43, %v6514_v49  ;;  %v1140_v9 = vmul.f32 %v4662_v43, %v6518_v8  ;;  %v1204_v44 = vmul.f32 %v4686_v39, %v6515_v57  ;;  %v1216_v33 = vmul.f32 %v4686_v39, %v6519_v6  ;;  %v6522_v49 = vld [vmem:[#allocation63_spill] sm:$0xff] }
 0x163   : > { %v4793_v15 = vadd.f32 %v1279_v27, %v1205_v54  ;;  %v1217_v29 = vadd.f32 %v1215_v0, %v1141_v36  ;;  %v1280_v46 = vmul.f32 %v4714_v28, %v6516_v1  ;;  %v1292_v22 = vmul.f32 %v4714_v28, %v6520_v14 }
 0x164   : > { %v1130_v53 = vadd.f32 %v1128_v26, %v1052_v60  ;;  %v1142_v16 = vadd.f32 %v1140_v9, %v1064_v58  ;;  %v1069_v2 = vmul.f32 %v4632_v40, %v6521_v45  ;;  %v1145_v55 = vmul.f32 %v4652_v51, %v6522_v49  ;;  %v4803_v57 = vld [vmem:[#allocation2 + $0x18] sm:$0xfe]  ;;  %v4805_v56 = vld [vmem:[#allocation2 + $0x28] sm:$0xff] }
 0x165   : > { %6523 = vst [vmem:[#allocation41_spill] sm:$0xff] %v4803_v57  ;;  %6524 = vst [vmem:[#allocation49_spill] sm:$0xff] %v4805_v56  ;;  %v4807_v12 = vadd.f32 %v1291_v7, %v1217_v29  ;;  %v1221_v1 = vmul.f32 %v4682_v31, %v6525_v62  ;;  %v1297_v27 = vmul.f32 %v4712_v17, %v4489_v63 }
 0x166   : > { %v1070_v21 = vmul.f32 %v4638_v10, %v6521_v45  ;;  %979 = vst.msk [vmem:[#allocation2 + $0x18] sm:$0xff] %vm806_vm3, %v799_v48  ;;  %980 = vst.msk [vmem:[#allocation2 + $0x28] sm:$0xff] %vm806_vm3, %v800_v25  ;;  %v1206_v5 = vadd.f32 %v1204_v44, %v1130_v53  ;;  %v1218_v20 = vadd.f32 %v1216_v33, %v1142_v16 }
 0x167   : > { %v1147_v8 = vadd.f32 %v1145_v55, %v1069_v2  ;;  %v1146_v19 = vmul.f32 %v4662_v43, %v6522_v49  ;;  %v1222_v6 = vmul.f32 %v4686_v39, %v6525_v62  ;;  %v1298_v0 = vmul.f32 %v4714_v28, %v4489_v63 }
 0x168   : > { %v1075_v52 = vmul.f32 %v4632_v40, %v4482_v32  ;;  %v1076_v48 = vmul.f32 %v4638_v10, %v4482_v32  ;;  %v4827_v47 = vadd.f32 %v1280_v46, %v1206_v5  ;;  %v4829_v25 = vadd.f32 %v1292_v22, %v1218_v20 }
 0x169   : > { %v1223_v14 = vadd.f32 %v1221_v1, %v1147_v8  ;;  %v1148_v7 = vadd.f32 %v1146_v19, %v1070_v21  ;;  %v1151_v60 = vmul.f32 %v4652_v51, %v4513_v23  ;;  %v1152_v54 = vmul.f32 %v4662_v43, %v4513_v23  ;;  %v4891_v19 = vld [vmem:[%s4008_s5 + $0x18] sm:$0xff] }
 0x16a   : > { %v1227_v63 = vmul.f32 %v4682_v31, %v4525_v41  ;;  %v1228_v36 = vmul.f32 %v4686_v39, %v4525_v41  ;;  %v1303_v26 = vmul.f32 %v4712_v17, %v4541_v42  ;;  %v1304_v9 = vmul.f32 %v4714_v28, %v4541_v42 }
 0x16b   : > { %v4843_v32 = vadd.f32 %v1297_v27, %v1223_v14  ;;  %v1224_v58 = vadd.f32 %v1222_v6, %v1148_v7  ;;  %v1153_v23 = vadd.f32 %v1151_v60, %v1075_v52  ;;  %v1154_v44 = vadd.f32 %v1152_v54, %v1076_v48  ;;  %v1320_v6 = vld [vmem:[#allocation2 + $0x8] sm:$0x80]  ;;  %v4908_v52 = vld [vmem:[%s4008_s5 + $0x30] sm:$0xff] }
 0x16c   : > { %v1081_v33 = vmul.f32 %v4632_v40, %v4502_v3  ;;  %v1082_v41 = vmul.f32 %v4638_v10, %v4502_v3  ;;  %v1157_v46 = vmul.f32 %v4652_v51, %v4516_v50  ;;  %v1158_v22 = vmul.f32 %v4662_v43, %v4516_v50 }
 0x16d   : > { %v4855_v29 = vadd.f32 %v1298_v0, %v1224_v58  ;;  %v1233_v42 = vmul.f32 %v4682_v31, %v4528_v38  ;;  %v981_v53 = vld [vmem:[#allocation2 + $0x18] sm:$0xfe]  ;;  %v982_v16 = vld [vmem:[#allocation2 + $0x28] sm:$0xff]  ;;  %v1229_v45 = vadd.f32 %v1227_v63, %v1153_v23  ;;  %v1230_v3 = vadd.f32 %v1228_v36, %v1154_v44 }
 0x16e   : > { %v1234_v2 = vmul.f32 %v4686_v39, %v4528_v38  ;;  %v1309_v49 = vmul.f32 %v4712_v17, %v4544_v24  ;;  %v987_v55 = vrot.slane %v981_v53, 1  ;;  %v988_v62 = vrot.slane %v982_v16, 1  ;;  %1318 = vst.msk [vmem:[#allocation2 + $0x28] sm:$0xff] %vm806_vm3, %v4734_v11  ;;  %1317 = vst.msk [vmem:[#allocation2 + $0x18] sm:$0xff] %vm806_vm3, %v4732_v61  ;;  %v4884_v11 = vld [vmem:[%s4008_s5 + $0x10] sm:$0xff]  ;;  %v4928_v36 = vld [vmem:[%s4008_s5 + $0x38] sm:$0xff] }
 0x16f   : > { %v1159_v50 = vadd.f32 %v1157_v46, %v1081_v33  ;;  %v1160_v1 = vadd.f32 %v1158_v22, %v1082_v41  ;;  %v4877_v38 = vadd.f32 %v1303_v26, %v1229_v45  ;;  %v4879_v27 = vadd.f32 %v1304_v9, %v1230_v3 }
 0x170   : > { %v1310_v21 = vmul.f32 %v4714_v28, %v4544_v24  ;;  %v989_v61 = vsel %vm937_vm2, %v987_v55, %v988_v62  ;;  %v991_v5 = vsel %vm937_vm2, %v988_v62, %v990_v30  ;;  %v4896_v24 = vstv %s4839_s21  ;;  %s4989_s21 = sld [smem:[#allocation4 + $0x182]] }
 0x171   : > { %v1235_v20 = vadd.f32 %v1233_v42, %v1159_v50  ;;  %v1236_v8 = vadd.f32 %v1234_v2, %v1160_v1  ;;  %992 = vrot.lane.b32.xlu1 %v989_v61, %s3538_s8  ;;  %994 = vrot.lane.b32.xlu0 %v991_v5, %s3538_s8  ;;  %v4899_v0 = vstv %s4841_s22  ;;  %v1519_v48 = vmul.f32 %v4884_v11, %v4896_v24  ;;  %s5010_s22 = sld [smem:[#allocation9 + $0x3]] }
 0x172   : > { %v1520_v14 = vmul.f32 %v4891_v19, %v4896_v24  ;;  %v1523_v7 = vmul.f32 %v4573_v18, %v4899_v0  ;;  %v1524_v60 = vmul.f32 %v4576_v37, %v4899_v0  ;;  %v4923_v54 = vstv %s4853_s6  ;;  %s5027_s6 = sld [smem:[#allocation10 + $0x100]] }
 0x173   : > { %v4903_v4 = vadd.f32 %v1309_v49, %v1235_v20  ;;  %v4905_v30 = vadd.f32 %v1310_v21, %v1236_v8  ;;  %v1334_v63 = vrot.slane %v1320_v6, 7  ;;  %v4931_v58 = vstv %s4863_s24  ;;  %s5040_s24 = sld [smem:[#allocation10 + $0x1]] }
 0x174   : > { %v1525_v23 = vadd.f32 %v1523_v7, %v1519_v48  ;;  %v1529_v44 = vmul.f32 %v4908_v52, %v4923_v54  ;;  %v1595_v33 = vmul.f32 %v4884_v11, %v4931_v58  ;;  %v1596_v41 = vmul.f32 %v4891_v19, %v4931_v58 }
 0x175   : > { %v1322_v26 = vld [vmem:[#allocation2 + $0x18] sm:$0xff]  ;;  %v1324_v9 = vld [vmem:[#allocation2 + $0x28] sm:$0x7f]  ;;  %v4946_v42 = vstv %s4873_s11  ;;  %v4949_v53 = vstv %s4875_s2  ;;  %v1526_v16 = vadd.f32 %v1524_v60, %v1520_v14  ;;  %v1530_v45 = vmul.f32 %v4928_v36, %v4923_v54  ;;  %s5052_s11 = sld [smem:[#allocation10 + $0x2]]  ;;  %s5054_s2 = sld [smem:[#allocation10 + $0x81]] }
 0x176   : > { %v1335_v46 = vrot.slane %v1322_v26, 7  ;;  %v1339_v22 = vrot.slane %v1324_v9, 7  ;;  %1355 = vst.msk [vmem:[#allocation2 + $0x18] sm:$0xff] %vm806_vm3, %v4742_v13  ;;  %1356 = vst.msk [vmem:[#allocation2 + $0x28] sm:$0xff] %vm806_vm3, %v4744_v34  ;;  %v1599_v3 = vmul.f32 %v4573_v18, %v4946_v42  ;;  %v1600_v2 = vmul.f32 %v4576_v37, %v4946_v42 }
 0x177   : > { %v1605_v49 = vmul.f32 %v4908_v52, %v4949_v53  ;;  %v1606_v55 = vmul.f32 %v4928_v36, %v4949_v53  ;;  %v4970_v62 = vstv %s4901_s29  ;;  %v1531_v1 = vadd.f32 %v1529_v44, %v1525_v23  ;;  %s5059_s29 = sld [smem:[#allocation10 + $0x82]] }
 0x178   : > { %v1340_v13 = vsel %vm821_vm1, %v1335_v46, %v1339_v22  ;;  %v1336_v34 = vsel %vm821_vm1, %v1334_v63, %v1335_v46  ;;  %v1601_v50 = vadd.f32 %v1599_v3, %v1595_v33  ;;  %v1602_v21 = vadd.f32 %v1600_v2, %v1596_v41  ;;  %v1374_v46 = vld [vmem:[#allocation2 + $0x8] sm:$0x80] }
 0x179   : > { %1347 = vrot.lane.b32.xlu1 %v1340_v13, %s3537_s10  ;;  %1343 = vrot.lane.b32.xlu0 %v1336_v34, %s3537_s10  ;;  %v4977_v61 = vstv %s4912_s7  ;;  %v4980_v5 = vstv %s4914_s16  ;;  %v1532_v20 = vadd.f32 %v1530_v45, %v1526_v16  ;;  %v1535_v22 = vadd.f32 %v4970_v62, %v1531_v1  ;;  %s5075_s7 = sld [smem:[#allocation10 + $0x180]]  ;;  %s5081_s16 = sld [smem:[#allocation10 + $0x101]] }
 0x17a   : > { %v1607_v8 = vadd.f32 %v1605_v49, %v1601_v50  ;;  %v4983_v6 = vstv %s4925_s12  ;;  %v1671_v48 = vmul.f32 %v4884_v11, %v4977_v61  ;;  %v1608_v14 = vadd.f32 %v1606_v55, %v1602_v21  ;;  %s5101_s12 = sld [smem:[#allocation10 + $0x3]] }
 0x17b   : > { %v1672_v7 = vmul.f32 %v4891_v19, %v4977_v61  ;;  %v1675_v60 = vmul.f32 %v4573_v18, %v4980_v5  ;;  %v1676_v63 = vmul.f32 %v4576_v37, %v4980_v5  ;;  %v5002_v23 = vstv %s4939_s27  ;;  %s5106_s27 = sld [smem:[#allocation10 + $0x102]] }
 0x17c   : > { %v1681_v41 = vmul.f32 %v4908_v52, %v5002_v23  ;;  %v1536_v16 = vadd.f32 %v4970_v62, %v1532_v20  ;;  %v1611_v45 = vadd.f32 %v4983_v6, %v1607_v8  ;;  %v5019_v2 = vstv %s4963_s14  ;;  %s5117_s14 = sld [smem:[#allocation10 + $0x181]] }
 0x17d   : > { %v4997_v26 = vld [vmem:[#allocation2 + $0x28] sm:$0x7f]  ;;  %v4999_v9 = vld [vmem:[#allocation2 + $0x18] sm:$0xff]  ;;  %v1677_v44 = vadd.f32 %v1675_v60, %v1671_v48  ;;  %v1678_v33 = vadd.f32 %v1676_v63, %v1672_v7  ;;  %6528 = vst [vmem:[#allocation50_spill] sm:$0xff] %v5019_v2  ;;  %v5022_v13 = vstv %s4965_s17  ;;  %v5025_v49 = vstv %s4972_s19  ;;  %s5119_s17 = sld [smem:[#allocation10 + $0x83]] }
 0x17e   : > { %6526 = vst [vmem:[#allocation44_spill] sm:$0xff] %v4997_v26  ;;  %6527 = vst [vmem:[#allocation45_spill] sm:$0xff] %v4999_v9  ;;  %v1747_v55 = vmul.f32 %v4884_v11, %v5019_v2  ;;  %v1748_v50 = vmul.f32 %v4891_v19, %v5019_v2  ;;  %v1380_v1 = vrot.slane %v1374_v46, 7  ;;  %v5034_v21 = vstv %s4974_s18  ;;  %s5129_s19 = sld [smem:[#allocation10 + $0x103]]  ;;  %s5154_s18 = sld [smem:[#allocation10 + $0x5]] }
 0x17f   : > { %1373 = vst.msk [vmem:[#allocation2 + $0x28] sm:$0xff] %vm806_vm3, %v4750_v35  ;;  %1372 = vst.msk [vmem:[#allocation2 + $0x18] sm:$0xff] %vm806_vm3, %v4748_v59  ;;  %v1682_v35 = vmul.f32 %v4928_v36, %v5002_v23  ;;  %v1612_v59 = vadd.f32 %v4983_v6, %v1608_v14  ;;  %v1683_v3 = vadd.f32 %v1681_v41, %v1677_v44  ;;  %v5042_v48 = vmax.f32 %v1535_v22, 0.0 }
 0x180   : > { %6529 = vst [vmem:[#allocation51_spill] sm:$0xff] %v5022_v13  ;;  %6530 = vst [vmem:[#allocation54_spill] sm:$0xff] %v5025_v49  ;;  %v1751_v20 = vmul.f32 %v4573_v18, %v5022_v13  ;;  %v1752_v8 = vmul.f32 %v4576_v37, %v5022_v13  ;;  %v5044_v14 = vmax.f32 %v1536_v16, 0.0  ;;  %v5047_v7 = vstv %s4985_s0  ;;  %s5156_s0 = sld [smem:[#allocation10 + $0x85]] }
 0x181   : > { %v1684_v34 = vadd.f32 %v1682_v35, %v1678_v33  ;;  %6531 = vst [vmem:[#allocation56_spill] sm:$0xff] %v5042_v48  ;;  %v5050_v11 = vstv %s4989_s21  ;;  %v5056_v19 = vmax.f32 %v1611_v45, 0.0  ;;  %v1687_v18 = vadd.f32 %v5025_v49, %v1683_v3  ;;  %s5167_s21 = sld [smem:[#allocation10 + $0x182]] }
 0x182   : > { %6532 = vst [vmem:[#allocation58_spill] sm:$0xff] %v5044_v14  ;;  %6533 = vst [vmem:[#allocation60_spill] sm:$0xff] %v5050_v11  ;;  %v1753_v37 = vadd.f32 %v1751_v20, %v1747_v55  ;;  %v1754_v60 = vadd.f32 %v1752_v8, %v1748_v50  ;;  %v5061_v33 = vmax.f32 %v1612_v59, 0.0  ;;  %v1757_v46 = vmul.f32 %v4908_v52, %v5050_v11  ;;  %v5091_v8 = vld [vmem:[#allocation2 + $0x38] sm:$0x1] }
 0x183   : > { %6534 = vst [vmem:[#allocation55_spill] sm:$0xff] %v5056_v19  ;;  %v1688_v41 = vadd.f32 %v5025_v49, %v1684_v34  ;;  %v1758_v22 = vmul.f32 %v4928_v36, %v5050_v11  ;;  %v5073_v35 = vstv %s5010_s22  ;;  %v1541_v59 = vmul.f32 %v5034_v21, %v5042_v48  ;;  %s5171_s22 = sld [smem:[#allocation10 + $0x183]] }
 0x184   : > { %6535 = vst [vmem:[#allocation57_spill] sm:$0xff] %v5061_v33  ;;  %6536 = vst [vmem:[#allocation59_spill] sm:$0xff] %v5073_v35  ;;  %v1542_v3 = vmul.f32 %v5034_v21, %v5044_v14  ;;  %v1759_v34 = vadd.f32 %v1757_v46, %v1753_v37  ;;  %v1617_v50 = vmul.f32 %v5047_v7, %v5056_v19  ;;  %v5087_v20 = vmax.f32 %v1687_v18, 0.0 }
 0x185   : > { %v1760_v55 = vadd.f32 %v1758_v22, %v1754_v60  ;;  %v1618_v37 = vmul.f32 %v5047_v7, %v5061_v33  ;;  %v5095_v60 = vmax.f32 %v1688_v41, 0.0  ;;  %v5104_v18 = vstv %s5040_s24  ;;  %s5234_s24 = sld [smem:[#allocation10 + $0x6]] }
 0x186   : > { %v1375_v63 = vld [vmem:[#allocation2 + $0x18] sm:$0xff]  ;;  %v1376_v44 = vld [vmem:[#allocation2 + $0x28] sm:$0x7f]  ;;  %6537 = vst [vmem:[#allocation61_spill] sm:$0xff] %v5087_v20  ;;  %v5112_v22 = vstv %s5052_s11  ;;  %v5181_v51 = vstv %s5101_s12  ;;  %v5186_v56 = vstv %s5106_s27  ;;  %v5196_v11 = vstv %s5117_s14  ;;  %s5236_s11 = sld [smem:[#allocation10 + $0x86]]  ;;  %s5272_s12 = sld [smem:[#allocation10 + $0x87]] }
 0x187   : > { %v1381_v16 = vrot.slane %v1375_v63, 7  ;;  %v1383_v45 = vrot.slane %v1376_v44, 7  ;;  %1393 = vst.msk [vmem:[#allocation2 + $0x18] sm:$0xff] %vm806_vm3, %v4793_v15  ;;  %1394 = vst.msk [vmem:[#allocation2 + $0x28] sm:$0xff] %vm806_vm3, %v4827_v47  ;;  %v5098_v63 = vstv %s5027_s6  ;;  %v5108_v44 = vld [vmem:[#allocation2 + $0x38] sm:$0x1]  ;;  %v1764_v46 = vadd.f32 %v5073_v35, %v1760_v55 }
 0x188   : > { %6538 = vst [vmem:[#allocation62_spill] sm:$0xff] %v5095_v60  ;;  %6539 = vst [vmem:[#allocation63_spill] sm:$0xff] %v5098_v63  ;;  %v1620_v9 = vadd.f32 %v1618_v37, %v1542_v3  ;;  %v1694_v17 = vmul.f32 %v5098_v63, %v5095_v60  ;;  %v5146_v3 = vstv %s5075_s7  ;;  %v1548_v37 = vmul.f32 %v5104_v18, %v5044_v14  ;;  %s5188_s6 = sld [smem:[#allocation10 + $0x105]]  ;;  %s5262_s7 = sld [smem:[#allocation10 + $0x106]] }
 0x189   : > { %v1384_v15 = vsel %vm821_vm1, %v1381_v16, %v1383_v45  ;;  %v1382_v47 = vsel %vm821_vm1, %v1380_v1, %v1381_v16  ;;  %v1763_v1 = vadd.f32 %v5073_v35, %v1759_v34  ;;  %v5115_v16 = vstv %s5054_s2  ;;  %6543 = vst [vmem:[#allocation75_spill] sm:$0xff] %v5146_v3  ;;  %6545 = vst [vmem:[#allocation77_spill] sm:$0xff] %v5181_v51  ;;  %s5245_s2 = sld [smem:[#allocation10 + $0x185]]  ;;  %s5278_s27 = sld [smem:[#allocation10 + $0x8]] }
 0x18a   : > { %1387 = vrot.lane.b32.xlu1 %v1384_v15, %s3538_s8  ;;  %1385 = vrot.lane.b32.xlu0 %v1382_v47, %s3538_s8  ;;  %6540 = vst [vmem:[#allocation64_spill] sm:$0xff] %v5115_v16  ;;  %v1619_v45 = vadd.f32 %v1617_v50, %v1541_v59  ;;  %v1693_v34 = vmul.f32 %v5098_v63, %v5087_v20  ;;  %v5124_v15 = vld [vmem:[#allocation2 + $0x8] sm:$0x80]  ;;  %v5127_v47 = vstv %s5059_s29  ;;  %6546 = vst [vmem:[#allocation78_spill] sm:$0xff] %v5186_v56  ;;  %s5255_s29 = sld [smem:[#allocation10 + $0x7]]  ;;  %s5280_s14 = sld [smem:[#allocation10 + $0x88]] }
 0x18b   : > { %6541 = vst [vmem:[#allocation73_spill] sm:$0xff] %v5127_v47  ;;  %v5133_v31 = vmax.f32 %v1763_v1, 0.0  ;;  %v1547_v59 = vmul.f32 %v5104_v18, %v5042_v48  ;;  %v5137_v50 = vld [vmem:[#allocation2 + $0x8] sm:$0x80]  ;;  %v1553_v1 = vmul.f32 %v5112_v22, %v5042_v48  ;;  %v1623_v41 = vmul.f32 %v5115_v16, %v5056_v19  ;;  %6548 = vst [vmem:[#allocation80_spill] sm:$0xff] %v5196_v11 }
 0x18c   : > { %6542 = vst [vmem:[#allocation74_spill] sm:$0xff] %v5137_v50  ;;  %v1695_v40 = vadd.f32 %v1693_v34, %v1619_v45  ;;  %v1554_v43 = vmul.f32 %v5112_v22, %v5044_v14  ;;  %v1630_v10 = vmul.f32 %v5127_v47, %v5061_v33  ;;  %v1696_v45 = vadd.f32 %v1694_v17, %v1620_v9 }
 0x18d   : > { %v1769_v39 = vmul.f32 %v5146_v3, %v5133_v31  ;;  %v1625_v34 = vadd.f32 %v1623_v41, %v1547_v59  ;;  %v5193_v35 = vstv %s5119_s17  ;;  %v1559_v17 = vmul.f32 %v5181_v51, %v5042_v48  ;;  %s5286_s17 = sld [smem:[#allocation10 + $0x107]] }
 0x18e   : > { %v1396_v55 = vld [vmem:[#allocation2 + $0x18] sm:$0xff]  ;;  %v1398_v26 = vld [vmem:[#allocation2 + $0x28] sm:$0xff]  ;;  %6547 = vst [vmem:[#allocation79_spill] sm:$0xff] %v5193_v35  ;;  %v1635_v9 = vmul.f32 %v5193_v35, %v5056_v19  ;;  %v5203_v41 = vstv %s5129_s19  ;;  %v5260_v2 = vstv %s5188_s6  ;;  %s5315_s19 = sld [smem:[#allocation10 + $0x108]]  ;;  %s5646_s6 = sld [smem:[#allocation10 + $0x104]] }
 0x18f   : > { %1417 = vst.msk [vmem:[#allocation2 + $0x18] sm:$0xff] %vm806_vm3, %v4807_v12  ;;  %1405 = vrot.lane.b32.xlu1 %v1396_v55, %s3537_s10  ;;  %1418 = vst.msk [vmem:[#allocation2 + $0x28] sm:$0xff] %vm806_vm3, %v4829_v25  ;;  %1409 = vrot.lane.b32.xlu0 %v1398_v26, %s3537_s10  ;;  %v5158_v12 = vmax.f32 %v1764_v46, 0.0  ;;  %v1624_v25 = vmul.f32 %v5115_v16, %v5061_v33  ;;  %v1629_v26 = vmul.f32 %v5127_v47, %v5056_v19 }
 0x190   : > { %v5165_v55 = vstv %s5081_s16  ;;  %6549 = vst [vmem:[#allocation81_spill] sm:$0xff] %v5203_v41  ;;  %6553 = vst [vmem:[#allocation85_spill] sm:$0xff] %v5260_v2  ;;  %s5270_s16 = sld [smem:[#allocation10 + $0x186]] }
 0x191   : > { %6544 = vst [vmem:[#allocation76_spill] sm:$0xff] %v5165_v55  ;;  %v1699_v28 = vmul.f32 %v5165_v55, %v5087_v20  ;;  %v1770_v46 = vmul.f32 %v5146_v3, %v5158_v12  ;;  %v1626_v57 = vadd.f32 %v1624_v25, %v1548_v37  ;;  %v1631_v50 = vadd.f32 %v1629_v26, %v1553_v1 }
 0x192   : > { %v5205_v3 = vadd.f32 %v1769_v39, %v1695_v40  ;;  %v1632_v37 = vadd.f32 %v1630_v10, %v1554_v43  ;;  %v1700_v1 = vmul.f32 %v5165_v55, %v5095_v60  ;;  %v1705_v25 = vmul.f32 %v5186_v56, %v5087_v20 }
 0x193   : > { %v1701_v40 = vadd.f32 %v1699_v28, %v1625_v34  ;;  %v1706_v10 = vmul.f32 %v5186_v56, %v5095_v60  ;;  %v5220_v43 = vstv %s5154_s18  ;;  %v5223_v39 = vstv %s5156_s0  ;;  %s5322_s18 = sld [smem:[#allocation10 + $0x187]] }
 0x194   : > { %6550 = vst [vmem:[#allocation82_spill] sm:$0xff] %v5220_v43  ;;  %6551 = vst [vmem:[#allocation83_spill] sm:$0xff] %v5223_v39  ;;  %v1775_v26 = vmul.f32 %v5196_v11, %v5133_v31  ;;  %v1637_v28 = vadd.f32 %v1635_v9, %v1559_v17  ;;  %v1560_v34 = vmul.f32 %v5181_v51, %v5044_v14  ;;  %s5369_s0 = scalar_select %p2024_p12, 1, 0 }
 0x195   : > { %v1636_v56 = vmul.f32 %v5193_v35, %v5061_v33  ;;  %v1572_v55 = vmul.f32 %v5220_v43, %v5044_v14  ;;  %v1647_v13 = vmul.f32 %v5223_v39, %v5056_v19  ;;  %v1648_v17 = vmul.f32 %v5223_v39, %v5061_v33 }
 0x196   : > { %v1419_v59 = vld [vmem:[#allocation2 + $0x18] sm:$0xff]  ;;  %v1420_v63 = vld [vmem:[#allocation2 + $0x28] sm:$0xff]  ;;  %v1702_v9 = vadd.f32 %v1700_v1, %v1626_v57  ;;  %v1707_v51 = vadd.f32 %v1705_v25, %v1631_v50  ;;  %v5264_v49 = vadd.f32 %v1770_v46, %v1696_v45  ;;  %v5266_v47 = vadd.f32 %v1775_v26, %v1701_v40 }
 0x197   : > { %1431 = vst.msk [vmem:[#allocation2 + $0x18] sm:$0xff] %vm806_vm3, %v4843_v32  ;;  %1423 = vrot.lane.b32.xlu1 %v1419_v59, %s3538_s8  ;;  %1432 = vst.msk [vmem:[#allocation2 + $0x28] sm:$0xff] %vm806_vm3, %v4855_v29  ;;  %1425 = vrot.lane.b32.xlu0 %v1420_v63, %s3538_s8  ;;  %v1776_v32 = vmul.f32 %v5196_v11, %v5158_v12  ;;  %v5230_v59 = vstv %s5167_s21  ;;  %v1711_v29 = vmul.f32 %v5203_v41, %v5087_v20  ;;  %s5405_s21 = sld [smem:[#allocation10 + $0x188]] }
 0x198   : > { %v5239_v63 = vstv %s5171_s22  ;;  %v1571_v11 = vmul.f32 %v5220_v43, %v5042_v48  ;;  %v1781_v35 = vmul.f32 %v5230_v59, %v5133_v31  ;;  %v1708_v43 = vadd.f32 %v1706_v10, %v1632_v37  ;;  %s2026_s22 = scvt.s32.f32 %s5369_s0  ;;  %s3539_s0 = smov [#allocation16]  }
 0x199   : > { %6552 = vst [vmem:[#allocation84_spill] sm:$0xff] %v5239_v63  ;;  %v1782_v16 = vmul.f32 %v5230_v59, %v5158_v12  ;;  %v1713_v57 = vadd.f32 %v1711_v29, %v1637_v28  ;;  %v1787_v50 = vmul.f32 %v5239_v63, %v5133_v31  ;;  %v1638_v1 = vadd.f32 %v1636_v56, %v1560_v34 }
 0x19a   : > { %v1712_v25 = vmul.f32 %v5203_v41, %v5095_v60  ;;  %v1649_v37 = vadd.f32 %v1647_v13, %v1571_v11  ;;  %v1650_v40 = vadd.f32 %v1648_v17, %v1572_v55  ;;  %v1723_v10 = vmul.f32 %v5260_v2, %v5087_v20 }
 0x19b   : > { %v1724_v56 = vmul.f32 %v5260_v2, %v5095_v60  ;;  %v5292_v28 = vadd.f32 %v1776_v32, %v1702_v9  ;;  %v5294_v13 = vadd.f32 %v1781_v35, %v1707_v51  ;;  %v5296_v11 = vadd.f32 %v1782_v16, %v1708_v43  ;;  %v5381_v2 = vpop.permute.xlu1 %3160 }
 0x19c   : > { %v1788_v55 = vmul.f32 %v5239_v63, %v5158_v12  ;;  %v5301_v34 = vstv %s5234_s24  ;;  %v5304_v17 = vstv %s5236_s11  ;;  %v5310_v9 = vadd.f32 %v1787_v50, %v1713_v57  ;;  %v5379_v63 = vpop.permute.xlu0 %3165  ;;  %s5658_s24 = sld [smem:[#allocation3]]  ;;  %s5660_s11 = sld [smem:[#allocation10 + $0x184]] }
 0x19d   : > { %6554 = vst [vmem:[#allocation86_spill] sm:$0xff] %v5301_v34  ;;  %6555 = vst [vmem:[#allocation87_spill] sm:$0xff] %v5304_v17  ;;  %v5313_v51 = vstv %s5245_s2  ;;  %v1714_v35 = vadd.f32 %v1712_v25, %v1638_v1  ;;  %v1725_v16 = vadd.f32 %v1723_v10, %v1649_v37  ;;  %v5320_v43 = vstv %s5255_s29  ;;  %s5882_s2 = scalar_lea.vmem [#allocation16], %s4005_s26  ;;  %s6660_s26 = sld [smem:[#allocation29_spill]] }
 0x19e   : > { %v1434_v46 = vld [vmem:[#allocation2 + $0x18] sm:$0xfe]  ;;  %v1436_v45 = vld [vmem:[#allocation2 + $0x28] sm:$0xff]  ;;  %6557 = vst [vmem:[#allocation88_spill] sm:$0xff] %v5313_v51  ;;  %6558 = vst [vmem:[#allocation89_spill] sm:$0xff] %v5320_v43  ;;  %v1577_v57 = vmul.f32 %v5301_v34, %v5042_v48  ;;  %v1578_v50 = vmul.f32 %v5301_v34, %v5044_v14  ;;  %v1654_v1 = vmul.f32 %v5304_v17, %v5061_v33  ;;  %v5338_v37 = vstv %s5262_s7 }
 0x19f   : > { %v1449_v26 = vrot.slane %v1436_v45, 1  ;;  %1469 = vst.msk [vmem:[#allocation2 + $0x18] sm:$0xff] %vm806_vm3, %v4877_v38  ;;  %1470 = vst.msk [vmem:[#allocation2 + $0x28] sm:$0xff] %vm806_vm3, %v4879_v27  ;;  %v1448_v29 = vrot.slane %v1434_v46, 1  ;;  %v6556_v38 = vrot.slane %v5091_v8, 1  ;;  %v1726_v8 = vadd.f32 %v1724_v56, %v1650_v40 }
 0x1a0   : > { %v1653_v46 = vmul.f32 %v5304_v17, %v5056_v19  ;;  %v1799_v25 = vmul.f32 %v5313_v51, %v5133_v31  ;;  %v1800_v45 = vmul.f32 %v5313_v51, %v5158_v12  ;;  %6559 = vst [vmem:[#allocation90_spill] sm:$0xff] %v5338_v37  ;;  %v5341_v40 = vstv %s5272_s12  ;;  %6567 = vst [vmem:[#allocation98_spill] sm:$0xff] %v5379_v63 }
 0x1a1   : > { %v1454_v27 = vsel %vm937_vm2, %v1449_v26, %v6556_v38  ;;  %v1450_v32 = vsel %vm937_vm2, %v1448_v29, %v1449_v26  ;;  %6560 = vst [vmem:[#allocation91_spill] sm:$0xff] %v5341_v40  ;;  %v1583_v10 = vmul.f32 %v5320_v43, %v5042_v48  ;;  %v5346_v56 = vstv %s5278_s27 }
 0x1a2   : > { %1461 = vrot.lane.b32.xlu1 %v1454_v27, %s3537_s10  ;;  %1457 = vrot.lane.b32.xlu0 %v1450_v32, %s3537_s10  ;;  %6561 = vst [vmem:[#allocation92_spill] sm:$0xff] %v5346_v56  ;;  %v1659_v26 = vmul.f32 %v5341_v40, %v5056_v19  ;;  %v5351_v29 = vstv %s5280_s14  ;;  %v5358_v32 = vstv %s5270_s16  ;;  %v1584_v17 = vmul.f32 %v5320_v43, %v5044_v14  ;;  %s2548_s16 = sshll.u32 %s5882_s2, 4  ;;  %s6662_s14 = sld [smem:[#allocation112_spill]]  ;;  %s6148_s16 = int_to_ptr.vmem [resolvable:$true] %s2548_s16 }
 0x1a3   : > { %6562 = vst [vmem:[#allocation93_spill] sm:$0xff] %v5351_v29  ;;  %6565 = vst [vmem:[#allocation96_spill] sm:$0xff] %v5358_v32  ;;  %v1660_v34 = vmul.f32 %v5341_v40, %v5061_v33  ;;  %v5365_v51 = vstv %s5286_s17  ;;  %v1729_v43 = vmul.f32 %v5338_v37, %v5087_v20  ;;  %v1730_v40 = vmul.f32 %v5338_v37, %v5095_v60 }
 0x1a4   : > { %6566 = vst [vmem:[#allocation97_spill] sm:$0xff] %v5365_v51  ;;  %v1735_v63 = vmul.f32 %v5365_v51, %v5087_v20  ;;  %v5396_v37 = vstv %s5315_s19 }
 0x1a5   : > { %6568 = vst [vmem:[#allocation99_spill] sm:$0xff] %v5396_v37 }
 0x1a6   : > { %v5353_v38 = vld [vmem:[#allocation2 + $0x18] sm:$0xfe]  ;;  %v5355_v27 = vld [vmem:[#allocation2 + $0x28] sm:$0xff] }
 0x1a7   : > { %6563 = vst [vmem:[#allocation94_spill] sm:$0xff] %v5353_v38  ;;  %6564 = vst [vmem:[#allocation95_spill] sm:$0xff] %v5355_v27  ;;  %v1655_v38 = vadd.f32 %v1653_v46, %v1577_v57  ;;  %v1656_v27 = vadd.f32 %v1654_v1, %v1578_v50  ;;  %v1665_v57 = vmul.f32 %v5351_v29, %v5056_v19 }
 0x1a8   : > { %1486 = vst.msk [vmem:[#allocation2 + $0x18] sm:$0xff] %vm806_vm3, %v4903_v4  ;;  %1487 = vst.msk [vmem:[#allocation2 + $0x28] sm:$0xff] %vm806_vm3, %v4905_v30  ;;  %v1589_v4 = vmul.f32 %v5346_v56, %v5042_v48  ;;  %v1590_v30 = vmul.f32 %v5346_v56, %v5044_v14  ;;  %v1666_v50 = vmul.f32 %v5351_v29, %v5061_v33  ;;  %v5403_v56 = vstv %s5322_s18  ;;  %s6663_s17 = smov %s6662_s14  ;;  %s3360_s18 = scalar_lea.vmem %s6148_s16, 1024 }
 0x1a9   : > { %v5391_v46 = vadd.f32 %v1788_v55, %v1714_v35  ;;  %v1661_v1 = vadd.f32 %v1659_v26, %v1583_v10  ;;  %v5398_v48 = vadd.f32 %v1799_v25, %v1725_v16  ;;  %v1662_v14 = vadd.f32 %v1660_v34, %v1584_v17  ;;  %6570 = vst [vmem:[#allocation101_spill] sm:$0xff] %v5403_v56  ;;  %v5421_v17 = vld [vmem:[%s4008_s5 + $0x20] sm:$0xff]  ;;  %v5424_v16 = vld [vmem:[%s4008_s5 + $0x28] sm:$0xff]  ;;  %p3361_p6 = scmp.ne.s32.totalorder %s6148_s16, %s3360_s18 }
 0x1aa   : > { %v1736_v19 = vmul.f32 %v5365_v51, %v5095_v60  ;;  %v5408_v55 = vadd.f32 %v1800_v45, %v1726_v8  ;;  %v5410_v35 = vadd.f32 %v1729_v43, %v1655_v38  ;;  %v5414_v10 = vmul.f32 %v5358_v32, %v5133_v31  ;;  %v2022_v45 = vld [vmem:[%s422_s20] sm:$0xff]  ;;  %v2023_v38 = vld [vmem:[%s422_s20 + $0x8] sm:$0xff]  ;;  %s5631_s20 = sld [smem:[#allocation10 + $0x84]] }
 0x1ab   : > { %6569 = vst [vmem:[#allocation100_spill] sm:$0xff] %v5398_v48  ;;  %v5418_v34 = vmul.f32 %v5358_v32, %v5158_v12  ;;  %v5426_v25 = vadd.f32 %v1730_v40, %v1656_v27  ;;  %v5428_v26 = vadd.f32 %v1665_v57, %v1589_v4  ;;  %v5430_v8 = vadd.f32 %v1666_v50, %v1590_v30  ;;  %v5454_v4 = vpop.permute.xlu1 %3180  ;;  %v5456_v30 = vpop.permute.xlu0 %3170 }
 0x1ac   : > { %v5434_v43 = vmul.f32 %v5396_v37, %v5087_v20  ;;  %v5440_v33 = vadd.f32 %v1735_v63, %v1661_v1  ;;  %v5444_v51 = vmul.f32 %v5396_v37, %v5095_v60  ;;  %v5448_v40 = vmul.f32 %v5403_v56, %v5133_v31  ;;  %6571 = vst [vmem:[#allocation102_spill] sm:$0xff] %v5454_v4 }
 0x1ad   : > { %v5452_v27 = vmul.f32 %v5403_v56, %v5158_v12  ;;  %v5458_v63 = vadd.f32 %v1736_v19, %v1662_v14  ;;  %v2027_v1 = vstv %s2026_s22  ;;  %v2032_v60 = vmul.f32 %v5421_v17, %v4896_v24 }
 0x1ae   : > { %v2033_v20 = vmul.f32 %v5424_v16, %v4896_v24  ;;  %v5468_v4 = vmul.f32 %v2027_v1, %v2022_v45  ;;  %v5470_v14 = vmul.f32 %v2027_v1, %v2023_v38  ;;  %v2036_v19 = vmul.f32 %v4908_v52, %v4899_v0 }
 0x1af   : > { %v1489_v57 = vld [vmem:[#allocation2 + $0x28] sm:$0xff]  ;;  %v1488_v50 = vld [vmem:[#allocation2 + $0x18] sm:$0xfe]  ;;  %v2037_v29 = vmul.f32 %v4928_v36, %v4899_v0  ;;  %v2108_v24 = vmul.f32 %v5421_v17, %v4931_v58  ;;  %v5491_v0 = vstv %s5405_s21  ;;  %v2188_v32 = vmul.f32 %v4908_v52, %v4980_v5  ;;  %s3364_s21 = sshll.u32 %s3539_s0, 4  ;;  %s3365_s21 = int_to_ptr.vmem [resolvable:$false] %s3364_s21 }
 0x1b0   : > { %v1495_v37 = vrot.slane %v1489_v57, 1  ;;  %1826 = vst.msk [vmem:[#allocation2 + $0x28] sm:$0xff] %vm806_vm3, %v5264_v49  ;;  %v1494_v56 = vrot.slane %v1488_v50, 1  ;;  %1825 = vst.msk [vmem:[#allocation2 + $0x18] sm:$0xff] %vm806_vm3, %v5205_v3  ;;  %v2109_v49 = vmul.f32 %v5424_v16, %v4931_v58  ;;  %v6572_v57 = vrot.slane %v5108_v44, 1  ;;  %s3366_s22 = scalar_lea.vmem %s3365_s21, 2048  ;;  %p3367_p11 = scmp.lt.s32.totalorder %s6148_s16, %s3365_s21 }
 0x1b1   : > { %v2042_v38 = vmul.f32 %v5468_v4, %v4923_v54  ;;  %v2043_v50 = vmul.f32 %v5470_v14, %v4923_v54  ;;  %v2038_v1 = vadd.f32 %v2036_v19, %v2032_v60  ;;  %v2039_v58 = vadd.f32 %v2037_v29, %v2033_v20  ;;  %p3368_p3 = scmp.lt.s32.totalorder %s3366_s22, %s3360_s18 }
 0x1b2   : > { %v1498_v3 = vsel %vm937_vm2, %v1495_v37, %v6572_v57  ;;  %v1496_v45 = vsel %vm937_vm2, %v1494_v56, %v1495_v37  ;;  %v2112_v44 = vmul.f32 %v4908_v52, %v4946_v42  ;;  %v2113_v37 = vmul.f32 %v4928_v36, %v4946_v42 }
 0x1b3   : > { %1501 = vrot.lane.b32.xlu1 %v1498_v3, %s3538_s8  ;;  %1499 = vrot.lane.b32.xlu0 %v1496_v45, %s3538_s8  ;;  %v2118_v56 = vmul.f32 %v5468_v4, %v4949_v53  ;;  %v2119_v54 = vmul.f32 %v5470_v14, %v4949_v53  ;;  %v2184_v57 = vmul.f32 %v5421_v17, %v4977_v61  ;;  %v5503_v3 = vpop.permute.xlu1 %3185  ;;  %v5505_v45 = vpop.permute.xlu0 %3175  ;;  %p3369_p10 = por %p3368_p3, %p3367_p11 }
 0x1b4   : > { %6573 = vst [vmem:[#allocation103_spill] sm:$0xff] %v5503_v3  ;;  %v2044_v20 = vadd.f32 %v2042_v38, %v2038_v1  ;;  %v2045_v60 = vadd.f32 %v2043_v50, %v2039_v58  ;;  %v2114_v29 = vadd.f32 %v2112_v44, %v2108_v24  ;;  %v2185_v19 = vmul.f32 %v5424_v16, %v4977_v61 }
 0x1b5   : > { %v2115_v42 = vadd.f32 %v2113_v37, %v2109_v49  ;;  %v2189_v53 = vmul.f32 %v4928_v36, %v4980_v5  ;;  %v2194_v41 = vmul.f32 %v5468_v4, %v5002_v23  ;;  %v2195_v61 = vmul.f32 %v5470_v14, %v5002_v23 }
 0x1b6   : > { %v2048_v48 = vadd.f32 %v2044_v20, %v4970_v62  ;;  %v2049_v38 = vadd.f32 %v2045_v60, %v4970_v62  ;;  %v2120_v24 = vadd.f32 %v2118_v56, %v2114_v29  ;;  %v2190_v1 = vadd.f32 %v2188_v32, %v2184_v57 }
 0x1b7   : > { %v1830_v39 = vld [vmem:[#allocation2 + $0x18] sm:$0xff]  ;;  %v1832_v3 = vld [vmem:[#allocation2 + $0x28] sm:$0x7f]  ;;  %v2121_v5 = vadd.f32 %v2119_v54, %v2115_v42  ;;  %v2191_v37 = vadd.f32 %v2189_v53, %v2185_v19  ;;  %v6574_v56 = vrot.slane %v5124_v15, 7  ;;  %v5533_v20 = vpop.permute.xlu1 %3195 }
 0x1b8   : > { %v1843_v49 = vrot.slane %v1830_v39, 7  ;;  %v1847_v50 = vrot.slane %v1832_v3, 7  ;;  %1864 = vst.msk [vmem:[#allocation2 + $0x28] sm:$0xff] %vm806_vm3, %v5292_v28  ;;  %1863 = vst.msk [vmem:[#allocation2 + $0x18] sm:$0xff] %vm806_vm3, %v5266_v47  ;;  %v5523_v58 = vmax.f32 %v2048_v48, 0.0  ;;  %v5525_v44 = vmax.f32 %v2049_v38, 0.0  ;;  %v5535_v47 = vpop.permute.xlu0 %3190 }
 0x1b9   : > { %v2124_v62 = vadd.f32 %v2120_v24, %v4983_v6  ;;  %v2125_v28 = vadd.f32 %v2121_v5, %v4983_v6  ;;  %v2196_v3 = vadd.f32 %v2194_v41, %v2190_v1  ;;  %6575 = vst [vmem:[#allocation104_spill] sm:$0xff] %v5533_v20  ;;  %6576 = vst [vmem:[#allocation105_spill] sm:$0xff] %v5535_v47  ;;  %v6578_v42 = vld [vmem:[#allocation73_spill] sm:$0xff]  ;;  %v6607_v20 = vld [vmem:[#allocation82_spill] sm:$0xff] }
 0x1ba   : > { %v1844_v23 = vsel %vm821_vm1, %v6574_v56, %v1843_v49  ;;  %v1848_v39 = vsel %vm821_vm1, %v1843_v49, %v1847_v50  ;;  %v2054_v48 = vmul.f32 %v5523_v58, %v5034_v21  ;;  %v2055_v15 = vmul.f32 %v5525_v44, %v5034_v21  ;;  %v6577_v21 = vld [vmem:[#allocation64_spill] sm:$0xff]  ;;  %v6579_v49 = vld [vmem:[#allocation54_spill] sm:$0xff] }
 0x1bb   : > { %1851 = vrot.lane.b32.xlu1 %v1844_v23, %s3537_s10  ;;  %1855 = vrot.lane.b32.xlu0 %v1848_v39, %s3537_s10  ;;  %v2060_v32 = vmul.f32 %v5523_v58, %v5104_v18  ;;  %v5545_v54 = vmax.f32 %v2124_v62, 0.0  ;;  %v2061_v6 = vmul.f32 %v5525_v44, %v5104_v18  ;;  %v2066_v41 = vmul.f32 %v5523_v58, %v5112_v22 }
 0x1bc   : > { %v2067_v57 = vmul.f32 %v5525_v44, %v5112_v22  ;;  %v5553_v60 = vmax.f32 %v2125_v28, 0.0  ;;  %v2197_v38 = vadd.f32 %v2195_v61, %v2191_v37  ;;  %v2200_v50 = vadd.f32 %v2196_v3, %v6579_v49  ;;  %v5579_v3 = vpop.permute.xlu1 %3205 }
 0x1bd   : > { %v2130_v29 = vmul.f32 %v5545_v54, %v5047_v7  ;;  %v2136_v19 = vmul.f32 %v5545_v54, %v6577_v21  ;;  %v2142_v53 = vmul.f32 %v5545_v54, %v6578_v42  ;;  %6580 = vst [vmem:[#allocation64_spill] sm:$0xff] %v5579_v3  ;;  %v6606_v3 = vld [vmem:[#allocation77_spill] sm:$0xff] }
 0x1be   : > { %v2131_v18 = vmul.f32 %v5553_v60, %v5047_v7  ;;  %v2137_v24 = vmul.f32 %v5553_v60, %v6577_v21  ;;  %v2143_v22 = vmul.f32 %v5553_v60, %v6578_v42  ;;  %v2201_v61 = vadd.f32 %v2197_v38, %v6579_v49  ;;  %v5581_v21 = vpop.permute.xlu0 %3200  ;;  %v6586_v42 = vld [vmem:[#allocation78_spill] sm:$0xff] }
 0x1bf   : > { %v5568_v5 = vld [vmem:[#allocation2 + $0x28] sm:$0x7f]  ;;  %v5570_v1 = vld [vmem:[#allocation2 + $0x18] sm:$0xff]  ;;  %v2132_v62 = vadd.f32 %v2130_v29, %v2054_v48  ;;  %v2138_v56 = vadd.f32 %v2136_v19, %v2060_v32  ;;  %v2144_v23 = vadd.f32 %v2142_v53, %v2066_v41  ;;  %v5577_v28 = vmax.f32 %v2200_v50, 0.0  ;;  %6581 = vst [vmem:[#allocation73_spill] sm:$0xff] %v5581_v21  ;;  %v6582_v32 = vld [vmem:[#allocation50_spill] sm:$0xff] }
 0x1c0   : > { %1881 = vst.msk [vmem:[#allocation2 + $0x28] sm:$0xff] %vm806_vm3, %v5296_v11  ;;  %1880 = vst.msk [vmem:[#allocation2 + $0x18] sm:$0xff] %vm806_vm3, %v5294_v13  ;;  %v2133_v7 = vadd.f32 %v2131_v18, %v2055_v15  ;;  %v2139_v37 = vadd.f32 %v2137_v24, %v2061_v6  ;;  %v2145_v39 = vadd.f32 %v2143_v22, %v2067_v57  ;;  %v5583_v48 = vmax.f32 %v2201_v61, 0.0  ;;  %v6583_v29 = vld [vmem:[#allocation51_spill] sm:$0xff]  ;;  %v6585_v57 = vld [vmem:[#allocation76_spill] sm:$0xff] }
 0x1c1   : > { %v2260_v41 = vmul.f32 %v5421_v17, %v6582_v32  ;;  %v2261_v11 = vmul.f32 %v5424_v16, %v6582_v32  ;;  %v2264_v13 = vmul.f32 %v4908_v52, %v6583_v29  ;;  %v6584_v15 = vld [vmem:[#allocation63_spill] sm:$0xff]  ;;  %v2212_v19 = vmul.f32 %v5577_v28, %v6585_v57  ;;  %v5607_v61 = vld [vmem:[#allocation2 + $0x38] sm:$0x1] }
 0x1c2   : > { %v2206_v6 = vmul.f32 %v5577_v28, %v6584_v15  ;;  %v2218_v53 = vmul.f32 %v5577_v28, %v6586_v42  ;;  %v2265_v38 = vmul.f32 %v4928_v36, %v6583_v29  ;;  %v2207_v17 = vmul.f32 %v5583_v48, %v6584_v15  ;;  %v6587_v15 = vld [vmem:[#allocation60_spill] sm:$0xff] }
 0x1c3   : > { %v2213_v16 = vmul.f32 %v5583_v48, %v6585_v57  ;;  %v2219_v52 = vmul.f32 %v5583_v48, %v6586_v42  ;;  %v2266_v18 = vadd.f32 %v2264_v13, %v2260_v41  ;;  %v2214_v22 = vadd.f32 %v2212_v19, %v2138_v56  ;;  %v6591_v19 = vld [vmem:[#allocation74_spill] sm:$0xff] }
 0x1c4   : > { %v2208_v24 = vadd.f32 %v2206_v6, %v2132_v62  ;;  %v2220_v49 = vadd.f32 %v2218_v53, %v2144_v23  ;;  %v2267_v50 = vadd.f32 %v2265_v38, %v2261_v11  ;;  %v5609_v32 = vadd.f32 %v2207_v17, %v2133_v7  ;;  %v5627_v7 = vpop.permute.xlu1 %3215 }
 0x1c5   : > { %v5611_v36 = vadd.f32 %v2213_v16, %v2139_v37  ;;  %v5613_v29 = vadd.f32 %v2219_v52, %v2145_v39  ;;  %v2270_v57 = vmul.f32 %v5468_v4, %v6587_v15  ;;  %v5619_v41 = vadd.f32 %v5414_v10, %v5410_v35  ;;  %6588 = vst [vmem:[#allocation54_spill] sm:$0xff] %v5627_v7  ;;  %v5629_v37 = vpop.permute.xlu0 %3210 }
 0x1c6   : > { %v1743_v62 = vadd.f32 %v5434_v43, %v5428_v26  ;;  %v1817_v56 = vmul.f32 %v5491_v0, %v5133_v31  ;;  %v2271_v23 = vmul.f32 %v5470_v14, %v6587_v15  ;;  %6589 = vst [vmem:[#allocation50_spill] sm:$0xff] %v5629_v37  ;;  %v5635_v35 = vadd.f32 %v5418_v34, %v5426_v25 }
 0x1c7   : > { %v1883_v4 = vld [vmem:[#allocation2 + $0x18] sm:$0xff]  ;;  %v1884_v39 = vld [vmem:[#allocation2 + $0x28] sm:$0x7f]  ;;  %v1744_v10 = vadd.f32 %v5444_v51, %v5430_v8  ;;  %v1818_v26 = vmul.f32 %v5491_v0, %v5158_v12  ;;  %v2272_v43 = vadd.f32 %v2270_v57, %v2266_v18  ;;  %v5650_v51 = vadd.f32 %v5448_v40, %v5440_v33  ;;  %v6603_v18 = vld [vmem:[#allocation52_spill] sm:$0xff] }
 0x1c8   : > { %v1889_v14 = vrot.slane %v1883_v4, 7  ;;  %v1891_v11 = vrot.slane %v1884_v39, 7  ;;  %1901 = vst.msk [vmem:[#allocation2 + $0x18] sm:$0xff] %vm806_vm3, %v5310_v9  ;;  %1902 = vst.msk [vmem:[#allocation2 + $0x28] sm:$0xff] %vm806_vm3, %v5391_v46  ;;  %v2273_v6 = vadd.f32 %v2271_v23, %v2267_v50  ;;  %v5654_v34 = vadd.f32 %v5452_v27, %v5458_v63  ;;  %v6590_v8 = vld [vmem:[#allocation59_spill] sm:$0xff]  ;;  %v839_v15 = vpop.permute.xlu1 %838  ;;  %v6594_v23 = vld [vmem:[#allocation80_spill] sm:$0xff] }
 0x1c9   : > { %v2276_v9 = vadd.f32 %v2272_v43, %v6590_v8  ;;  %v6592_v42 = vrot.slane %v6591_v19, 7  ;;  %v5666_v40 = vadd.f32 %v1817_v56, %v1743_v62  ;;  %v5671_v63 = vadd.f32 %v1818_v26, %v1744_v10  ;;  %v835_v57 = vpop.permute.xlu0 %834  ;;  %v6593_v62 = vld [vmem:[#allocation75_spill] sm:$0xff] }
 0x1ca   : > { %v1892_v46 = vsel %vm821_vm1, %v1889_v14, %v1891_v11  ;;  %v2277_v27 = vadd.f32 %v2273_v6, %v6590_v8  ;;  %v3173_v38 = vunpack.i.h.bf16 %v5456_v30  ;;  %v3172_v16 = vunpack.i.l.bf16 %v5456_v30  ;;  %v6595_v10 = vld [vmem:[#allocation39_spill] sm:$0xff] }
 0x1cb   : > { %v1890_v33 = vsel %vm821_vm1, %v6592_v42, %v1889_v14  ;;  %1895 = vrot.lane.b32.xlu1 %v1892_v46, %s3538_s8  ;;  %v5675_v17 = vmax.f32 %v2276_v9, 0.0  ;;  %v5682_v50 = vstv %s5605_s23  ;;  %v5699_v11 = vstv %s5631_s20  ;;  %v6596_v42 = vld [vmem:[#allocation43_spill] sm:$0xff] }
 0x1cc   : > { %1893 = vrot.lane.b32.xlu0 %v1890_v33, %s3538_s8  ;;  %v5678_v52 = vmax.f32 %v2277_v27, 0.0  ;;  %v546_v30 = vmul.f32 %v5682_v50, %v6595_v10  ;;  %v622_v33 = vmul.f32 %v5699_v11, %v6596_v42  ;;  %v5725_v27 = vstv %s5646_s6  ;;  %v3219_v10 = vld [vmem:[%s4008_s5 + $0x8] sm:$0xff] }
 0x1cd   : > { %v2282_v56 = vmul.f32 %v5675_v17, %v6593_v62  ;;  %v2288_v4 = vmul.f32 %v5675_v17, %v6594_v23  ;;  %v2294_v39 = vmul.f32 %v5675_v17, %v5230_v59  ;;  %v841_v53 = vsel %vm840_vm4, %v3172_v16, %v835_v57 }
 0x1ce   : > { %v2283_v26 = vmul.f32 %v5678_v52, %v6593_v62  ;;  %v2289_v43 = vmul.f32 %v5678_v52, %v6594_v23  ;;  %v2295_v14 = vmul.f32 %v5678_v52, %v5230_v59  ;;  %v6597_v59 = vld [vmem:[#allocation100_spill] sm:$0xff]  ;;  %v624_v62 = vadd.f32 %v622_v33, %v546_v30  ;;  %v880_v30 = vpop.permute.xlu0 %879  ;;  %v6601_v33 = vld [vmem:[#allocation42_spill] sm:$0xff] }
 0x1cf   : > { %v1904_v6 = vld [vmem:[#allocation2 + $0x18] sm:$0xff]  ;;  %v1906_v8 = vld [vmem:[#allocation2 + $0x28] sm:$0xff]  ;;  %v5701_v9 = vadd.f32 %v2282_v56, %v2208_v24  ;;  %v5703_v46 = vadd.f32 %v2288_v4, %v2214_v22  ;;  %v5705_v19 = vadd.f32 %v2294_v39, %v2220_v49  ;;  %v5730_v23 = vstv %s5660_s11 }
 0x1d0   : > { %1913 = vrot.lane.b32.xlu1 %v1904_v6, %s3537_s10  ;;  %1926 = vst.msk [vmem:[#allocation2 + $0x28] sm:$0xff] %vm806_vm3, %v5408_v55  ;;  %1917 = vrot.lane.b32.xlu0 %v1906_v8, %s3537_s10  ;;  %1925 = vst.msk [vmem:[#allocation2 + $0x18] sm:$0xff] %vm806_vm3, %v6597_v59  ;;  %v5716_v24 = vadd.f32 %v2283_v26, %v5609_v32  ;;  %v5719_v22 = vadd.f32 %v2289_v43, %v5611_v36  ;;  %v6598_v56 = vld [vmem:[#allocation47_spill] sm:$0xff]  ;;  %v5733_v4 = vstv %s5658_s24  ;;  %v6599_v39 = vld [vmem:[#allocation53_spill] sm:$0xff]  ;;  %v5740_v43 = vpop.permute.xlu1 %877 }
 0x1d1   : > { %v5722_v49 = vadd.f32 %v2295_v14, %v5613_v29  ;;  %v698_v55 = vmul.f32 %v5725_v27, %v6598_v56  ;;  %v774_v36 = vmul.f32 %v5730_v23, %v6599_v39  ;;  %v803_v29 = vadd.f32 %v3219_v10, %v5733_v4  ;;  %v849_v26 = vld [vmem:[#allocation2 + $0x8] sm:$0x80]  ;;  %v6600_v8 = vld [vmem:[#allocation38_spill] sm:$0xff] }
 0x1d2   : > { %v842_v6 = vsel %vm840_vm4, %v3173_v38, %v839_v15  ;;  %v545_v42 = vmul.f32 %v5682_v50, %v6600_v8  ;;  %v621_v59 = vmul.f32 %v5699_v11, %v6601_v33  ;;  %v6602_v56 = vld [vmem:[#allocation46_spill] sm:$0xff]  ;;  %v773_v10 = vmul.f32 %v5730_v23, %v6603_v18  ;;  %v6604_v15 = vld [vmem:[#allocation65_spill] sm:$0xff] }
 0x1d3   : > { %v700_v14 = vadd.f32 %v698_v55, %v624_v62  ;;  %v697_v39 = vmul.f32 %v5725_v27, %v6602_v56  ;;  %v3220_v32 = vld [vmem:[%s4008_s5] sm:$0xff]  ;;  %v855_v38 = vrot.slane %v849_v26, 7  ;;  %v856_v25 = vrot.slane %v6604_v15, 7  ;;  %v6608_v26 = vld [vmem:[#allocation79_spill] sm:$0xff] }
 0x1d4   : > { %v802_v13 = vadd.f32 %v3220_v32, %v5733_v4  ;;  %v623_v55 = vadd.f32 %v621_v59, %v545_v42  ;;  %v6605_v8 = vld [vmem:[#allocation66_spill] sm:$0xff]  ;;  %v2072_v33 = vmul.f32 %v5523_v58, %v6606_v3  ;;  %v2073_v56 = vmul.f32 %v5525_v44, %v6606_v3  ;;  %v902_v42 = vpop.permute.xlu1 %901  ;;  %v6609_v59 = vld [vmem:[#allocation41_spill] sm:$0xff] }
 0x1d5   : > { %v776_v62 = vadd.f32 %v774_v36, %v700_v14  ;;  %v858_v7 = vrot.slane %v6605_v8, 7  ;;  %v2084_v18 = vmul.f32 %v5523_v58, %v6607_v20  ;;  %v857_v57 = vsel %vm821_vm1, %v855_v38, %v856_v25 }
 0x1d6   : > { %v699_v16 = vadd.f32 %v697_v39, %v623_v55  ;;  %v2085_v36 = vmul.f32 %v5525_v44, %v6607_v20  ;;  %v2149_v14 = vmul.f32 %v5553_v60, %v6608_v26  ;;  %v898_v20 = vpop.permute.xlu0 %897 }
 0x1d7   : > { %v1928_v37 = vld [vmem:[#allocation2 + $0x28] sm:$0xff]  ;;  %v1927_v32 = vld [vmem:[#allocation2 + $0x18] sm:$0xff]  ;;  %v805_v21 = vadd.f32 %v803_v29, %v776_v62  ;;  %v859_v3 = vsel %vm821_vm1, %v856_v25, %v858_v7  ;;  %v2148_v29 = vmul.f32 %v5545_v54, %v6608_v26 }
 0x1d8   : > { %1940 = vst.msk [vmem:[#allocation2 + $0x28] sm:$0xff] %vm806_vm3, %v5635_v35  ;;  %1933 = vrot.lane.b32.xlu1 %v1928_v37, %s3538_s8  ;;  %1939 = vst.msk [vmem:[#allocation2 + $0x18] sm:$0xff] %vm806_vm3, %v5619_v41  ;;  %1931 = vrot.lane.b32.xlu0 %v1927_v32, %s3538_s8  ;;  %v775_v62 = vadd.f32 %v773_v10, %v699_v16  ;;  %v6610_v37 = vld [vmem:[#allocation83_spill] sm:$0xff]  ;;  %v2151_v7 = vadd.f32 %v2149_v14, %v2073_v56  ;;  %v6611_v25 = vld [vmem:[#allocation81_spill] sm:$0xff] }
 0x1d9   : > { %v846_v35 = vadd.f32 %v842_v6, %v805_v21  ;;  %v2160_v55 = vmul.f32 %v5545_v54, %v6610_v37  ;;  %v2161_v41 = vmul.f32 %v5553_v60, %v6610_v37  ;;  %v2150_v38 = vadd.f32 %v2148_v29, %v2072_v33  ;;  %v6612_v10 = vld [vmem:[#allocation85_spill] sm:$0xff]  ;;  %v6613_v29 = vld [vmem:[#allocation84_spill] sm:$0xff] }
 0x1da   : > { %v2224_v15 = vmul.f32 %v5577_v28, %v6611_v25  ;;  %v2225_v8 = vmul.f32 %v5583_v48, %v6611_v25  ;;  %v804_v32 = vadd.f32 %v802_v13, %v775_v62  ;;  %v2236_v16 = vmul.f32 %v5577_v28, %v6612_v10  ;;  %v918_v62 = vpop.permute.xlu1 %917 }
 0x1db   : > { %v863_v26 = vadd.f32 %v859_v3, %v846_v35  ;;  %v2162_v47 = vadd.f32 %v2160_v55, %v2084_v18  ;;  %v2163_v39 = vadd.f32 %v2161_v41, %v2085_v36  ;;  %v2237_v37 = vmul.f32 %v5583_v48, %v6612_v10  ;;  %v6614_v18 = vld [vmem:[#allocation88_spill] sm:$0xff]  ;;  %v916_v55 = vpop.permute.xlu0 %915 }
 0x1dc   : > { %v2226_v21 = vadd.f32 %v2224_v15, %v2150_v38  ;;  %v2227_v6 = vadd.f32 %v2225_v8, %v2151_v7  ;;  %v845_v33 = vadd.f32 %v841_v53, %v804_v32  ;;  %v2300_v14 = vmul.f32 %v5675_v17, %v6613_v29 }
 0x1dd   : > { %v884_v56 = vadd.f32 %v880_v30, %v863_v26  ;;  %v2301_v25 = vmul.f32 %v5678_v52, %v6613_v29  ;;  %v2238_v13 = vadd.f32 %v2236_v16, %v2162_v47  ;;  %v2239_v3 = vadd.f32 %v2237_v37, %v2163_v39  ;;  %v6619_v29 = vld [vmem:[#allocation87_spill] sm:$0xff] }
 0x1de   : > { %v2312_v36 = vmul.f32 %v5675_v17, %v6614_v18  ;;  %v2313_v35 = vmul.f32 %v5678_v52, %v6614_v18  ;;  %v862_v53 = vadd.f32 %v857_v57, %v845_v33  ;;  %v5797_v30 = vadd.f32 %v2300_v14, %v2226_v21  ;;  %v6620_v14 = vld [vmem:[#allocation49_spill] sm:$0xff] }
 0x1df   : > { %v1942_v41 = vld [vmem:[#allocation2 + $0x18] sm:$0xfe]  ;;  %v1944_v38 = vld [vmem:[#allocation2 + $0x28] sm:$0xff]  ;;  %v5799_v7 = vadd.f32 %v2301_v25, %v2227_v6  ;;  %v6615_v15 = vunpack.i.h.bf16 %v5381_v2  ;;  %v6616_v21 = vunpack.i.l.bf16 %v5381_v2  ;;  %v971_v25 = vrot.slane %v6620_v14, 1 }
 0x1e0   : > { %v1956_v39 = vrot.slane %v1942_v41, 1  ;;  %v1957_v8 = vrot.slane %v1944_v38, 1  ;;  %1977 = vst.msk [vmem:[#allocation2 + $0x18] sm:$0xff] %vm806_vm3, %v5650_v51  ;;  %1978 = vst.msk [vmem:[#allocation2 + $0x28] sm:$0xff] %vm806_vm3, %v5654_v34  ;;  %v5808_v32 = vadd.f32 %v2312_v36, %v2238_v13  ;;  %v5810_v26 = vadd.f32 %v2313_v35, %v2239_v3  ;;  %v6621_v3 = vld [vmem:[#allocation90_spill] sm:$0xff]  ;;  %v6622_v35 = vld [vmem:[#allocation96_spill] sm:$0xff]  ;;  %v951_v38 = vpop.permute.xlu1 %950 }
 0x1e1   : > { %v904_v47 = vsel %vm840_vm4, %v6615_v15, %v902_v42  ;;  %v883_v57 = vadd.f32 %v5740_v43, %v862_v53  ;;  %v903_v6 = vsel %vm840_vm4, %v6616_v21, %v898_v20  ;;  %v6617_v42 = vld [vmem:[#allocation86_spill] sm:$0xff]  ;;  %v6618_v51 = vrot.slane %v5607_v61, 1  ;;  %v966_v61 = vld [vmem:[#allocation2 + $0x38] sm:$0x1]  ;;  %v955_v53 = vpop.permute.xlu0 %954 }
 0x1e2   : > { %v908_v10 = vadd.f32 %v904_v47, %v884_v56  ;;  %v2090_v16 = vmul.f32 %v5523_v58, %v6617_v42  ;;  %v1958_v37 = vsel %vm937_vm2, %v1956_v39, %v1957_v8  ;;  %v2091_v33 = vmul.f32 %v5525_v44, %v6617_v42 }
 0x1e3   : > { %v1962_v34 = vsel %vm937_vm2, %v1957_v8, %v6618_v51  ;;  %v2166_v43 = vmul.f32 %v5545_v54, %v6619_v29  ;;  %1965 = vrot.lane.b32.xlu1 %v1958_v37, %s3537_s10  ;;  %v907_v20 = vadd.f32 %v903_v6, %v883_v57  ;;  %v2167_v56 = vmul.f32 %v5553_v60, %v6619_v29  ;;  %v6626_v29 = vld [vmem:[#allocation89_spill] sm:$0xff] }
 0x1e4   : > { %1969 = vrot.lane.b32.xlu0 %v1962_v34, %s3537_s10  ;;  %v922_v2 = vadd.f32 %v918_v62, %v908_v10  ;;  %v2242_v18 = vmul.f32 %v5577_v28, %v6621_v3  ;;  %v2243_v36 = vmul.f32 %v5583_v48, %v6621_v3  ;;  %v2318_v41 = vmul.f32 %v5675_v17, %v6622_v35  ;;  %v993_v3 = vpop.permute.xlu1 %992 }
 0x1e5   : > { %v2168_v13 = vadd.f32 %v2166_v43, %v2090_v16  ;;  %v921_v62 = vadd.f32 %v916_v55, %v907_v20  ;;  %v2169_v15 = vadd.f32 %v2167_v56, %v2091_v33  ;;  %v2319_v47 = vmul.f32 %v5678_v52, %v6622_v35  ;;  %v6627_v56 = vld [vmem:[#allocation92_spill] sm:$0xff]  ;;  %v6629_v35 = vld [vmem:[#allocation93_spill] sm:$0xff] }
 0x1e6   : > { %v6623_v39 = vunpack.i.l.bf16 %v5505_v45  ;;  %v6624_v21 = vunpack.i.h.bf16 %v5505_v45  ;;  %v6625_v10 = vrot.slane %v6609_v59, 1  ;;  %v973_v16 = vrot.slane %v966_v61, 1 }
 0x1e7   : > { %v2244_v57 = vadd.f32 %v2242_v18, %v2168_v13  ;;  %v5848_v37 = vld [vmem:[#allocation2 + $0x18] sm:$0xfe]  ;;  %v5850_v55 = vld [vmem:[#allocation2 + $0x28] sm:$0xff]  ;;  %v2245_v51 = vadd.f32 %v2243_v36, %v2169_v15  ;;  %v2096_v43 = vmul.f32 %v5523_v58, %v6626_v29  ;;  %v2097_v20 = vmul.f32 %v5525_v44, %v6626_v29 }
 0x1e8   : > { %v956_v8 = vsel %vm840_vm4, %v6623_v39, %v951_v38  ;;  %v957_v6 = vsel %vm840_vm4, %v6624_v21, %v955_v53  ;;  %v972_v42 = vsel %vm937_vm2, %v6625_v10, %v971_v25  ;;  %1994 = vst.msk [vmem:[#allocation2 + $0x18] sm:$0xff] %vm806_vm3, %v5666_v40  ;;  %1995 = vst.msk [vmem:[#allocation2 + $0x28] sm:$0xff] %vm806_vm3, %v5671_v63  ;;  %v995_v63 = vpop.permute.xlu0 %994  ;;  %v6628_v18 = vld [vmem:[#allocation91_spill] sm:$0xff]  ;;  %v6630_v15 = vld [vmem:[#allocation97_spill] sm:$0xff] }
 0x1e9   : > { %v960_v34 = vadd.f32 %v956_v8, %v921_v62  ;;  %v961_v33 = vadd.f32 %v957_v6, %v922_v2  ;;  %v5858_v45 = vadd.f32 %v2318_v41, %v2244_v57  ;;  %v974_v59 = vsel %vm937_vm2, %v971_v25, %v973_v16  ;;  %v6631_v10 = vld [vmem:[#allocation99_spill] sm:$0xff] }
 0x1ea   : > { %v2102_v14 = vmul.f32 %v5523_v58, %v6627_v56  ;;  %v5865_v2 = vadd.f32 %v2319_v47, %v2245_v51  ;;  %v2103_v40 = vmul.f32 %v5525_v44, %v6627_v56  ;;  %v2172_v36 = vmul.f32 %v5545_v54, %v6628_v18  ;;  %v6632_v51 = vld [vmem:[#allocation101_spill] sm:$0xff] }
 0x1eb   : > { %v977_v61 = vadd.f32 %v972_v42, %v960_v34  ;;  %v978_v13 = vadd.f32 %v974_v59, %v961_v33  ;;  %v2173_v25 = vmul.f32 %v5553_v60, %v6628_v18  ;;  %v2178_v41 = vmul.f32 %v5545_v54, %v6629_v35 }
 0x1ec   : > { %v2179_v38 = vmul.f32 %v5553_v60, %v6629_v35  ;;  %v2248_v47 = vmul.f32 %v5577_v28, %v6630_v15  ;;  %v2249_v39 = vmul.f32 %v5583_v48, %v6630_v15  ;;  %v2174_v8 = vadd.f32 %v2172_v36, %v2096_v43 }
 0x1ed   : > { %v998_v53 = vadd.f32 %v993_v3, %v977_v61  ;;  %v999_v62 = vadd.f32 %v995_v63, %v978_v13  ;;  %v2175_v57 = vadd.f32 %v2173_v25, %v2097_v20  ;;  %v2180_v21 = vadd.f32 %v2178_v41, %v2102_v14  ;;  %v6635_v25 = vld [vmem:[#allocation72_spill] sm:$0xff] }
 0x1ee   : > { %v2181_v6 = vadd.f32 %v2179_v38, %v2103_v40  ;;  %v2254_v42 = vmul.f32 %v5577_v28, %v6631_v10  ;;  %v2255_v16 = vmul.f32 %v5583_v48, %v6631_v10  ;;  %v2324_v34 = vmul.f32 %v5675_v17, %v6632_v51  ;;  %v6633_v40 = vld [vmem:[#allocation68_spill] sm:$0xff] }
 0x1ef   : > { %1000 = vst.msk [vmem:[%s5882_s2] sm:$0xff] %vm806_vm3, %v998_v53  ;;  %1001 = vst.msk [vmem:[%s5882_s2 + $0x8] sm:$0xff] %vm806_vm3, %v999_v62  ;;  %v2325_v33 = vmul.f32 %v5678_v52, %v6632_v51  ;;  %v2250_v29 = vadd.f32 %v2248_v47, %v2174_v8  ;;  %v2251_v43 = vadd.f32 %v2249_v39, %v2175_v57  ;;  %v5900_v56 = vld [vmem:[#allocation2 + $0x18] sm:$0xfe]  ;;  %v5902_v14 = vld [vmem:[#allocation2 + $0x28] sm:$0xff] }
 0x1f0   : > { %v2330_v59 = vmul.f32 %v5675_v17, %v5491_v0  ;;  %v2331_v20 = vmul.f32 %v5678_v52, %v5491_v0  ;;  %v2256_v61 = vadd.f32 %v2254_v42, %v2180_v21  ;;  %v2257_v13 = vadd.f32 %v2255_v16, %v2181_v6  ;;  %2338 = vst.msk [vmem:[#allocation2 + $0x18] sm:$0xff] %vm806_vm3, %v5701_v9  ;;  %v6634_v0 = vld [vmem:[#allocation70_spill] sm:$0xff]  ;;  %v6636_v9 = vld [vmem:[#allocation40_spill] sm:$0xff]  ;;  %v6638_v47 = vld [vmem:[#allocation69_spill] sm:$0xff] }
 0x1f1   : > { %v1058_v3 = vmul.f32 %v6633_v40, %v5682_v50  ;;  %2339 = vst.msk [vmem:[#allocation2 + $0x28] sm:$0xff] %vm806_vm3, %v5716_v24  ;;  %v5910_v63 = vadd.f32 %v2324_v34, %v2250_v29  ;;  %v5912_v18 = vadd.f32 %v2325_v33, %v2251_v43  ;;  %v1134_v36 = vmul.f32 %v6634_v0, %v5699_v11  ;;  %v6637_v24 = vld [vmem:[#allocation67_spill] sm:$0xff]  ;;  %v6639_v8 = vld [vmem:[#allocation102_spill] sm:$0xff]  ;;  %v3221_v16 = vld [vmem:[%s4008_s5 + $0x18] sm:$0xff] }
 0x1f2   : > { %v1210_v35 = vmul.f32 %v6635_v25, %v5725_v27  ;;  %v5918_v41 = vadd.f32 %v2330_v59, %v2256_v61  ;;  %v5920_v38 = vadd.f32 %v2331_v20, %v2257_v13  ;;  %v1286_v62 = vmul.f32 %v6636_v9, %v5730_v23  ;;  %v2341_v21 = vld [vmem:[#allocation2 + $0x8] sm:$0x80]  ;;  %v6641_v33 = vld [vmem:[#allocation48_spill] sm:$0xff]  ;;  %v6642_v20 = vld [vmem:[#allocation45_spill] sm:$0xff] }
 0x1f3   : > { %v1136_v53 = vadd.f32 %v1134_v36, %v1058_v3  ;;  %v1057_v15 = vmul.f32 %v6637_v24, %v5682_v50  ;;  %v1133_v39 = vmul.f32 %v6638_v47, %v5699_v11  ;;  %v3183_v57 = vunpack.i.h.bf16 %v6639_v8  ;;  %v6640_v6 = vld [vmem:[#allocation71_spill] sm:$0xff]  ;;  %v6643_v13 = vld [vmem:[#allocation44_spill] sm:$0xff]  ;;  %v1348_v36 = vpop.permute.xlu1 %1347  ;;  %v1344_v47 = vpop.permute.xlu0 %1343 }
 0x1f4   : > { %v1209_v10 = vmul.f32 %v6640_v6, %v5725_v27  ;;  %v1314_v51 = vadd.f32 %v3221_v16, %v5733_v4  ;;  %v1285_v29 = vmul.f32 %v6641_v33, %v5730_v23  ;;  %v1357_v43 = vld [vmem:[#allocation2 + $0x8] sm:$0x80]  ;;  %v3182_v59 = vunpack.i.l.bf16 %v6639_v8  ;;  %v3222_v9 = vld [vmem:[%s4008_s5 + $0x10] sm:$0xff] }
 0x1f5   : > { %v1212_v42 = vadd.f32 %v1210_v35, %v1136_v53  ;;  %v1135_v34 = vadd.f32 %v1133_v39, %v1057_v15  ;;  %v1364_v61 = vrot.slane %v6642_v20, 7  ;;  %v1366_v40 = vrot.slane %v6643_v13, 7 }
 0x1f6   : > { %v2355_v3 = vrot.slane %v2341_v21, 7  ;;  %v1313_v35 = vadd.f32 %v3222_v9, %v5733_v4  ;;  %v1350_v15 = vsel %vm840_vm4, %v3183_v57, %v1348_v36  ;;  %v1363_v39 = vrot.slane %v1357_v43, 7  ;;  %v6645_v57 = vld [vmem:[#allocation55_spill] sm:$0xff]  ;;  %v6646_v36 = vld [vmem:[#allocation98_spill] sm:$0xff] }
 0x1f7   : > { %v1288_v0 = vadd.f32 %v1286_v62, %v1212_v42  ;;  %v1211_v25 = vadd.f32 %v1209_v10, %v1135_v34  ;;  %v2343_v53 = vld [vmem:[#allocation2 + $0x18] sm:$0xff]  ;;  %v1349_v21 = vsel %vm840_vm4, %v3182_v59, %v1344_v47  ;;  %v1367_v10 = vsel %vm821_vm1, %v1364_v61, %v1366_v40  ;;  %v6644_v42 = vld [vmem:[#allocation56_spill] sm:$0xff] }
 0x1f8   : > { %v2345_v24 = vld [vmem:[#allocation2 + $0x28] sm:$0x7f]  ;;  %v2356_v6 = vrot.slane %v2343_v53, 7  ;;  %2376 = vst.msk [vmem:[#allocation2 + $0x18] sm:$0xff] %vm806_vm3, %v5703_v46  ;;  %v1565_v34 = vmul.f32 %v6644_v42, %v5682_v50  ;;  %v1641_v33 = vmul.f32 %v6645_v57, %v5699_v11  ;;  %v6648_v53 = vld [vmem:[#allocation58_spill] sm:$0xff] }
 0x1f9   : > { %v2360_v16 = vrot.slane %v2345_v24, 7  ;;  %2377 = vst.msk [vmem:[#allocation2 + $0x28] sm:$0xff] %vm806_vm3, %v5719_v22  ;;  %v1316_v62 = vadd.f32 %v1314_v51, %v1288_v0  ;;  %v1287_v8 = vadd.f32 %v1285_v29, %v1211_v25  ;;  %v3168_v22 = vunpack.i.h.bf16 %v6646_v36  ;;  %v6647_v0 = vld [vmem:[#allocation61_spill] sm:$0xff] }
 0x1fa   : > { %v2357_v20 = vsel %vm821_vm1, %v2355_v3, %v2356_v6  ;;  %v1365_v51 = vsel %vm821_vm1, %v1363_v39, %v1364_v61  ;;  %v1643_v29 = vadd.f32 %v1641_v33, %v1565_v34  ;;  %v1717_v25 = vmul.f32 %v6647_v0, %v5725_v27 }
 0x1fb   : > { %v2361_v43 = vsel %vm821_vm1, %v2356_v6, %v2360_v16  ;;  %v1354_v46 = vadd.f32 %v1350_v15, %v1316_v62  ;;  %v1315_v13 = vadd.f32 %v1313_v35, %v1287_v8  ;;  %2364 = vrot.lane.b32.xlu0 %v2357_v20, %s3537_s10  ;;  %v1793_v3 = vmul.f32 %v5133_v31, %v5730_v23  ;;  %v6649_v15 = vld [vmem:[#allocation57_spill] sm:$0xff]  ;;  %v6650_v6 = vld [vmem:[#allocation62_spill] sm:$0xff] }
 0x1fc   : > { %2368 = vrot.lane.b32.xlu1 %v2361_v43, %s3537_s10  ;;  %v1388_v9 = vpop.permute.xlu1 %1387  ;;  %v1386_v35 = vpop.permute.xlu0 %1385  ;;  %v1566_v24 = vmul.f32 %v6648_v53, %v5682_v50  ;;  %v1642_v47 = vmul.f32 %v6649_v15, %v5699_v11  ;;  %v1718_v61 = vmul.f32 %v6650_v6, %v5725_v27  ;;  %v1872_v39 = vrot.slane %v5570_v1, 7 }
 0x1fd   : > { %v1353_v59 = vadd.f32 %v1349_v21, %v1315_v13  ;;  %v1371_v40 = vadd.f32 %v1367_v10, %v1354_v46  ;;  %v3167_v16 = vunpack.i.l.bf16 %v6646_v36  ;;  %v1719_v8 = vadd.f32 %v1717_v25, %v1643_v29  ;;  %v3223_v21 = vld [vmem:[%s4008_s5 + $0x20] sm:$0xff]  ;;  %v3224_v29 = vld [vmem:[%s4008_s5 + $0x28] sm:$0xff]  ;;  %v3225_v25 = vld [vmem:[%s4008_s5 + $0x38] sm:$0xff] }
 0x1fe   : > { %v1821_v31 = vadd.f32 %v3223_v21, %v5733_v4  ;;  %v1644_v57 = vadd.f32 %v1642_v47, %v1566_v24  ;;  %v1794_v33 = vmul.f32 %v5158_v12, %v5730_v23  ;;  %v1874_v43 = vrot.slane %v5568_v5, 7 }
 0x1ff   : > { %v1370_v62 = vadd.f32 %v1365_v51, %v1353_v59  ;;  %v5971_v42 = vld [vmem:[#allocation2 + $0x18] sm:$0xff]  ;;  %v1392_v34 = vadd.f32 %v1388_v9, %v1371_v40  ;;  %v1795_v46 = vadd.f32 %v1793_v3, %v1719_v8  ;;  %v2079_v13 = vmul.f32 %v5525_v44, %v5682_v50 }
 0x200   : > { %v2380_v10 = vld [vmem:[#allocation2 + $0x28] sm:$0x7f]  ;;  %2393 = vst.msk [vmem:[#allocation2 + $0x18] sm:$0xff] %vm806_vm3, %v5705_v19  ;;  %v2155_v36 = vmul.f32 %v5553_v60, %v5699_v11  ;;  %v1720_v51 = vadd.f32 %v1718_v61, %v1644_v57  ;;  %v1822_v12 = vadd.f32 %v3224_v29, %v5733_v4  ;;  %v5989_v5 = vsel %vm821_vm1, %v1872_v39, %v1874_v43 }
 0x201   : > { %2394 = vst.msk [vmem:[#allocation2 + $0x28] sm:$0xff] %vm806_vm3, %v5722_v49  ;;  %v1391_v20 = vadd.f32 %v1386_v35, %v1370_v62  ;;  %v2231_v19 = vmul.f32 %v5583_v48, %v5725_v27  ;;  %v2395_v49 = vld [vmem:[#allocation2 + $0x8] sm:$0x80]  ;;  %v1406_v59 = vpop.permute.xlu1 %1405  ;;  %v1410_v40 = vpop.permute.xlu0 %1409  ;;  %v5993_v0 = vadd.f32 %v1821_v31, %v1795_v46  ;;  %v2307_v60 = vmul.f32 %v5678_v52, %v5730_v23 }
 0x202   : > { %v2157_v44 = vadd.f32 %v2155_v36, %v2079_v13  ;;  %v2335_v3 = vadd.f32 %v3225_v25, %v5733_v4  ;;  %v1411_v9 = vsel %vm840_vm4, %v3167_v16, %v1406_v59  ;;  %v1412_v35 = vsel %vm840_vm4, %v3168_v22, %v1410_v40  ;;  %v6651_v36 = vld [vmem:[#allocation103_spill] sm:$0xff]  ;;  %v2459_v25 = vld [vmem:[#allocation2 + $0x38] sm:$0x1] }
 0x203   : > { %v1796_v53 = vadd.f32 %v1794_v33, %v1720_v51  ;;  %v2078_v48 = vmul.f32 %v5523_v58, %v5682_v50  ;;  %v1415_v24 = vadd.f32 %v1411_v9, %v1391_v20  ;;  %v1416_v15 = vadd.f32 %v1412_v35, %v1392_v34  ;;  %v3226_v34 = vld [vmem:[%s4008_s5 + $0x30] sm:$0xff]  ;;  %v6653_v35 = vld [vmem:[#allocation94_spill] sm:$0xff]  ;;  %s2984_s5 = sshll.u32 %s6465_s4, 3  ;;  %s6156_s4 = scalar_lea.sflag [#allocation6], %s411_s25 }
 0x204   : > { %v2233_v47 = vadd.f32 %v2231_v19, %v2157_v44  ;;  %v2154_v6 = vmul.f32 %v5545_v54, %v5699_v11  ;;  %v2401_v61 = vrot.slane %v2395_v49, 7  ;;  %v2230_v62 = vmul.f32 %v5577_v28, %v5725_v27  ;;  %v6652_v44 = vld [vmem:[#allocation95_spill] sm:$0xff] }
 0x205   : > { %v6005_v52 = vadd.f32 %v1822_v12, %v1796_v53  ;;  %v2306_v22 = vmul.f32 %v5675_v17, %v5730_v23  ;;  %v2385_v21 = vrot.slane %v5971_v42, 7  ;;  %v2387_v58 = vrot.slane %v2380_v10, 7 }
 0x206   : > { %v2309_v16 = vadd.f32 %v2307_v60, %v2233_v47  ;;  %v2156_v8 = vadd.f32 %v2154_v6, %v2078_v48  ;;  %v2334_v57 = vadd.f32 %v3226_v34, %v5733_v4  ;;  %v1986_v54 = vrot.slane %v5850_v55, 1  ;;  %v1998_v48 = vld [vmem:[#allocation2 + $0x38] sm:$0x1] }
 0x207   : > { %v2396_v50 = vld [vmem:[#allocation2 + $0x18] sm:$0xff]  ;;  %v6024_v27 = vsel %vm821_vm1, %v2385_v21, %v2387_v58  ;;  %v1985_v23 = vrot.slane %v5848_v37, 1  ;;  %v3188_v51 = vunpack.i.h.bf16 %v6651_v36  ;;  %v3187_v29 = vunpack.i.l.bf16 %v6651_v36 }
 0x208   : > { %v2397_v31 = vld [vmem:[#allocation2 + $0x28] sm:$0x7f]  ;;  %v2402_v11 = vrot.slane %v2396_v50, 7  ;;  %2414 = vst.msk [vmem:[#allocation2 + $0x18] sm:$0xff] %vm806_vm3, %v5797_v30  ;;  %v6019_v28 = vadd.f32 %v2335_v3, %v2309_v16  ;;  %v2232_v17 = vadd.f32 %v2230_v62, %v2156_v8  ;;  %v1478_v60 = vrot.slane %v6652_v44, 1 }
 0x209   : > { %v2404_v33 = vrot.slane %v2397_v31, 7  ;;  %2415 = vst.msk [vmem:[#allocation2 + $0x28] sm:$0xff] %vm806_vm3, %v5799_v7  ;;  %v6034_v30 = vsel %vm937_vm2, %v1985_v23, %v1986_v54  ;;  %v1424_v37 = vpop.permute.xlu1 %1423  ;;  %v1426_v13 = vpop.permute.xlu0 %1425  ;;  %v1477_v53 = vrot.slane %v6653_v35, 1  ;;  %v2474_v47 = vrot.slane %v2459_v25, 1 }
 0x20a   : > { %v2403_v10 = vsel %vm821_vm1, %v2401_v61, %v2402_v11  ;;  %v2308_v43 = vadd.f32 %v2306_v22, %v2232_v17  ;;  %v1430_v49 = vadd.f32 %v1426_v13, %v1416_v15  ;;  %v2005_v58 = vrot.slane %v1998_v48, 1 }
 0x20b   : > { %v2405_v4 = vsel %vm821_vm1, %v2402_v11, %v2404_v33  ;;  %2406 = vrot.lane.b32.xlu0 %v2403_v10, %s3538_s8  ;;  %v1479_v22 = vsel %vm937_vm2, %v1477_v53, %v1478_v60  ;;  %v2002_v50 = vrot.slane %v5900_v56, 1  ;;  %v1865_v10 = vld [vmem:[#allocation2 + $0x8] sm:$0x80]  ;;  %v6655_v53 = vld [vmem:[#allocation73_spill] sm:$0xff] }
 0x20c   : > { %2408 = vrot.lane.b32.xlu1 %v2405_v4, %s3538_s8  ;;  %v6036_v7 = vadd.f32 %v2334_v57, %v2308_v43  ;;  %v1871_v36 = vrot.slane %v1865_v10, 7  ;;  %v3203_v48 = vunpack.i.h.bf16 %v6655_v53 }
 0x20f   : > { %v2417_v46 = vld [vmem:[#allocation2 + $0x18] sm:$0xff] }
 0x210   : > { %v2419_v20 = vld [vmem:[#allocation2 + $0x28] sm:$0xff]  ;;  %2426 = vrot.lane.b32.xlu0 %v2417_v46, %s3537_s10  ;;  %2438 = vst.msk [vmem:[#allocation2 + $0x18] sm:$0xff] %vm806_vm3, %v5808_v32  ;;  %v1429_v32 = vadd.f32 %v1424_v37, %v1415_v24  ;;  %v2003_v24 = vrot.slane %v5902_v14, 1  ;;  %v6654_v46 = vld [vmem:[#allocation105_spill] sm:$0xff] }
 0x211   : > { %2439 = vst.msk [vmem:[#allocation2 + $0x28] sm:$0xff] %vm806_vm3, %v5810_v26  ;;  %2430 = vrot.lane.b32.xlu1 %v2419_v20, %s3537_s10  ;;  %v1473_v26 = vld [vmem:[#allocation2 + $0x38] sm:$0x1]  ;;  %v3193_v37 = vunpack.i.h.bf16 %v6654_v46  ;;  %v3192_v13 = vunpack.i.l.bf16 %v6654_v46 }
 0x212   : > { %v2004_v11 = vsel %vm937_vm2, %v2002_v50, %v2003_v24 }
 0x214   : > { %v1462_v59 = vpop.permute.xlu1 %1461  ;;  %v1458_v40 = vpop.permute.xlu0 %1457 }
 0x215   : > { %v1464_v3 = vsel %vm840_vm4, %v3188_v51, %v1462_v59  ;;  %v1463_v9 = vsel %vm840_vm4, %v3187_v29, %v1458_v40 }
 0x216   : > { %v1468_v6 = vadd.f32 %v1464_v3, %v1430_v49  ;;  %v1467_v61 = vadd.f32 %v1463_v9, %v1429_v32  ;;  %v1873_v32 = vsel %vm821_vm1, %v1871_v36, %v1872_v39 }
 0x217   : > { %v2440_v19 = vld [vmem:[#allocation2 + $0x18] sm:$0xff] }
 0x218   : > { %v2441_v12 = vld [vmem:[#allocation2 + $0x28] sm:$0xff]  ;;  %2444 = vrot.lane.b32.xlu0 %v2440_v19, %s3538_s8  ;;  %2452 = vst.msk [vmem:[#allocation2 + $0x18] sm:$0xff] %vm806_vm3, %v5858_v45  ;;  %v1484_v57 = vadd.f32 %v1479_v22, %v1467_v61 }
 0x219   : > { %2453 = vst.msk [vmem:[#allocation2 + $0x28] sm:$0xff] %vm806_vm3, %v5865_v2  ;;  %2446 = vrot.lane.b32.xlu1 %v2441_v12, %s3538_s8  ;;  %v1480_v2 = vrot.slane %v1473_v26, 1 }
 0x21b   : > { %v1481_v15 = vsel %vm937_vm2, %v1478_v60, %v1480_v2 }
 0x21c   : > { %v1485_v14 = vadd.f32 %v1481_v15, %v1468_v6  ;;  %v1981_v15 = vld [vmem:[#allocation2 + $0x38] sm:$0x1] }
 0x21f   : > { %v2455_v62 = vld [vmem:[#allocation2 + $0x18] sm:$0xfe] }
 0x220   : > { %v2457_v45 = vld [vmem:[#allocation2 + $0x28] sm:$0xff]  ;;  %v2469_v8 = vrot.slane %v2455_v62, 1  ;;  %2490 = vst.msk [vmem:[#allocation2 + $0x18] sm:$0xff] %vm806_vm3, %v5910_v63 }
 0x221   : > { %v2470_v16 = vrot.slane %v2457_v45, 1  ;;  %2491 = vst.msk [vmem:[#allocation2 + $0x28] sm:$0xff] %vm806_vm3, %v5912_v18  ;;  %v2006_v18 = vsel %vm937_vm2, %v2003_v24, %v2005_v58  ;;  %v6656_v58 = vld [vmem:[#allocation50_spill] sm:$0xff] }
 0x222   : > { %v3213_v50 = vunpack.i.h.bf16 %v6656_v58 }
 0x223   : > { %v2475_v31 = vsel %vm937_vm2, %v2470_v16, %v2474_v47  ;;  %v2471_v34 = vsel %vm937_vm2, %v2469_v8, %v2470_v16  ;;  %v1988_v8 = vrot.slane %v1981_v15, 1 }
 0x224   : > { %2482 = vrot.lane.b32.xlu1 %v2475_v31, %s3537_s10  ;;  %2478 = vrot.lane.b32.xlu0 %v2471_v34, %s3537_s10  ;;  %v3212_v31 = vunpack.i.l.bf16 %v6656_v58  ;;  %s6661_s10 = sld [smem:[#allocation34_spill]] }
 0x225   : > { %v1502_v63 = vpop.permute.xlu1 %1501  ;;  %v1500_v33 = vpop.permute.xlu0 %1499 }
 0x226   : > { %v1506_v17 = vadd.f32 %v1502_v63, %v1485_v14  ;;  %v1505_v56 = vadd.f32 %v1500_v33, %v1484_v57  ;;  %v1989_v33 = vsel %vm937_vm2, %v1986_v54, %v1988_v8 }
 0x227   : > { %v2492_v4 = vld [vmem:[#allocation2 + $0x18] sm:$0xfe] }
 0x228   : > { %v6070_v23 = vld [vmem:[#allocation2 + $0x28] sm:$0xff]  ;;  %2009 = vrot.lane.b32.xlu1 %v2006_v18, %s3538_s8  ;;  %2007 = vrot.lane.b32.xlu0 %v2004_v11, %s3538_s8  ;;  %2507 = vst.msk [vmem:[#allocation2 + $0x18] sm:$0xff] %vm806_vm3, %v5918_v41  ;;  %2863 = vst.msk [vmem:[%s5882_s2 + $0x18] sm:$0xff] %vm806_vm3, %v1506_v17  ;;  %v2498_v20 = vrot.slane %v2492_v4, 1 }
 0x229   : > { %2508 = vst.msk [vmem:[#allocation2 + $0x28] sm:$0xff] %vm806_vm3, %v5920_v38  ;;  %2862 = vst.msk [vmem:[%s5882_s2 + $0x10] sm:$0xff] %vm806_vm3, %v1505_v56  ;;  %v2499_v43 = vrot.slane %v6070_v23, 1  ;;  %v2511_v38 = vld [vmem:[#allocation2 + $0x38] sm:$0x1] }
 0x22a   : > { %v2518_v12 = vrot.slane %v2511_v38, 1  ;;  %p6664_p9 = scmp.ne.s32.totalorder %s6661_s10, 0 }
 0x22b   : > { %v6088_v51 = vsel %vm937_vm2, %v2498_v20, %v2499_v43  ;;  %v2378_v20 = vld [vmem:[#allocation2 + $0x8] sm:$0x80] }
 0x22c   : > { %v2384_v46 = vrot.slane %v2378_v20, 7  ;;  %p3362_p1 = pnand %p3361_p6, %p6664_p9 }
 0x22d   : > { %v1852_v29 = vpop.permute.xlu1 %1851  ;;  %v1856_v41 = vpop.permute.xlu0 %1855 }
 0x22e   : > { %v1857_v19 = vsel %vm840_vm4, %v3192_v13, %v1852_v29  ;;  %v1858_v26 = vsel %vm840_vm4, %v3193_v37, %v1856_v41  ;;  %v6657_v37 = vld [vmem:[#allocation104_spill] sm:$0xff]  ;;  %v2386_v55 = vsel %vm821_vm1, %v2384_v46, %v2385_v21  ;;  %p3363_p2 = pneg %p3362_p1 }
 0x22f   : > { %v2509_v59 = vld [vmem:[#allocation2 + $0x18] sm:$0xfe]  ;;  %v1861_v40 = vadd.f32 %v1857_v19, %v5993_v0  ;;  %v1862_v44 = vadd.f32 %v1858_v26, %v6005_v52  ;;  %v3202_v0 = vunpack.i.l.bf16 %v6655_v53  ;;  %v3198_v13 = vunpack.i.h.bf16 %v6657_v37 }
 0x230   : > { %v2510_v49 = vld [vmem:[#allocation2 + $0x28] sm:$0xff]  ;;  %v2515_v25 = vrot.slane %v2509_v59, 1  ;;  %v3197_v36 = vunpack.i.l.bf16 %v6657_v37  ;;  %v6658_v59 = vld [vmem:[#allocation64_spill] sm:$0xff]  ;;  %p3370_p4 = pnand %p3369_p10, %p3363_p2 }
 0x231   : > { %v2516_v60 = vrot.slane %v2510_v49, 1  ;;  %v1879_v3 = vadd.f32 %v5989_v5, %v1862_v44  ;;  %v1878_v9 = vadd.f32 %v1873_v32, %v1861_v40  ;;  %v3208_v40 = vunpack.i.h.bf16 %v6658_v59 }
 0x232   : > { %v3207_v44 = vunpack.i.l.bf16 %v6658_v59 }
 0x233   : > { %v2519_v2 = vsel %vm937_vm2, %v2516_v60, %v2518_v12  ;;  %v2517_v35 = vsel %vm937_vm2, %v2515_v25, %v2516_v60 }
 0x234   : > { %2522 = vrot.lane.b32.xlu1 %v2519_v2, %s3538_s8  ;;  %2520 = vrot.lane.b32.xlu0 %v2517_v35, %s3538_s8  ;;  %s2979_s8 = sshll.u32 %s6660_s26, 4 }
 0x235   : > { %s2545_s29 = sadd.s32 %s2984_s5, %s2979_s8 }
 0x236   : > { %s2980_s7 = sshll.u32 %s2545_s29, 7 }
 0x237   : > { %s6146_s19 = scalar_lea.hbm %s6662_s14, %s2980_s7 }
 0x23d   : > { %v1896_v1 = vpop.permute.xlu1 %1895 }
 0x23e   : > { %v1894_v39 = vpop.permute.xlu0 %1893  ;;  %v1900_v52 = vadd.f32 %v1896_v1, %v1879_v3 }
 0x23f   : > { %v1899_v47 = vadd.f32 %v1894_v39, %v1878_v9  ;;  %v6659_v39 = vld [vmem:[#allocation54_spill] sm:$0xff] }
 0x240   : > { %v3218_v53 = vunpack.i.h.bf16 %v6659_v39 }
 0x242   : > { %v1914_v6 = vpop.permute.xlu1 %1913  ;;  %v1918_v61 = vpop.permute.xlu0 %1917 }
 0x243   : > { %v1919_v5 = vsel %vm840_vm4, %v3202_v0, %v1914_v6  ;;  %v1920_v45 = vsel %vm840_vm4, %v3203_v48, %v1918_v61  ;;  %v3217_v48 = vunpack.i.l.bf16 %v6659_v39 }
 0x244   : > { %v1924_v62 = vadd.f32 %v1920_v45, %v1900_v52  ;;  %v1923_v24 = vadd.f32 %v1919_v5, %v1899_v47 }
 0x24a   : > { %v1934_v22 = vpop.permute.xlu1 %1933  ;;  %v1932_v16 = vpop.permute.xlu0 %1931 }
 0x24b   : > { %v1938_v34 = vadd.f32 %v1934_v22, %v1924_v62  ;;  %v1937_v14 = vadd.f32 %v1932_v16, %v1923_v24 }
 0x255   : > { %v1966_v57 = vpop.permute.xlu1 %1965 }
 0x256   : > { %v1970_v18 = vpop.permute.xlu0 %1969  ;;  %v1971_v11 = vsel %vm840_vm4, %v3212_v31, %v1966_v57 }
 0x257   : > { %v1972_v63 = vsel %vm840_vm4, %v3213_v50, %v1970_v18  ;;  %v1975_v17 = vadd.f32 %v1971_v11, %v1937_v14 }
 0x258   : > { %v1976_v56 = vadd.f32 %v1972_v63, %v1938_v34 }
 0x259   : > { %v1992_v10 = vadd.f32 %v6034_v30, %v1975_v17 }
 0x25a   : > { %v1993_v4 = vadd.f32 %v1989_v33, %v1976_v56 }
 0x26d   : > { %v2365_v29 = vpop.permute.xlu0 %2364 }
 0x26e   : > { %v2369_v38 = vpop.permute.xlu1 %2368  ;;  %v2370_v12 = vsel %vm840_vm4, %v3197_v36, %v2365_v29 }
 0x26f   : > { %v2371_v41 = vsel %vm840_vm4, %v3198_v13, %v2369_v38  ;;  %v2374_v30 = vadd.f32 %v2370_v12, %v6036_v7  ;;  %v2494_v7 = vld [vmem:[#allocation2 + $0x38] sm:$0x1] }
 0x270   : > { %v2375_v54 = vadd.f32 %v2371_v41, %v6019_v28  ;;  %v2501_v1 = vrot.slane %v2494_v7, 1 }
 0x271   : > { %v2391_v26 = vadd.f32 %v2386_v55, %v2374_v30 }
 0x272   : > { %v2392_v19 = vadd.f32 %v6024_v27, %v2375_v54  ;;  %v2502_v45 = vsel %vm937_vm2, %v2499_v43, %v2501_v1 }
 0x27d   : > { %v2407_v49 = vpop.permute.xlu0 %2406 }
 0x27e   : > { %v2409_v32 = vpop.permute.xlu1 %2408  ;;  %v2412_v25 = vadd.f32 %v2407_v49, %v2391_v26 }
 0x27f   : > { %v2413_v60 = vadd.f32 %v2409_v32, %v2392_v19 }
 0x282   : > { %v2427_v9 = vpop.permute.xlu0 %2426 }
 0x283   : > { %v2431_v3 = vpop.permute.xlu1 %2430  ;;  %v2432_v21 = vsel %vm840_vm4, %v3207_v44, %v2427_v9 }
 0x284   : > { %v2433_v42 = vsel %vm840_vm4, %v3208_v40, %v2431_v3  ;;  %v2436_v2 = vadd.f32 %v2432_v21, %v2412_v25 }
 0x285   : > { %v2437_v28 = vadd.f32 %v2433_v42, %v2413_v60 }
 0x28a   : > { %v2445_v27 = vpop.permute.xlu0 %2444 }
 0x28b   : > { %v2447_v35 = vpop.permute.xlu1 %2446  ;;  %v2450_v52 = vadd.f32 %v2445_v27, %v2436_v2 }
 0x28c   : > { %v2451_v0 = vadd.f32 %v2447_v35, %v2437_v28 }
 0x296   : > { %v2483_v47 = vpop.permute.xlu1 %2482  ;;  %v2479_v6 = vpop.permute.xlu0 %2478 }
 0x297   : > { %v2485_v61 = vsel %vm840_vm4, %v3218_v53, %v2483_v47  ;;  %v2484_v5 = vsel %vm840_vm4, %v3217_v48, %v2479_v6 }
 0x298   : > { %v2489_v62 = vadd.f32 %v2485_v61, %v2451_v0  ;;  %v2488_v24 = vadd.f32 %v2484_v5, %v2450_v52 }
 0x29a   : > { %v2010_v15 = vpop.permute.xlu1 %2009  ;;  %v2008_v22 = vpop.permute.xlu0 %2007  ;;  %v2506_v16 = vadd.f32 %v2502_v45, %v2489_v62  ;;  %v2505_v8 = vadd.f32 %v6088_v51, %v2488_v24 }
 0x29b   : > { %v2014_v58 = vadd.f32 %v2010_v15, %v1993_v4  ;;  %v2013_v50 = vadd.f32 %v2008_v22, %v1992_v10 }
 0x29d   : > { %2920 = vst.msk [vmem:[%s5882_s2 + $0x28] sm:$0xff] %vm806_vm3, %v2014_v58  ;;  %2919 = vst.msk [vmem:[%s5882_s2 + $0x20] sm:$0xff] %vm806_vm3, %v2013_v50 }
 0x2a6   : > { %v2523_v23 = vpop.permute.xlu1 %2522  ;;  %v2521_v43 = vpop.permute.xlu0 %2520 }
 0x2a7   : > { %v2527_v51 = vadd.f32 %v2523_v23, %v2506_v16  ;;  %v2526_v31 = vadd.f32 %v2521_v43, %v2505_v8 }
 0x2a9   : > { %2975 = vst.msk [vmem:[%s5882_s2 + $0x38] sm:$0xff] %vm806_vm3, %v2527_v51  ;;  %2974 = vst.msk [vmem:[%s5882_s2 + $0x30] sm:$0xff] %vm806_vm3, %v2526_v31 }
 0x2aa   : > { %3373 = shalt.err (!%p3370_p4)
}
 0x2ab   : > { %s3374_s25 = scalar_lea.hbm %s6146_s19, 1024  ;;  %s3378_s6 = scalar_lea.hbm %s6663_s17, 4096 }
 0x2ac   : > { %p3375_p7 = scmp.ne.s32.totalorder %s6146_s19, %s3374_s25  ;;  %p3379_p0 = scmp.lt.u32.totalorder %s6146_s19, %s6663_s17 }
 0x2ad   : > { %p3380_p5 = scmp.lt.u32.totalorder %s3378_s6, %s3374_s25  ;;  %p3382_p6 = scmp.lt.u32.totalorder %s3374_s25, %s6146_s19 }
 0x2ae   : > { %p3376_p8 = pnand %p3375_p7, %p6664_p9 }
 0x2af   : > { %p3381_p12 = por %p3380_p5, %p3379_p0 }
 0x2b0   : > { %p3377_p13 = pneg %p3376_p8 }
 0x2b1   : > { %p3383_p1 = por %p3382_p6, %p3381_p12 }
 0x2b3   : > { %p3384_p2 = pnand %p3383_p1, %p3377_p13 }
 0x2b5   : > { %3387 = shalt.err (!%p3384_p2)
}
 0x2b6   : > { %s3540_s2 = smov 128   ;;  %s3541_s26 = smov 8  }
 0x2b7   : > { %3003 = dma.vmem_to_hbm [thread:$0]  (%p6664_p9), %s6148_s16, 1024, %s6146_s19, %s6156_s4, %s3540_s2, %s3540_s2, %s3541_s26  }
 0x2b8 PF: > { %s6665_s5 = sld [smem:[#allocation26_spill]]  ;;  %s6666_s8 = sld [smem:[#allocation33_spill]] }
 0x2b9   : > { %p3036_p11 = scmp.ge.s32.totalorder %s3526_s15, 2 }
 0x2be   : > { %s2563_s29 = sand.u32 1, %s6665_s5   ;;  %p6667_p3 = scmp.ne.s32.totalorder %s6666_s8, 0 }
 0x2bf   : > { %s2564_s7 = scalar_lea.sflag [#allocation6], %s2563_s29 }
 0x2c0   : > { %p3026_p10 = pnand %p3036_p11, %p6667_p3 }
 0x2c2   : > { %3469 = dma.done.wait (!%p3026_p10), %s2564_s7, 1024  }
 0x2c3   : > { %3471 = vsyncadd (!%p3026_p10), %s2564_s7, 4294966272  ;;  %s30_s15 = sadd.s32 1, %s3526_s15   ;;  %s6669_s26 = sld [smem:[#allocation25_spill]] }
 0x2c4   : > { %p6185_p4 = scmp.ge.s32.totalorder %s30_s15, 6   ;;  %s6670_s10 = sld [smem:[#allocation37_spill]] }
 0x2c5   : > { %s6671_s16 = sld [smem:[#allocation27_spill]]  ;;  %s6672_s14 = sld [smem:[#allocation36_spill]] }
 0x2c6   : > { %s6673_s11 = sld [smem:[#allocation30_spill]]  ;;  %s6674_s19 = sld [smem:[#allocation31_spill]] }
 0x2c7   : > { %s6675_s4 = sld [smem:[#allocation32_spill]]  ;;  %s6676_s18 = sld [smem:[#allocation35_spill]] }
 0x2c8   : > { %s6678_s27 = smov %s3482_s28  ;;  %s6679_s28 = smov %s3934_s13 }
 0x2c9   : > { %s6680_s29 = smov %s3490_s30  ;;  %s6681_s30 = smov %s3494_s3 }
 0x2ca   : > { %s6682_s3 = smov %s6670_s10  ;;  %s6683_s8 = smov %s3502_s9 }
 0x2cb   : > { %s6684_s9 = smov %s6671_s16  ;;  %s6685_s10 = smov %s6672_s14 }
 0x2cc   : > { %s6686_s12 = smov %s6674_s19  ;;  %29 = sbr.rel (!%p6185_p4) target bundleno = 24 (0x18), region = 137 }
 0x2cd   : > { %s6687_s13 = smov %s6675_s4  ;;  %s6688_s14 = smov %s6676_s18 }
 0x2d3   :  { %2569 = vsyncpa [#allocation5], 1 }
 0x2d4   :  { %2571 = vsyncpa [#allocation5 + $0x1], 1 }
 0x2d5   :  { %2572 = vsyncpa [#allocation14], 1 }
 0x2d6   :  { %2574 = vsyncpa [#allocation14 + $0x1], 1 }
 0x2d7   :  { %2575 = vsyncpa [#allocation6], 1 }
 0x2d8   :  { %2577 = vsyncpa [#allocation6 + $0x1], 1 }
 0x2d9   :  { %2578 = vsyncpa [#allocation7], 1 }
 0x2da   :  { %2580 = vsyncpa [#allocation7 + $0x1], 1 }
 0x2db   :  { %2581 = vsyncpa [#allocation8], 1 }
 0x2dc   :  { %2583 = vsyncpa [#allocation8 + $0x1], 1 }
 0x2dd   :  { %2584 = vsyncpa [#allocation11], 1 }

</bundles_post_ra>
